<compile_context>
chip_gen: v7x
topology: tpu7x:2x2x1
jax: 0.10.0
libtpu: 0.0.40
codegen_flags: <defaults>
</compile_context>

<pallas_src>
import functools
import math

import jax
import jax.numpy as jnp
from jax.experimental import pallas as pl
from jax.experimental.pallas import tpu as pltpu

BN_EPS = 0.8
LRELU_SLOPE = 0.2
LANE = 128
HIDDEN_DIMS = (128, 256, 512, 1024)


def _round_up(x, m):
    return (x + m - 1) // m * m


def _bf16_vpu_available():
    """v6e / v7x have a bf16 VPU; v5e and earlier do not (bf16 elementwise would
    just insert up/down converts there)."""
    try:
        kind = jax.devices()[0].device_kind.lower()
    except Exception:
        return False
    return not any(t in kind for t in ("v2", "v3", "v4", "v5"))


def _vec_layout(out_pad):
    """Static layout of the packed per-feature vector (all offsets 128-aligned)."""
    names = [("b1", HIDDEN_DIMS[0]),
             ("g2", HIDDEN_DIMS[1]), ("be2", HIDDEN_DIMS[1]),
             ("g3", HIDDEN_DIMS[2]), ("be3", HIDDEN_DIMS[2]),
             ("g4", HIDDEN_DIMS[3]), ("be4", HIDDEN_DIMS[3]),
             ("b5", out_pad)]
    offs, o = {}, 0
    for name, sz in names:
        offs[name] = (o, sz)
        o += sz
    return offs, o


# ----------------------------------------------------------------------------- kernel

def generator_kernel(zc_ref,
                     w1_ref, w2_ref, w3_ref, w4_ref, w5_ref,
                     vec_ref,
                     out_ref,
                     *, act_dtype, vec_off):
    inv_b = 1.0 / float(zc_ref.shape[0])

    def vslice(name):
        off, n = vec_off[name]
        return vec_ref[:, off:off + n]                       # static, lane-aligned slice

    def dot_bf16(x, w_ref):
        # bf16 x bf16 on the MXU, f32 accumulation. astype is a no-op when x is bf16.
        return jnp.dot(x.astype(jnp.bfloat16), w_ref[...],
                       preferred_element_type=jnp.float32)

    def lrelu(x):
        return jnp.where(x > 0, x, LRELU_SLOPE * x)

    def bn_lrelu(x, gname, bename):
        # Training-mode BatchNorm1d (biased batch variance, eps=0.8) folded into a
        # per-feature scale/shift.  Stats / rsqrt in f32; apply + LeakyReLU in act_dtype
        # (bf16 on v6e/v7x, f32 on v5e).  Linear bias is mathematically cancelled here.
        s1 = jnp.sum(x, axis=0, keepdims=True)
        s2 = jnp.sum(x * x, axis=0, keepdims=True)
        mean = s1 * inv_b
        var = s2 * inv_b - mean * mean
        scale = vslice(gname) * jax.lax.rsqrt(var + BN_EPS)
        shift = vslice(bename) - mean * scale
        y = x.astype(act_dtype) * scale.astype(act_dtype) + shift.astype(act_dtype)
        return lrelu(y)

    # layer 1: Linear(in_pad, 128) + bias, LeakyReLU (no BN)
    h = lrelu((dot_bf16(zc_ref[...], w1_ref) + vslice("b1")).astype(act_dtype))
    # layers 2-4: Linear (bias dropped, cancelled by BN) -> BN -> LeakyReLU
    h = bn_lrelu(dot_bf16(h, w2_ref), "g2", "be2")           # 128 -> 256
    h = bn_lrelu(dot_bf16(h, w3_ref), "g3", "be3")           # 256 -> 512
    h = bn_lrelu(dot_bf16(h, w4_ref), "g4", "be4")           # 512 -> 1024
    # output layer: Linear(1024, out_pad) + bias, Tanh (f32)
    out_ref[...] = jnp.tanh(dot_bf16(h, w5_ref) + vslice("b5"))


# ------------------------------------------------------------------------ params / prep

def make_generator_params(key, latent_dim, img_shape):
    """Deterministic synthetic parameters mirroring the PyTorch module's shapes (f32)."""
    out_dim = math.prod(img_shape)
    dims = [latent_dim + 10, *HIDDEN_DIMS, out_dim]

    keys = jax.random.split(key, 17)
    p = {}
    # Embedding(10, 10)
    p["embed"] = jax.random.normal(keys[0], (10, 10), jnp.float32)
    ki = 1
    for i in range(5):
        din, dout = dims[i], dims[i + 1]
        bound = 1.0 / jnp.sqrt(float(din))
        p[f"w{i+1}"] = jax.random.uniform(keys[ki], (din, dout), jnp.float32,
                                          -bound, bound)
        p[f"b{i+1}"] = jax.random.uniform(keys[ki + 1], (1, dout), jnp.float32,
                                          -bound, bound)
        ki += 2
    # BatchNorm affine params for layers 2, 3, 4 (independent keys for gamma / beta)
    for i, dout in zip((2, 3, 4), HIDDEN_DIMS[1:]):
        p[f"g{i}"] = 1.0 + 0.1 * jax.random.normal(keys[ki], (1, dout), jnp.float32)
        p[f"be{i}"] = 0.1 * jax.random.normal(keys[ki + 1], (1, dout), jnp.float32)
        ki += 2
    return p


def prepare_kernel_params(params, latent_dim, img_shape):
    """One-time prep: lane-pad, cast weights to bf16, pack small vectors into one array.

    Padding is exact (zero rows / cols), so kernel outputs match the unpadded math.
    b2/b3/b4 are intentionally omitted: they are cancelled by the training-mode BN mean
    subtraction that follows those linears.
    """
    in_dim = latent_dim + 10
    in_pad = _round_up(in_dim, LANE)
    out_dim = math.prod(img_shape)
    out_pad = _round_up(out_dim, LANE)

    # w1: pad input-feature rows with zeros (matches zero-padded zc features).
    w1 = jnp.zeros((in_pad, HIDDEN_DIMS[0]), jnp.float32).at[:in_dim].set(params["w1"])
    # w5 / b5: pad output-feature cols with zeros (extra lanes sliced off in glue).
    w5 = jnp.zeros((HIDDEN_DIMS[3], out_pad), jnp.float32).at[:, :out_dim].set(params["w5"])
    b5 = jnp.zeros((1, out_pad), jnp.float32).at[:, :out_dim].set(params["b5"])

    weights = tuple(w.astype(jnp.bfloat16)
                    for w in (w1, params["w2"], params["w3"], params["w4"], w5))

    vec_off, vec_total = _vec_layout(out_pad)
    parts = {"b1": params["b1"],
             "g2": params["g2"], "be2": params["be2"],
             "g3": params["g3"], "be3": params["be3"],
             "g4": params["g4"], "be4": params["be4"],
             "b5": b5}
    vec = jnp.concatenate([parts[name] for name in vec_off], axis=1).astype(jnp.float32)
    assert vec.shape == (1, vec_total)

    kparams = {"embed": params["embed"], "weights": weights, "vec": vec}
    return jax.tree_util.tree_map(jax.device_put, kparams), in_pad, out_pad


def _cost_estimate(batch, in_pad, out_pad):
    dims = [in_pad, *HIDDEN_DIMS, out_pad]
    mm_elems = sum(dims[i] * dims[i + 1] for i in range(5))
    flops = 2 * batch * mm_elems
    weight_bytes = mm_elems * 2                                     # bf16 weights
    vec_bytes = (HIDDEN_DIMS[0] + 2 * sum(HIDDEN_DIMS[1:]) + out_pad) * 4
    io_bytes = batch * in_pad * 2 + batch * out_pad * 4             # bf16 in, f32 out
    transcendentals = batch * out_pad + sum(HIDDEN_DIMS[1:])        # tanh + per-feature rsqrt
    return pl.CostEstimate(flops=flops, transcendentals=transcendentals,
                           bytes_accessed=weight_bytes + vec_bytes + io_bytes)


# ------------------------------------------------------------------------------ forward

@functools.partial(jax.jit,
                   static_argnames=("img_shape", "in_pad", "out_pad", "act_dtype"))
def generator_forward(z, labels, kparams, img_shape, in_pad, out_pad, act_dtype):
    # --- glue (plain JAX): embedding gather + concat + exact zero-pad + bf16 cast ---
    c = jnp.take(kparams["embed"], labels, axis=0)            # (B, 10)
    zc = jnp.concatenate([z, c], axis=1)                      # (B, latent+10)
    B, in_dim = zc.shape
    zc = jnp.pad(zc, ((0, 0), (0, in_pad - in_dim))).astype(jnp.bfloat16)

    out_dim = math.prod(img_shape)
    vec_off, _ = _vec_layout(out_pad)

    vmem_spec = pl.BlockSpec(memory_space=pltpu.MemorySpace.VMEM)
    kernel = functools.partial(generator_kernel, act_dtype=act_dtype, vec_off=vec_off)

    flat = pl.pallas_call(
        kernel,
        out_shape=jax.ShapeDtypeStruct((B, out_pad), jnp.float32),
        in_specs=[vmem_spec] * 7,
        out_specs=vmem_spec,
        cost_estimate=_cost_estimate(B, in_pad, out_pad),
    )(zc, *kparams["weights"], kparams["vec"])

    return flat[:, :out_dim].reshape((B,) + tuple(img_shape))


if __name__ == "__main__":
    latent_dim = 32
    img_shape = (1, 16, 16)   # (C, H, W); prod = 256 (already lane-aligned)
    B = 8                     # small demo batch; see TODO(synk) about feeding B >= 128

    key = jax.random.PRNGKey(0)
    kp, kz, kl = jax.random.split(key, 3)

    params = make_generator_params(kp, latent_dim, img_shape)
    kparams, in_pad, out_pad = prepare_kernel_params(params, latent_dim, img_shape)

    act_dtype = jnp.bfloat16 if _bf16_vpu_available() else jnp.float32

    z = jax.random.normal(kz, (B, latent_dim), jnp.float32)
    labels = jax.random.randint(kl, (B,), 0, 10, jnp.int32)

    img = generator_forward(z, labels, kparams, tuple(img_shape), in_pad, out_pad,
                            act_dtype)
    img = jax.block_until_ready(img)

    assert img.shape == (B,) + img_shape, img.shape
    assert bool(jnp.all(jnp.isfinite(img)))
    assert bool(jnp.all(jnp.abs(img) <= 1.0))  # tanh output range
    print("KERNEL_OK")
</pallas_src>

<mosaic_0001>
module attributes {stable_mosaic.version = 11 : i64} {
  func.func @generator_kernel(%arg0: memref<8x128xbf16, #tpu.memory_space<vmem>>, %arg1: memref<128x128xbf16, #tpu.memory_space<vmem>>, %arg2: memref<128x256xbf16, #tpu.memory_space<vmem>>, %arg3: memref<256x512xbf16, #tpu.memory_space<vmem>>, %arg4: memref<512x1024xbf16, #tpu.memory_space<vmem>>, %arg5: memref<1024x256xbf16, #tpu.memory_space<vmem>>, %arg6: memref<1x3968xf32, #tpu.memory_space<vmem>>, %arg7: memref<8x256xf32, #tpu.memory_space<vmem>>) attributes {dimension_semantics = [], scalar_prefetch = 0 : i64, scratch_operands = 0 : i64, tpu.core_type = #tpu.core_type<tc>} {
    %c0 = arith.constant 0 : index
    %c0_0 = arith.constant 0 : index
    %0 = vector.load %arg0[%c0, %c0_0] : memref<8x128xbf16, #tpu.memory_space<vmem>>, vector<8x128xbf16>
    %c0_1 = arith.constant 0 : index
    %c0_2 = arith.constant 0 : index
    %1 = vector.load %arg1[%c0_1, %c0_2] : memref<128x128xbf16, #tpu.memory_space<vmem>>, vector<128x128xbf16>
    %cst = arith.constant dense<0.000000e+00> : vector<8x128xf32>
    %2 = tpu.matmul %0, %1, %cst {dimension_numbers = #tpu.dot_dimension_numbers<[1], [0], [0], [1], [0, 0, 1, 1], [], []>} : vector<8x128xbf16>, vector<128x128xbf16>, vector<8x128xf32> -> vector<8x128xf32>
    %c0_3 = arith.constant 0 : index
    %c0_4 = arith.constant 0 : index
    %3 = vector.load %arg6[%c0_3, %c0_4] : memref<1x3968xf32, #tpu.memory_space<vmem>>, vector<1x128xf32>
    %4 = vector.broadcast %3 : vector<1x128xf32> to vector<8x128xf32>
    %5 = arith.addf %2, %4 : vector<8x128xf32>
    %6 = arith.truncf %5 : vector<8x128xf32> to vector<8x128xbf16>
    %cst_5 = arith.constant 0.000000e+00 : bf16
    %7 = vector.broadcast %cst_5 : bf16 to vector<8x128xbf16>
    %8 = arith.cmpf ogt, %6, %7 : vector<8x128xbf16>
    %cst_6 = arith.constant 2.001950e-01 : bf16
    %9 = vector.broadcast %cst_6 : bf16 to vector<8x128xbf16>
    %10 = arith.mulf %9, %6 : vector<8x128xbf16>
    %11 = arith.select %8, %6, %10 : vector<8x128xi1>, vector<8x128xbf16>
    %c0_7 = arith.constant 0 : index
    %c0_8 = arith.constant 0 : index
    %12 = vector.load %arg2[%c0_7, %c0_8] : memref<128x256xbf16, #tpu.memory_space<vmem>>, vector<128x256xbf16>
    %cst_9 = arith.constant dense<0.000000e+00> : vector<8x256xf32>
    %13 = tpu.matmul %11, %12, %cst_9 {dimension_numbers = #tpu.dot_dimension_numbers<[1], [0], [0], [1], [0, 0, 1, 1], [], []>} : vector<8x128xbf16>, vector<128x256xbf16>, vector<8x256xf32> -> vector<8x256xf32>
    %cst_10 = arith.constant dense<0.000000e+00> : vector<256xf32>
    %14 = vector.multi_reduction <add>, %13, %cst_10 [0] : vector<8x256xf32> to vector<256xf32>
    %15 = vector.shape_cast %14 : vector<256xf32> to vector<1x256xf32>
    %16 = arith.mulf %13, %13 : vector<8x256xf32>
    %cst_11 = arith.constant dense<0.000000e+00> : vector<256xf32>
    %17 = vector.multi_reduction <add>, %16, %cst_11 [0] : vector<8x256xf32> to vector<256xf32>
    %18 = vector.shape_cast %17 : vector<256xf32> to vector<1x256xf32>
    %cst_12 = arith.constant 1.250000e-01 : f32
    %19 = vector.broadcast %cst_12 : f32 to vector<1x256xf32>
    %20 = arith.mulf %15, %19 : vector<1x256xf32>
    %cst_13 = arith.constant 1.250000e-01 : f32
    %21 = vector.broadcast %cst_13 : f32 to vector<1x256xf32>
    %22 = arith.mulf %18, %21 : vector<1x256xf32>
    %23 = arith.mulf %20, %20 : vector<1x256xf32>
    %24 = arith.subf %22, %23 : vector<1x256xf32>
    %c0_14 = arith.constant 0 : index
    %c128 = arith.constant 128 : index
    %25 = vector.load %arg6[%c0_14, %c128] : memref<1x3968xf32, #tpu.memory_space<vmem>>, vector<1x256xf32>
    %cst_15 = arith.constant 8.000000e-01 : f32
    %26 = vector.broadcast %cst_15 : f32 to vector<1x256xf32>
    %27 = arith.addf %24, %26 : vector<1x256xf32>
    %28 = math.rsqrt %27 : vector<1x256xf32>
    %29 = arith.mulf %25, %28 : vector<1x256xf32>
    %c0_16 = arith.constant 0 : index
    %c384 = arith.constant 384 : index
    %30 = vector.load %arg6[%c0_16, %c384] : memref<1x3968xf32, #tpu.memory_space<vmem>>, vector<1x256xf32>
    %31 = arith.mulf %20, %29 : vector<1x256xf32>
    %32 = arith.subf %30, %31 : vector<1x256xf32>
    %33 = arith.truncf %13 : vector<8x256xf32> to vector<8x256xbf16>
    %34 = arith.truncf %29 : vector<1x256xf32> to vector<1x256xbf16>
    %35 = vector.broadcast %34 : vector<1x256xbf16> to vector<8x256xbf16>
    %36 = arith.mulf %33, %35 : vector<8x256xbf16>
    %37 = arith.truncf %32 : vector<1x256xf32> to vector<1x256xbf16>
    %38 = vector.broadcast %37 : vector<1x256xbf16> to vector<8x256xbf16>
    %39 = arith.addf %36, %38 : vector<8x256xbf16>
    %cst_17 = arith.constant 0.000000e+00 : bf16
    %40 = vector.broadcast %cst_17 : bf16 to vector<8x256xbf16>
    %41 = arith.cmpf ogt, %39, %40 : vector<8x256xbf16>
    %cst_18 = arith.constant 2.001950e-01 : bf16
    %42 = vector.broadcast %cst_18 : bf16 to vector<8x256xbf16>
    %43 = arith.mulf %42, %39 : vector<8x256xbf16>
    %44 = arith.select %41, %39, %43 : vector<8x256xi1>, vector<8x256xbf16>
    %c0_19 = arith.constant 0 : index
    %c0_20 = arith.constant 0 : index
    %45 = vector.load %arg3[%c0_19, %c0_20] : memref<256x512xbf16, #tpu.memory_space<vmem>>, vector<256x512xbf16>
    %cst_21 = arith.constant dense<0.000000e+00> : vector<8x512xf32>
    %46 = tpu.matmul %44, %45, %cst_21 {dimension_numbers = #tpu.dot_dimension_numbers<[1], [0], [0], [1], [0, 0, 1, 1], [], []>} : vector<8x256xbf16>, vector<256x512xbf16>, vector<8x512xf32> -> vector<8x512xf32>
    %cst_22 = arith.constant dense<0.000000e+00> : vector<512xf32>
    %47 = vector.multi_reduction <add>, %46, %cst_22 [0] : vector<8x512xf32> to vector<512xf32>
    %48 = vector.shape_cast %47 : vector<512xf32> to vector<1x512xf32>
    %49 = arith.mulf %46, %46 : vector<8x512xf32>
    %cst_23 = arith.constant dense<0.000000e+00> : vector<512xf32>
    %50 = vector.multi_reduction <add>, %49, %cst_23 [0] : vector<8x512xf32> to vector<512xf32>
    %51 = vector.shape_cast %50 : vector<512xf32> to vector<1x512xf32>
    %cst_24 = arith.constant 1.250000e-01 : f32
    %52 = vector.broadcast %cst_24 : f32 to vector<1x512xf32>
    %53 = arith.mulf %48, %52 : vector<1x512xf32>
    %cst_25 = arith.constant 1.250000e-01 : f32
    %54 = vector.broadcast %cst_25 : f32 to vector<1x512xf32>
    %55 = arith.mulf %51, %54 : vector<1x512xf32>
    %56 = arith.mulf %53, %53 : vector<1x512xf32>
    %57 = arith.subf %55, %56 : vector<1x512xf32>
    %c0_26 = arith.constant 0 : index
    %c640 = arith.constant 640 : index
    %58 = vector.load %arg6[%c0_26, %c640] : memref<1x3968xf32, #tpu.memory_space<vmem>>, vector<1x512xf32>
    %cst_27 = arith.constant 8.000000e-01 : f32
    %59 = vector.broadcast %cst_27 : f32 to vector<1x512xf32>
    %60 = arith.addf %57, %59 : vector<1x512xf32>
    %61 = math.rsqrt %60 : vector<1x512xf32>
    %62 = arith.mulf %58, %61 : vector<1x512xf32>
    %c0_28 = arith.constant 0 : index
    %c1152 = arith.constant 1152 : index
    %63 = vector.load %arg6[%c0_28, %c1152] : memref<1x3968xf32, #tpu.memory_space<vmem>>, vector<1x512xf32>
    %64 = arith.mulf %53, %62 : vector<1x512xf32>
    %65 = arith.subf %63, %64 : vector<1x512xf32>
    %66 = arith.truncf %46 : vector<8x512xf32> to vector<8x512xbf16>
    %67 = arith.truncf %62 : vector<1x512xf32> to vector<1x512xbf16>
    %68 = vector.broadcast %67 : vector<1x512xbf16> to vector<8x512xbf16>
    %69 = arith.mulf %66, %68 : vector<8x512xbf16>
    %70 = arith.truncf %65 : vector<1x512xf32> to vector<1x512xbf16>
    %71 = vector.broadcast %70 : vector<1x512xbf16> to vector<8x512xbf16>
    %72 = arith.addf %69, %71 : vector<8x512xbf16>
    %cst_29 = arith.constant 0.000000e+00 : bf16
    %73 = vector.broadcast %cst_29 : bf16 to vector<8x512xbf16>
    %74 = arith.cmpf ogt, %72, %73 : vector<8x512xbf16>
    %cst_30 = arith.constant 2.001950e-01 : bf16
    %75 = vector.broadcast %cst_30 : bf16 to vector<8x512xbf16>
    %76 = arith.mulf %75, %72 : vector<8x512xbf16>
    %77 = arith.select %74, %72, %76 : vector<8x512xi1>, vector<8x512xbf16>
    %c0_31 = arith.constant 0 : index
    %c0_32 = arith.constant 0 : index
    %78 = vector.load %arg4[%c0_31, %c0_32] : memref<512x1024xbf16, #tpu.memory_space<vmem>>, vector<512x1024xbf16>
    %cst_33 = arith.constant dense<0.000000e+00> : vector<8x1024xf32>
    %79 = tpu.matmul %77, %78, %cst_33 {dimension_numbers = #tpu.dot_dimension_numbers<[1], [0], [0], [1], [0, 0, 1, 1], [], []>} : vector<8x512xbf16>, vector<512x1024xbf16>, vector<8x1024xf32> -> vector<8x1024xf32>
    %cst_34 = arith.constant dense<0.000000e+00> : vector<1024xf32>
    %80 = vector.multi_reduction <add>, %79, %cst_34 [0] : vector<8x1024xf32> to vector<1024xf32>
    %81 = vector.shape_cast %80 : vector<1024xf32> to vector<1x1024xf32>
    %82 = arith.mulf %79, %79 : vector<8x1024xf32>
    %cst_35 = arith.constant dense<0.000000e+00> : vector<1024xf32>
    %83 = vector.multi_reduction <add>, %82, %cst_35 [0] : vector<8x1024xf32> to vector<1024xf32>
    %84 = vector.shape_cast %83 : vector<1024xf32> to vector<1x1024xf32>
    %cst_36 = arith.constant 1.250000e-01 : f32
    %85 = vector.broadcast %cst_36 : f32 to vector<1x1024xf32>
    %86 = arith.mulf %81, %85 : vector<1x1024xf32>
    %cst_37 = arith.constant 1.250000e-01 : f32
    %87 = vector.broadcast %cst_37 : f32 to vector<1x1024xf32>
    %88 = arith.mulf %84, %87 : vector<1x1024xf32>
    %89 = arith.mulf %86, %86 : vector<1x1024xf32>
    %90 = arith.subf %88, %89 : vector<1x1024xf32>
    %c0_38 = arith.constant 0 : index
    %c1664 = arith.constant 1664 : index
    %91 = vector.load %arg6[%c0_38, %c1664] : memref<1x3968xf32, #tpu.memory_space<vmem>>, vector<1x1024xf32>
    %cst_39 = arith.constant 8.000000e-01 : f32
    %92 = vector.broadcast %cst_39 : f32 to vector<1x1024xf32>
    %93 = arith.addf %90, %92 : vector<1x1024xf32>
    %94 = math.rsqrt %93 : vector<1x1024xf32>
    %95 = arith.mulf %91, %94 : vector<1x1024xf32>
    %c0_40 = arith.constant 0 : index
    %c2688 = arith.constant 2688 : index
    %96 = vector.load %arg6[%c0_40, %c2688] : memref<1x3968xf32, #tpu.memory_space<vmem>>, vector<1x1024xf32>
    %97 = arith.mulf %86, %95 : vector<1x1024xf32>
    %98 = arith.subf %96, %97 : vector<1x1024xf32>
    %99 = arith.truncf %79 : vector<8x1024xf32> to vector<8x1024xbf16>
    %100 = arith.truncf %95 : vector<1x1024xf32> to vector<1x1024xbf16>
    %101 = vector.broadcast %100 : vector<1x1024xbf16> to vector<8x1024xbf16>
    %102 = arith.mulf %99, %101 : vector<8x1024xbf16>
    %103 = arith.truncf %98 : vector<1x1024xf32> to vector<1x1024xbf16>
    %104 = vector.broadcast %103 : vector<1x1024xbf16> to vector<8x1024xbf16>
    %105 = arith.addf %102, %104 : vector<8x1024xbf16>
    %cst_41 = arith.constant 0.000000e+00 : bf16
    %106 = vector.broadcast %cst_41 : bf16 to vector<8x1024xbf16>
    %107 = arith.cmpf ogt, %105, %106 : vector<8x1024xbf16>
    %cst_42 = arith.constant 2.001950e-01 : bf16
    %108 = vector.broadcast %cst_42 : bf16 to vector<8x1024xbf16>
    %109 = arith.mulf %108, %105 : vector<8x1024xbf16>
    %110 = arith.select %107, %105, %109 : vector<8x1024xi1>, vector<8x1024xbf16>
    %c0_43 = arith.constant 0 : index
    %c0_44 = arith.constant 0 : index
    %111 = vector.load %arg5[%c0_43, %c0_44] : memref<1024x256xbf16, #tpu.memory_space<vmem>>, vector<1024x256xbf16>
    %cst_45 = arith.constant dense<0.000000e+00> : vector<8x256xf32>
    %112 = tpu.matmul %110, %111, %cst_45 {dimension_numbers = #tpu.dot_dimension_numbers<[1], [0], [0], [1], [0, 0, 1, 1], [], []>} : vector<8x1024xbf16>, vector<1024x256xbf16>, vector<8x256xf32> -> vector<8x256xf32>
    %c0_46 = arith.constant 0 : index
    %c3712 = arith.constant 3712 : index
    %113 = vector.load %arg6[%c0_46, %c3712] : memref<1x3968xf32, #tpu.memory_space<vmem>>, vector<1x256xf32>
    %114 = vector.broadcast %113 : vector<1x256xf32> to vector<8x256xf32>
    %115 = arith.addf %112, %114 : vector<8x256xf32>
    %116 = math.tanh %115 : vector<8x256xf32>
    %c0_47 = arith.constant 0 : index
    %c0_48 = arith.constant 0 : index
    %117 = vector.load %arg7[%c0_47, %c0_48] : memref<8x256xf32, #tpu.memory_space<vmem>>, vector<8x256xf32>
    tpu.vector_store %arg7[%c0_47, %c0_48], %116 {strides = array<i32>} : memref<8x256xf32, #tpu.memory_space<vmem>>, vector<8x256xf32>,
    return
  }
}

</mosaic_0001>

<bundles_post_ra>
// kernel: generator_forward.1
= control target key start
LH: loop header
LB: loop body
LE: loop exit
PB: predicated region body
PF: predicated region fallthrough
CT: control target
= control target key end

     0   :  { %12 = vsyncpa [#allocation3], 0  ;;  %s6098_s0 = inlined_call_operand.vmem [shape: bf16[8,128], index: 0, kind: input, shape index: {}]   ;;  %s6099_s1 = inlined_call_operand.vmem [shape: bf16[128,128], index: 1, kind: input, shape index: {}]   ;;  %s6100_s2 = inlined_call_operand.hbm [shape: bf16[128,256], index: 2, kind: input, shape index: {}]   ;;  %s6101_s3 = inlined_call_operand.hbm [shape: bf16[256,512], index: 3, kind: input, shape index: {}]   ;;  %s6102_s4 = inlined_call_operand.hbm [shape: bf16[512,1024], index: 4, kind: input, shape index: {}]   ;;  %s6103_s5 = inlined_call_operand.hbm [shape: bf16[1024,256], index: 5, kind: input, shape index: {}]   ;;  %s6104_s6 = inlined_call_operand.vmem [shape: f32[1,3968], index: 6, kind: input, shape index: {}]   ;;  %s6105_s7 = inlined_call_operand.vmem [shape: f32[8,256], index: 7, kind: output, shape index: {}]  }
   0x1   :  { %13 = vsyncpa [#allocation5], 0 }
   0x2   :  { %14 = vsyncpa [#allocation8], 0  ;;  %s5567_s24 = smov [#allocation4]   ;;  %s5473_s28 = scalar_lea.hbm %s6101_s3, 8192 }
   0x3   :  { %s36_s25 = sshll.u32 %s5567_s24, 4  ;;  %p5474_p0 = scmp.ne.s32.totalorder %s6101_s3, %s5473_s28  ;;  %s37_s25 = int_to_ptr.vmem [resolvable:$true] %s36_s25 }
   0x4   :  { %p5477_p1 = scmp.lt.u32.totalorder %s5473_s28, %s6101_s3 }
   0x6   :  { %p5479_p2 = pnand %p5477_p1, %p5474_p0 }
   0x8   :  { %5482 = shalt.err (!%p5479_p2)
}
   0x9   :  { %s5483_s10 = scalar_lea.vmem %s37_s25, 8192  ;;  %p5488_p4 = scmp.lt.s32.totalorder %s37_s25, %s37_s25 }
   0xa   :  { %p5484_p3 = scmp.ne.s32.totalorder %s37_s25, %s5483_s10  ;;  %p5489_p5 = scmp.lt.s32.totalorder %s5483_s10, %s5483_s10 }
   0xc   :  { %p5490_p6 = por %p5489_p5, %p5488_p4 }
   0xe   :  { %p5491_p7 = pnand %p5490_p6, %p5484_p3 }
  0x10   :  { %5494 = shalt.err (!%p5491_p7)
}
  0x11   :  { %s5568_s11 = smov 256   ;;  %s5569_s12 = smov 16  }
  0x12   :  { %42 = dma.hbm_to_vmem [thread:$0]  %s6101_s3, 8192, %s37_s25, [#allocation5], %s5568_s11, %s5568_s11, %s5569_s12  }
  0x13   :  { %s5570_s15 = smov [#allocation2]   ;;  %s5495_s19 = scalar_lea.hbm %s6100_s2, 2048 }
  0x14   :  { %s24_s16 = sshll.u32 %s5570_s15, 4  ;;  %p5496_p8 = scmp.ne.s32.totalorder %s6100_s2, %s5495_s19  ;;  %s25_s16 = int_to_ptr.vmem [resolvable:$true] %s24_s16 }
  0x15   :  { %p5499_p9 = scmp.lt.u32.totalorder %s5495_s19, %s6100_s2 }
  0x17   :  { %p5501_p10 = pnand %p5499_p9, %p5496_p8 }
  0x19   :  { %5504 = shalt.err (!%p5501_p10)
}
  0x1a   :  { %s5505_s24 = scalar_lea.vmem %s25_s16, 2048  ;;  %p5510_p12 = scmp.lt.s32.totalorder %s25_s16, %s25_s16 }
  0x1b   :  { %p5506_p11 = scmp.ne.s32.totalorder %s25_s16, %s5505_s24  ;;  %p5511_p13 = scmp.lt.s32.totalorder %s5505_s24, %s5505_s24 }
  0x1d   :  { %p5512_p0 = por %p5511_p13, %p5510_p12 }
  0x1f   :  { %p5513_p1 = pnand %p5512_p0, %p5506_p11 }
  0x21   :  { %5516 = shalt.err (!%p5513_p1)
}
  0x22   :  { %s5571_s3 = smov 128   ;;  %s5572_s25 = smov 8  }
  0x23   :  { %30 = dma.hbm_to_vmem [thread:$0]  %s6100_s2, 2048, %s25_s16, [#allocation3], %s5571_s3, %s5571_s3, %s5572_s25  }
  0x24   :  { %s5573_s28 = smov [#allocation6]   ;;  %s5517_s9 = scalar_lea.hbm %s6102_s4, 32768 }
  0x25   :  { %s48_s29 = sshll.u32 %s5573_s28, 4  ;;  %p5518_p2 = scmp.ne.s32.totalorder %s6102_s4, %s5517_s9  ;;  %s49_s29 = int_to_ptr.vmem [resolvable:$true] %s48_s29 }
  0x26   :  { %p5521_p3 = scmp.lt.u32.totalorder %s5517_s9, %s6102_s4 }
  0x28   :  { %p5523_p4 = pnand %p5521_p3, %p5518_p2 }
  0x2a   :  { %5526 = shalt.err (!%p5523_p4)
}
  0x2b   :  { %s5527_s14 = scalar_lea.vmem %s49_s29, 32768  ;;  %p5532_p6 = scmp.lt.s32.totalorder %s49_s29, %s49_s29 }
  0x2c   :  { %p5528_p5 = scmp.ne.s32.totalorder %s49_s29, %s5527_s14  ;;  %p5533_p7 = scmp.lt.s32.totalorder %s5527_s14, %s5527_s14 }
  0x2e   :  { %p5534_p8 = por %p5533_p7, %p5532_p6 }
  0x30   :  { %p5535_p9 = pnand %p5534_p8, %p5528_p5 }
  0x32   :  { %5538 = shalt.err (!%p5535_p9)
}
  0x33   :  { %s5574_s2 = smov 512   ;;  %s5575_s15 = smov 32  }
  0x34   :  { %54 = dma.hbm_to_vmem [thread:$0]  %s6102_s4, 32768, %s49_s29, [#allocation5], %s5574_s2, %s5574_s2, %s5575_s15  }
  0x35   :  { %s5576_s18 = smov [#allocation7]   ;;  %s5539_s22 = scalar_lea.hbm %s6103_s5, 16384 }
  0x36   :  { %s60_s19 = sshll.u32 %s5576_s18, 4  ;;  %p5540_p10 = scmp.ne.s32.totalorder %s6103_s5, %s5539_s22  ;;  %s61_s19 = int_to_ptr.vmem [resolvable:$true] %s60_s19 }
  0x37   :  { %p5543_p11 = scmp.lt.u32.totalorder %s5539_s22, %s6103_s5 }
  0x39   :  { %p5545_p12 = pnand %p5543_p11, %p5540_p10 }
  0x3b   :  { %5548 = shalt.err (!%p5545_p12)
}
  0x3c   :  { %s5549_s28 = scalar_lea.vmem %s61_s19, 16384  ;;  %p5554_p0 = scmp.lt.s32.totalorder %s61_s19, %s61_s19 }
  0x3d   :  { %p5550_p13 = scmp.ne.s32.totalorder %s61_s19, %s5549_s28  ;;  %p5555_p1 = scmp.lt.s32.totalorder %s5549_s28, %s5549_s28 }
  0x3f   :  { %p5556_p2 = por %p5555_p1, %p5554_p0 }
  0x41   :  { %p5557_p3 = pnand %p5556_p2, %p5550_p13 }
  0x43   :  { %5560 = shalt.err (!%p5557_p3)
}
  0x44   :  { %66 = dma.hbm_to_vmem [thread:$0]  %s6103_s5, 16384, %s61_s19, [#allocation8], %s5571_s3, %s5571_s3, %s5572_s25  }
  0x45   :  { %5561 = dma.done.wait [#allocation3], 2048  }
  0x46   :  { %5562 = vsyncadd [#allocation3], 4294965248 }
  0x47   :  { %5563 = dma.done.wait [#allocation5], 40960  }
  0x48   :  { %5564 = vsyncadd [#allocation5], 4294926336 }
  0x49   :  { %5565 = dma.done.wait [#allocation8], 16384  }
  0x4a   :  { %5566 = vsyncadd [#allocation8], 4294950912  ;;  %v5577_v0 = vmov 0.0   ;;  %vm5578_vm0 = vmmov 0   ;;  %v5121_v1 = vld [vmem:[%s6099_s1] sm:$0xff]   ;;  %v5122_v2 = vld [vmem:[%s6099_s1 + $0x8] sm:$0xff]  }
  0x4b   :  { %5059 = vmatprep.subr.bf16.mxu0 %v5577_v0  ;;  %5075 = vmatprep.mubr.msk.bf16.mxu0 %vm5578_vm0, %v5577_v0  ;;  %v5123_v3 = vld [vmem:[%s6099_s1 + $0x10] sm:$0xff]   ;;  %v5129_v4 = vld [vmem:[#allocation2 + $0x4] ss:$8 sps:$4 sm:$0xff]   ;;  %v5131_v5 = vld [vmem:[#allocation2] ss:$8 sps:$4 sm:$0xff]   ;;  %v5579_v26 = vmov 0  }
  0x4c   :  { %5060 = vmatpush3.bf16.msra.mxu0 %v5121_v1  ;;  %v5124_v6 = vld [vmem:[%s6099_s1 + $0x18] sm:$0xff]   ;;  %295 = vmatprep.subr.bf16.mxu1 %v5129_v4  ;;  %v5135_v9 = vld [vmem:[#allocation2 + $0x24] ss:$8 sps:$4 sm:$0xff]   ;;  %v5137_v12 = vld [vmem:[#allocation2 + $0x20] ss:$8 sps:$4 sm:$0xff]  }
  0x4d   :  { %5061 = vmatprep.subr.bf16.mxu0 %v5577_v0  ;;  %v5132_v7 = vld [vmem:[#allocation2 + $0x14] ss:$8 sps:$4 sm:$0xff]   ;;  %296 = vmatpush1.bf16.msra.mxu1 %v5131_v5  ;;  %v5134_v8 = vld [vmem:[#allocation2 + $0x10] ss:$8 sps:$4 sm:$0xff]   ;;  %v5125_v10 = vld [vmem:[%s6099_s1 + $0x20] sm:$0xff]  }
  0x4e   :  { %297 = vmatprep.subr.bf16.mxu1 %v5132_v7  ;;  %v5126_v11 = vld [vmem:[%s6099_s1 + $0x28] sm:$0xff]   ;;  %v5138_v13 = vld [vmem:[#allocation2 + $0x34] ss:$8 sps:$4 sm:$0xff]   ;;  %v5140_v14 = vld [vmem:[#allocation2 + $0x30] ss:$8 sps:$4 sm:$0xff]   ;;  %327 = vmatprep.mubr.bf16.mxu1 %v5579_v26 }
  0x4f   :  { %v5141_v15 = vld [vmem:[#allocation2 + $0x44] ss:$8 sps:$4 sm:$0xff]   ;;  %v5127_v16 = vld [vmem:[%s6099_s1 + $0x30] sm:$0xff]   ;;  %v5143_v17 = vld [vmem:[#allocation2 + $0x40] ss:$8 sps:$4 sm:$0xff]  }
  0x50   :  { %5062 = vmatpush3.bf16.msra.mxu0 %v5122_v2  ;;  %v5144_v18 = vld [vmem:[#allocation2 + $0x54] ss:$8 sps:$4 sm:$0xff]   ;;  %v5146_v20 = vld [vmem:[#allocation2 + $0x50] ss:$8 sps:$4 sm:$0xff]   ;;  %v83_v21 = vld [vmem:[%s6098_s0] sm:$0xf] }
  0x51   :  { %5063 = vmatprep.subr.bf16.mxu0 %v5577_v0  ;;  %298 = vmatpush1.bf16.msra.mxu1 %v5134_v8  ;;  %v5128_v19 = vld [vmem:[%s6099_s1 + $0x38] sm:$0xff]   ;;  %v5147_v22 = vld [vmem:[#allocation2 + $0x64] ss:$8 sps:$4 sm:$0xff]   ;;  %v5149_v23 = vld [vmem:[#allocation2 + $0x60] ss:$8 sps:$4 sm:$0xff]  }
  0x52   :  { %299 = vmatprep.subr.bf16.mxu1 %v5135_v9  ;;  %v5150_v24 = vld [vmem:[#allocation2 + $0x74] ss:$8 sps:$4 sm:$0xff]   ;;  %v5152_v25 = vld [vmem:[#allocation2 + $0x70] ss:$8 sps:$4 sm:$0xff]   ;;  %v4577_v27 = vld [vmem:[%s6104_s6] ss:$0 sm:$0xff] }
  0x53   :  { %v5155_v36 = vld [vmem:[#allocation4 + $0x4] ss:$16 sps:$4 sm:$0xff]   ;;  %v5153_v37 = vld [vmem:[#allocation4] ss:$16 sps:$4 sm:$0xff]   ;;  %v5203_v4 = vld [vmem:[#allocation4 + $0xc] ss:$16 sps:$4 sm:$0xff]  }
  0x54   :  { %5064 = vmatpush3.bf16.msra.mxu0 %v5123_v3  ;;  %v5158_v38 = vld [vmem:[#allocation4 + $0x24] ss:$16 sps:$4 sm:$0xff]   ;;  %v5156_v39 = vld [vmem:[#allocation4 + $0x20] ss:$16 sps:$4 sm:$0xff]  }
  0x55   :  { %5065 = vmatprep.subr.bf16.mxu0 %v5577_v0  ;;  %300 = vmatpush1.bf16.msra.mxu1 %v5137_v12  ;;  %v5161_v40 = vld [vmem:[#allocation4 + $0x44] ss:$16 sps:$4 sm:$0xff]   ;;  %v5159_v41 = vld [vmem:[#allocation4 + $0x40] ss:$16 sps:$4 sm:$0xff]  }
  0x56   :  { %301 = vmatprep.subr.bf16.mxu1 %v5138_v13  ;;  %v5164_v42 = vld [vmem:[#allocation4 + $0x64] ss:$16 sps:$4 sm:$0xff]   ;;  %v5162_v43 = vld [vmem:[#allocation4 + $0x60] ss:$16 sps:$4 sm:$0xff]  }
  0x57   :  { %v5167_v44 = vld [vmem:[#allocation4 + $0x84] ss:$16 sps:$4 sm:$0xff]   ;;  %v5165_v45 = vld [vmem:[#allocation4 + $0x80] ss:$16 sps:$4 sm:$0xff]  }
  0x58   :  { %5066 = vmatpush3.bf16.msra.mxu0 %v5124_v6  ;;  %v5170_v46 = vld [vmem:[#allocation4 + $0xa4] ss:$16 sps:$4 sm:$0xff]   ;;  %v5168_v47 = vld [vmem:[#allocation4 + $0xa0] ss:$16 sps:$4 sm:$0xff]  }
  0x59   :  { %5067 = vmatprep.subr.bf16.mxu0 %v5577_v0  ;;  %302 = vmatpush1.bf16.msra.mxu1 %v5140_v14  ;;  %v5173_v48 = vld [vmem:[#allocation4 + $0xc4] ss:$16 sps:$4 sm:$0xff]   ;;  %v5171_v49 = vld [vmem:[#allocation4 + $0xc0] ss:$16 sps:$4 sm:$0xff]  }
  0x5a   :  { %303 = vmatprep.subr.bf16.mxu1 %v5141_v15  ;;  %v5176_v50 = vld [vmem:[#allocation4 + $0xe4] ss:$16 sps:$4 sm:$0xff]   ;;  %v5174_v51 = vld [vmem:[#allocation4 + $0xe0] ss:$16 sps:$4 sm:$0xff]  }
  0x5b   :  { %v5179_v52 = vld [vmem:[#allocation4 + $0x104] ss:$16 sps:$4 sm:$0xff]   ;;  %v5177_v53 = vld [vmem:[#allocation4 + $0x100] ss:$16 sps:$4 sm:$0xff]  }
  0x5c   :  { %5068 = vmatpush3.bf16.msra.mxu0 %v5125_v10  ;;  %v5182_v54 = vld [vmem:[#allocation4 + $0x124] ss:$16 sps:$4 sm:$0xff]   ;;  %v5180_v55 = vld [vmem:[#allocation4 + $0x120] ss:$16 sps:$4 sm:$0xff]  }
  0x5d   :  { %5069 = vmatprep.subr.bf16.mxu0 %v5577_v0  ;;  %304 = vmatpush1.bf16.msra.mxu1 %v5143_v17  ;;  %v5185_v56 = vld [vmem:[#allocation4 + $0x144] ss:$16 sps:$4 sm:$0xff]   ;;  %v5183_v57 = vld [vmem:[#allocation4 + $0x140] ss:$16 sps:$4 sm:$0xff]  }
  0x5e   :  { %305 = vmatprep.subr.bf16.mxu1 %v5144_v18  ;;  %v5188_v58 = vld [vmem:[#allocation4 + $0x164] ss:$16 sps:$4 sm:$0xff]   ;;  %v5186_v59 = vld [vmem:[#allocation4 + $0x160] ss:$16 sps:$4 sm:$0xff]  }
  0x5f   :  { %v5191_v60 = vld [vmem:[#allocation4 + $0x184] ss:$16 sps:$4 sm:$0xff]   ;;  %v5189_v61 = vld [vmem:[#allocation4 + $0x180] ss:$16 sps:$4 sm:$0xff]  }
  0x60   :  { %5070 = vmatpush3.bf16.msra.mxu0 %v5126_v11  ;;  %v5194_v62 = vld [vmem:[#allocation4 + $0x1a4] ss:$16 sps:$4 sm:$0xff]   ;;  %v5192_v63 = vld [vmem:[#allocation4 + $0x1a0] ss:$16 sps:$4 sm:$0xff]  }
  0x61   :  { %5071 = vmatprep.subr.bf16.mxu0 %v5577_v0  ;;  %306 = vmatpush1.bf16.msra.mxu1 %v5146_v20  ;;  %v5195_v1 = vld [vmem:[#allocation4 + $0x1c0] ss:$16 sps:$4 sm:$0xff]   ;;  %v5200_v2 = vld [vmem:[#allocation4 + $0x1e4] ss:$16 sps:$4 sm:$0xff]  }
  0x62   :  { %307 = vmatprep.subr.bf16.mxu1 %v5147_v22  ;;  %v5198_v3 = vld [vmem:[#allocation4 + $0x1e0] ss:$16 sps:$4 sm:$0xff]  }
  0x64   :  { %5072 = vmatpush3.bf16.msra.mxu0 %v5127_v16 }
  0x65   :  { %5073 = vmatprep.subr.bf16.mxu0 %v5577_v0  ;;  %308 = vmatpush1.bf16.msra.mxu1 %v5149_v23  ;;  %v5197_v0 = vld [vmem:[#allocation4 + $0x1c4] ss:$16 sps:$4 sm:$0xff]  }
  0x66   :  { %309 = vmatprep.subr.bf16.mxu1 %v5150_v24 }
  0x68   :  { %5074 = vmatpush3.bf16.msra.mxu0 %v5128_v19 }
  0x69   :  { %310 = vmatpush1.bf16.msra.mxu1 %v5152_v25 }
  0x6a   :  { %866 = vmatprep.subr.bf16.mxu1 %v5155_v36 }
  0x6b   :  { %5076 = vmatmul.mubr.bf16.vlgmr.msra.gmra.mrb[0].mxu0 %v83_v21 }
 0x13e   :  { %v189_v28 = vpop.f32.mrb[0].mxu0 }
 0x13f   :  { %v190_v29 = vadd.f32 %v4577_v27, %v189_v28  ;;  %v5077_v30 = vpop.f32.mrb[1].mxu0 }
 0x140   :  { %v192_v31 = vpop.f32.mrb[2].mxu0 }
 0x141   :  { %v195_v32 = vpack.c.bf16 %v190_v29, %v190_v29  ;;  %v5078_v33 = vpop.f32.mrb[3].mxu0 }
 0x143   :  { %v197_v34 = vmul.bf16 1045249613, %v195_v32  ;;  %vm196_vm1 = vcmp.gt.bf16.partialorder %v195_v32, 0 }
 0x145   :  { %v198_v35 = vsel %vm196_vm1, %v195_v32, %v197_v34 }
 0x146   :  { %328 = vmatmul.mubr.bf16.vlgmr.msra.gmra.mrb[0].mxu1 %v198_v35 }
 0x147   :  { %867 = vmatpush1.bf16.msra.mxu1 %v5153_v37 }
 0x148   :  { %868 = vmatprep.subr.bf16.mxu1 %v5158_v38 }
 0x14b   :  { %869 = vmatpush1.bf16.msra.mxu1 %v5156_v39 }
 0x14c   :  { %870 = vmatprep.subr.bf16.mxu1 %v5161_v40 }
 0x14f   :  { %871 = vmatpush1.bf16.msra.mxu1 %v5159_v41 }
 0x150   :  { %872 = vmatprep.subr.bf16.mxu1 %v5164_v42 }
 0x153   :  { %873 = vmatpush1.bf16.msra.mxu1 %v5162_v43 }
 0x154   :  { %874 = vmatprep.subr.bf16.mxu1 %v5167_v44 }
 0x157   :  { %875 = vmatpush1.bf16.msra.mxu1 %v5165_v45  ;;  %v5580_v45 = vmov 1966171168  }
 0x158   :  { %876 = vmatprep.subr.bf16.mxu1 %v5170_v46  ;;  %v379_v46 = vunpack.c.l.s4 %v5580_v45  ;;  %v5225_v45 = vld [vmem:[#allocation4 + $0x108] ss:$16 sps:$4 sm:$0xff]  }
 0x15b   :  { %877 = vmatpush1.bf16.msra.mxu1 %v5168_v47  ;;  %v381_v47 = vlaneseq }
 0x15c   :  { %878 = vmatprep.subr.bf16.mxu1 %v5173_v48  ;;  %v380_v48 = vunpack.c.0.s8 %v379_v46  ;;  %v5230_v46 = vld [vmem:[#allocation4 + $0x12c] ss:$16 sps:$4 sm:$0xff]  }
 0x15f   :  { %879 = vmatpush1.bf16.msra.mxu1 %v5171_v49  ;;  %v5717_v49 = vshrl.u32 %v381_v47, 7  ;;  %v5228_v47 = vld [vmem:[#allocation4 + $0x128] ss:$16 sps:$4 sm:$0xff]  }
 0x160   :  { %880 = vmatprep.subr.bf16.mxu1 %v5176_v50 }
 0x163   :  { %881 = vmatpush1.bf16.msra.mxu1 %v5174_v51  ;;  %v5720_v51 = vsub.s32 %v380_v48, %v5717_v49  ;;  %v5233_v48 = vld [vmem:[#allocation4 + $0x14c] ss:$16 sps:$4 sm:$0xff]  }
 0x164   :  { %882 = vmatprep.subr.bf16.mxu1 %v5179_v52 }
 0x167   :  { %883 = vmatpush1.bf16.msra.mxu1 %v5177_v53 }
 0x168   :  { %884 = vmatprep.subr.bf16.mxu1 %v5182_v54 }
 0x16b   :  { %885 = vmatpush1.bf16.msra.mxu1 %v5180_v55  ;;  %v370_v55 = vld [vmem:[%s6104_s6 + $0x1] sm:$0x3] }
 0x16c   :  { %886 = vmatprep.subr.bf16.mxu1 %v5185_v56 }
 0x16f   :  { %887 = vmatpush1.bf16.msra.mxu1 %v5183_v57  ;;  %v5728_v57 = vsub.s32 0, %v5717_v49 }
 0x170   :  { %888 = vmatprep.subr.bf16.mxu1 %v5188_v58  ;;  %v5731_v58 = vsub.s32 1, %v5717_v49 }
 0x173   :  { %889 = vmatpush1.bf16.msra.mxu1 %v5186_v59 }
 0x174   :  { %890 = vmatprep.subr.bf16.mxu1 %v5191_v60 }
 0x177   :  { %891 = vmatpush1.bf16.msra.mxu1 %v5189_v61 }
 0x178   :  { %892 = vmatprep.subr.bf16.mxu1 %v5194_v62 }
 0x17b   :  { %893 = vmatpush1.bf16.msra.mxu1 %v5192_v63 }
 0x17c   :  { %894 = vmatprep.subr.bf16.mxu1 %v5197_v0 }
 0x17f   :  { %895 = vmatpush1.bf16.msra.mxu1 %v5195_v1 }
 0x180   :  { %896 = vmatprep.subr.bf16.mxu1 %v5200_v2 }
 0x183   :  { %897 = vmatpush1.bf16.msra.mxu1 %v5198_v3 }
 0x184   :  { %907 = vmatprep.subr.bf16.mxu1 %v5203_v4 }
 0x219   :  { %v5705_v5 = vpop.f32.mrb[0].mxu1 }
 0x21a   :  { %v336_v6 = vrot.slane %v5705_v5, 4  ;;  %v348_v7 = vmul.f32 %v5705_v5, %v5705_v5  ;;  %v5710_v8 = vpop.f32.mrb[1].mxu1 }
 0x21b   :  { %v342_v9 = vrot.slane %v5710_v8, 4  ;;  %v349_v10 = vmul.f32 %v5710_v8, %v5710_v8  ;;  %v333_v11 = vpop.f32.mrb[2].mxu1 }
 0x21c   :  { %v337_v12 = vadd.f32 %v336_v6, %v5705_v5  ;;  %v350_v13 = vrot.slane %v348_v7, 4  ;;  %v334_v14 = vpop.f32.mrb[3].mxu1  ;;  %v427_v6 = vpack.c.bf16 %v5705_v5, %v5705_v5 }
 0x21d   :  { %v343_v15 = vadd.f32 %v342_v9, %v5710_v8  ;;  %v356_v16 = vrot.slane %v349_v10, 4  ;;  %v428_v9 = vpack.c.bf16 %v5710_v8, %v5710_v8 }
 0x21e   :  { %v338_v17 = vrot.slane %v337_v12, 2  ;;  %v351_v18 = vadd.f32 %v350_v13, %v348_v7 }
 0x21f   :  { %v344_v19 = vrot.slane %v343_v15, 2  ;;  %v357_v20 = vadd.f32 %v356_v16, %v349_v10 }
 0x220   :  { %v339_v21 = vadd.f32 %v338_v17, %v337_v12  ;;  %v352_v22 = vrot.slane %v351_v18, 2  ;;  %v394_v12 = vld [vmem:[%s6104_s6 + $0x3] sm:$0x3] }
 0x221   :  { %v345_v23 = vadd.f32 %v344_v19, %v343_v15  ;;  %v358_v24 = vrot.slane %v357_v20, 2 }
 0x222   :  { %v340_v25 = vrot.slane %v339_v21, 1  ;;  %v353_v26 = vadd.f32 %v352_v22, %v351_v18 }
 0x223   :  { %v346_v27 = vrot.slane %v345_v23, 1  ;;  %v359_v28 = vadd.f32 %v358_v24, %v357_v20 }
 0x224   :  { %v341_v29 = vadd.f32 %v340_v25, %v339_v21  ;;  %v354_v30 = vrot.slane %v353_v26, 1 }
 0x225   :  { %v347_v31 = vadd.f32 %v346_v27, %v345_v23  ;;  %v360_v32 = vrot.slane %v359_v28, 1  ;;  %v5201_v27 = vld [vmem:[#allocation4 + $0x8] ss:$16 sps:$4 sm:$0xff]  }
 0x226   :  { %v355_v33 = vadd.f32 %v354_v30, %v353_v26  ;;  %v362_v34 = vmul.f32 0.125, %v341_v29  ;;  %v5206_v30 = vld [vmem:[#allocation4 + $0x2c] ss:$16 sps:$4 sm:$0xff]  }
 0x227   :  { %v361_v35 = vadd.f32 %v360_v32, %v359_v28  ;;  %v363_v36 = vmul.f32 0.125, %v347_v31  ;;  %v5204_v31 = vld [vmem:[#allocation4 + $0x28] ss:$16 sps:$4 sm:$0xff]   ;;  %v5209_v32 = vld [vmem:[#allocation4 + $0x4c] ss:$16 sps:$4 sm:$0xff]  }
 0x228   :  { %v364_v37 = vmul.f32 0.125, %v355_v33  ;;  %v366_v38 = vmul.f32 %v362_v34, %v362_v34  ;;  %v5207_v33 = vld [vmem:[#allocation4 + $0x48] ss:$16 sps:$4 sm:$0xff]  }
 0x229   :  { %v365_v39 = vmul.f32 0.125, %v361_v35  ;;  %v367_v40 = vmul.f32 %v363_v36, %v363_v36  ;;  %v5210_v35 = vld [vmem:[#allocation4 + $0x68] ss:$16 sps:$4 sm:$0xff]  }
 0x22a   :  { %v368_v41 = vsub.f32 %v364_v37, %v366_v38  ;;  %v5213_v37 = vld [vmem:[#allocation4 + $0x88] ss:$16 sps:$4 sm:$0xff]   ;;  %v5218_v38 = vld [vmem:[#allocation4 + $0xac] ss:$16 sps:$4 sm:$0xff]  }
 0x22b   :  { %v369_v42 = vsub.f32 %v365_v39, %v367_v40  ;;  %v5216_v39 = vld [vmem:[#allocation4 + $0xa8] ss:$16 sps:$4 sm:$0xff]   ;;  %v5221_v40 = vld [vmem:[#allocation4 + $0xcc] ss:$16 sps:$4 sm:$0xff]  }
 0x22c   :  { %v371_v43 = vadd.f32 0.8, %v368_v41  ;;  %v5219_v41 = vld [vmem:[#allocation4 + $0xc8] ss:$16 sps:$4 sm:$0xff]  }
 0x22d   :  { %v372_v44 = vadd.f32 0.8, %v369_v42  ;;  %v5224_v42 = vld [vmem:[#allocation4 + $0xec] ss:$16 sps:$4 sm:$0xff]  }
 0x22e   :  { %5441 = vrsqrt.f32 %v371_v43  ;;  %v5222_v43 = vld [vmem:[#allocation4 + $0xe8] ss:$16 sps:$4 sm:$0xff]  }
 0x22f   :  { %5443 = vrsqrt.f32 %v372_v44  ;;  %v5227_v44 = vld [vmem:[#allocation4 + $0x10c] ss:$16 sps:$4 sm:$0xff]  }
 0x238   :  { %v5442_v50 = vpop.eup %5441 }
 0x239   :  { %v5444_v52 = vpop.eup %5443 }
 0x23a   :  { %v377_v53 = vcombine.low %v5442_v50, %v5444_v52  ;;  %v5231_v50 = vld [vmem:[#allocation4 + $0x148] ss:$16 sps:$4 sm:$0xff]   ;;  %v5236_v52 = vld [vmem:[#allocation4 + $0x16c] ss:$16 sps:$4 sm:$0xff]  }
 0x23c   :  { %v384_v54 = vrot.slane %v377_v53, %v5720_v51  ;;  %v5234_v53 = vld [vmem:[#allocation4 + $0x168] ss:$16 sps:$4 sm:$0xff]  }
 0x23e   :  { %v391_v56 = vrot.slane %v384_v54, %v5720_v51  ;;  %v5239_v54 = vld [vmem:[#allocation4 + $0x18c] ss:$16 sps:$4 sm:$0xff]  }
 0x240   :  { %v393_v59 = vmul.f32 %v391_v56, %v370_v55  ;;  %v5237_v55 = vld [vmem:[#allocation4 + $0x188] ss:$16 sps:$4 sm:$0xff]   ;;  %v5242_v56 = vld [vmem:[#allocation4 + $0x1ac] ss:$16 sps:$4 sm:$0xff]  }
 0x242   :  { %v399_v60 = vrot.slane %v393_v59, %v5728_v57  ;;  %v403_v61 = vrot.slane %v393_v59, %v5731_v58  ;;  %v5240_v59 = vld [vmem:[#allocation4 + $0x1a8] ss:$16 sps:$4 sm:$0xff]  }
 0x244   :  { %v406_v62 = vmul.f32 %v399_v60, %v362_v34  ;;  %v407_v63 = vmul.f32 %v403_v61, %v363_v36  ;;  %v430_v0 = vpack.c.bf16 %v403_v61, %v403_v61  ;;  %v429_v1 = vpack.c.bf16 %v399_v60, %v399_v60  ;;  %v5212_v34 = vld [vmem:[#allocation4 + $0x6c] ss:$16 sps:$4 sm:$0xff]   ;;  %v5243_v61 = vld [vmem:[#allocation4 + $0x1c8] ss:$16 sps:$4 sm:$0xff]  }
 0x245   :  { %v5215_v36 = vld [vmem:[#allocation4 + $0x8c] ss:$16 sps:$4 sm:$0xff]  }
 0x246   :  { %v410_v2 = vcombine.low %v406_v62, %v407_v63  ;;  %v439_v3 = vpack.i.b16 %v430_v0, %v430_v0  ;;  %v432_v4 = vpack.i.b16 %v429_v1, %v429_v1  ;;  %v5245_v60 = vld [vmem:[#allocation4 + $0x1cc] ss:$16 sps:$4 sm:$0xff]   ;;  %v5246_v63 = vld [vmem:[#allocation4 + $0x1e8] ss:$16 sps:$4 sm:$0xff]   ;;  %v1220_v0 = vld [vmem:[#allocation6] sm:$0xff] }
 0x247   :  { %v5248_v62 = vld [vmem:[#allocation4 + $0x1ec] ss:$16 sps:$4 sm:$0xff]   ;;  %v1224_v1 = vld [vmem:[#allocation6 + $0x20] sm:$0xff] }
 0x248   :  { %v417_v7 = vrot.slane %v410_v2, %v5720_v51  ;;  %v444_v10 = vrot.slane %v439_v3, %v5728_v57  ;;  %v437_v11 = vrot.slane %v432_v4, %v5728_v57  ;;  %v1348_v2 = vld [vmem:[#allocation6 + $0x400] sm:$0xff]  ;;  %v4667_v3 = vcombine.high %v1220_v0, %v1224_v1 }
 0x249   :  { %v1352_v4 = vld [vmem:[#allocation6 + $0x420] sm:$0xff] }
 0x24a   :  { %v446_v13 = vmul.bf16 %v444_v10, %v428_v9  ;;  %v424_v14 = vrot.slane %v417_v7, %v5720_v51  ;;  %v445_v15 = vmul.bf16 %v437_v11, %v427_v6  ;;  %v4666_v6 = vcombine.low %v1220_v0, %v1224_v1  ;;  %v1228_v10 = vld [vmem:[#allocation6 + $0x40] sm:$0xff] }
 0x24b   :  { %v4794_v7 = vcombine.low %v1348_v2, %v1352_v4  ;;  %v4795_v9 = vcombine.high %v1348_v2, %v1352_v4  ;;  %v1232_v11 = vld [vmem:[#allocation6 + $0x60] sm:$0xff] }
 0x24c   :  { %v426_v16 = vsub.f32 %v394_v12, %v424_v14  ;;  %v1356_v12 = vld [vmem:[#allocation6 + $0x440] sm:$0xff] }
 0x24d   :  { %2797 = vmatprep.subr.bf16.mxu0 %v4795_v9  ;;  %v1360_v14 = vld [vmem:[#allocation6 + $0x460] sm:$0xff] }
 0x24e   :  { %v455_v5 = vrot.slane %v426_v16, %v5731_v58  ;;  %v451_v17 = vrot.slane %v426_v16, %v5728_v57  ;;  %2798 = vmatpush1.bf16.msra.mxu0 %v4794_v7  ;;  %v4802_v16 = vcombine.low %v1356_v12, %v1360_v14  ;;  %v1408_v0 = vld [vmem:[#allocation6 + $0x5e0] sm:$0xff] }
 0x24f   :  { %v1284_v4 = vld [vmem:[#allocation6 + $0x200] sm:$0xff] }
 0x250   :  { %v459_v18 = vpack.c.bf16 %v455_v5, %v455_v5  ;;  %v458_v19 = vpack.c.bf16 %v451_v17, %v451_v17  ;;  %v4803_v5 = vcombine.high %v1356_v12, %v1360_v14  ;;  %v1236_v17 = vld [vmem:[#allocation6 + $0x80] sm:$0xff] }
 0x251   :  { %v1412_v7 = vld [vmem:[#allocation6 + $0x600] sm:$0xff] }
 0x252   :  { %v468_v8 = vpack.i.b16 %v459_v18, %v459_v18  ;;  %v461_v20 = vpack.i.b16 %v458_v19, %v458_v19  ;;  %2799 = vmatprep.subr.bf16.mxu0 %v4803_v5  ;;  %v1240_v18 = vld [vmem:[#allocation6 + $0xa0] sm:$0xff] }
 0x253   :  { %v1364_v19 = vld [vmem:[#allocation6 + $0x480] sm:$0xff]  ;;  %2800 = vmatpush1.bf16.msra.mxu0 %v4802_v16 }
 0x254   :  { %v473_v21 = vrot.slane %v468_v8, %v5728_v57  ;;  %v466_v22 = vrot.slane %v461_v20, %v5728_v57  ;;  %v4683_v8 = vcombine.high %v1236_v17, %v1240_v18  ;;  %v1368_v20 = vld [vmem:[#allocation6 + $0x4a0] sm:$0xff] }
 0x255   :  { %v1292_v14 = vld [vmem:[#allocation6 + $0x240] sm:$0xff] }
 0x256   :  { %v475_v23 = vadd.bf16 %v473_v21, %v446_v13  ;;  %v474_v24 = vadd.bf16 %v466_v22, %v445_v15  ;;  %v4675_v13 = vcombine.high %v1228_v10, %v1232_v11  ;;  %v4674_v15 = vcombine.low %v1228_v10, %v1232_v11  ;;  %v1416_v10 = vld [vmem:[#allocation6 + $0x620] sm:$0xff] }
 0x257   :  { %v4682_v21 = vcombine.low %v1236_v17, %v1240_v18  ;;  %v4810_v22 = vcombine.low %v1364_v19, %v1368_v20  ;;  %v4858_v12 = vcombine.low %v1412_v7, %v1416_v10  ;;  %v1420_v16 = vld [vmem:[#allocation6 + $0x640] sm:$0xff] }
 0x258   :  { %vm477_vm2 = vcmp.gt.bf16.partialorder %v475_v23, 0  ;;  %v479_v25 = vmul.bf16 1045249613, %v475_v23  ;;  %vm476_vm3 = vcmp.gt.bf16.partialorder %v474_v24, 0  ;;  %v478_v26 = vmul.bf16 1045249613, %v474_v24 }
 0x259   :  { %v1424_v17 = vld [vmem:[#allocation6 + $0x660] sm:$0xff] }
 0x25a   :  { %v481_v28 = vsel %vm477_vm2, %v475_v23, %v479_v25  ;;  %v5750_v29 = vsel %vm476_vm3, %v474_v24, %v478_v26  ;;  %v4811_v23 = vcombine.high %v1364_v19, %v1368_v20  ;;  %v1244_v24 = vld [vmem:[#allocation6 + $0xc0] sm:$0xff]  ;;  %v4866_v19 = vcombine.low %v1420_v16, %v1424_v17 }
 0x25b   :  { %898 = vmatprep.mubr.bf16.mxu1 %v481_v28  ;;  %v1248_v25 = vld [vmem:[#allocation6 + $0xe0] sm:$0xff] }
 0x25c   :  { %899 = vmatmul.mubr.bf16.vlgmr.msra.gmra.mrb[4].mxu1 %v5750_v29  ;;  %2801 = vmatprep.subr.bf16.mxu0 %v4811_v23  ;;  %v1372_v26 = vld [vmem:[#allocation6 + $0x4c0] sm:$0xff] }
 0x25d   :  { %908 = vmatpush1.bf16.msra.mxu1 %v5201_v27  ;;  %939 = vmatprep.mubr.bf16.mxu1 %v481_v28  ;;  %v4691_v27 = vcombine.high %v1244_v24, %v1248_v25  ;;  %v1376_v28 = vld [vmem:[#allocation6 + $0x4e0] sm:$0xff] }
 0x25e   :  { %909 = vmatprep.subr.bf16.mxu1 %v5206_v30  ;;  %2802 = vmatpush1.bf16.msra.mxu0 %v4810_v22  ;;  %v4818_v30 = vcombine.low %v1372_v26, %v1376_v28  ;;  %v1300_v20 = vld [vmem:[#allocation6 + $0x280] sm:$0xff] }
 0x25f   :  { %v1428_v22 = vld [vmem:[#allocation6 + $0x680] sm:$0xff] }
 0x261   :  { %910 = vmatpush1.bf16.msra.mxu1 %v5204_v31  ;;  %v4819_v31 = vcombine.high %v1372_v26, %v1376_v28  ;;  %v1308_v28 = vld [vmem:[#allocation6 + $0x2c0] sm:$0xff] }
 0x262   :  { %911 = vmatprep.subr.bf16.mxu1 %v5209_v32  ;;  %v1252_v32 = vld [vmem:[#allocation6 + $0x100] sm:$0xff] }
 0x263   :  { %2803 = vmatprep.subr.bf16.mxu0 %v4819_v31 }
 0x264   :  { %2804 = vmatpush1.bf16.msra.mxu0 %v4818_v30  ;;  %v1436_v30 = vld [vmem:[#allocation6 + $0x6c0] sm:$0xff] }
 0x265   :  { %912 = vmatpush1.bf16.msra.mxu1 %v5207_v33  ;;  %v1256_v33 = vld [vmem:[#allocation6 + $0x120] sm:$0xff] }
 0x266   :  { %913 = vmatprep.subr.bf16.mxu1 %v5212_v34  ;;  %v1380_v34 = vld [vmem:[#allocation6 + $0x500] sm:$0xff] }
 0x269   :  { %914 = vmatpush1.bf16.msra.mxu1 %v5210_v35  ;;  %v4699_v35 = vcombine.high %v1252_v32, %v1256_v33 }
 0x26a   :  { %915 = vmatprep.subr.bf16.mxu1 %v5215_v36  ;;  %v1384_v36 = vld [vmem:[#allocation6 + $0x520] sm:$0xff] }
 0x26d   :  { %916 = vmatpush1.bf16.msra.mxu1 %v5213_v37  ;;  %v4698_v37 = vcombine.low %v1252_v32, %v1256_v33  ;;  %v1440_v32 = vld [vmem:[#allocation6 + $0x6e0] sm:$0xff] }
 0x26e   :  { %917 = vmatprep.subr.bf16.mxu1 %v5218_v38  ;;  %v4826_v38 = vcombine.low %v1380_v34, %v1384_v36 }
 0x271   :  { %918 = vmatpush1.bf16.msra.mxu1 %v5216_v39  ;;  %v4827_v39 = vcombine.high %v1380_v34, %v1384_v36  ;;  %v4882_v34 = vcombine.low %v1436_v30, %v1440_v32  ;;  %v1316_v36 = vld [vmem:[#allocation6 + $0x300] sm:$0xff] }
 0x272   :  { %919 = vmatprep.subr.bf16.mxu1 %v5221_v40  ;;  %v1260_v40 = vld [vmem:[#allocation6 + $0x140] sm:$0xff] }
 0x273   :  { %2805 = vmatprep.subr.bf16.mxu0 %v4827_v39 }
 0x274   :  { %2806 = vmatpush1.bf16.msra.mxu0 %v4826_v38  ;;  %v1444_v38 = vld [vmem:[#allocation6 + $0x700] sm:$0xff] }
 0x275   :  { %920 = vmatpush1.bf16.msra.mxu1 %v5219_v41  ;;  %v1264_v41 = vld [vmem:[#allocation6 + $0x160] sm:$0xff] }
 0x276   :  { %921 = vmatprep.subr.bf16.mxu1 %v5224_v42  ;;  %v1388_v42 = vld [vmem:[#allocation6 + $0x540] sm:$0xff] }
 0x279   :  { %922 = vmatpush1.bf16.msra.mxu1 %v5222_v43  ;;  %v4707_v43 = vcombine.high %v1260_v40, %v1264_v41 }
 0x27a   :  { %923 = vmatprep.subr.bf16.mxu1 %v5227_v44  ;;  %v1392_v44 = vld [vmem:[#allocation6 + $0x560] sm:$0xff] }
 0x27d   :  { %924 = vmatpush1.bf16.msra.mxu1 %v5225_v45  ;;  %v4706_v45 = vcombine.low %v1260_v40, %v1264_v41  ;;  %v1448_v41 = vld [vmem:[#allocation6 + $0x720] sm:$0xff] }
 0x27e   :  { %925 = vmatprep.subr.bf16.mxu1 %v5230_v46  ;;  %v4834_v46 = vcombine.low %v1388_v42, %v1392_v44 }
 0x281   :  { %926 = vmatpush1.bf16.msra.mxu1 %v5228_v47  ;;  %v4835_v47 = vcombine.high %v1388_v42, %v1392_v44  ;;  %v1324_v42 = vld [vmem:[#allocation6 + $0x340] sm:$0xff]  ;;  %v4890_v44 = vcombine.low %v1444_v38, %v1448_v41 }
 0x282   :  { %927 = vmatprep.subr.bf16.mxu1 %v5233_v48  ;;  %v1268_v48 = vld [vmem:[#allocation6 + $0x180] sm:$0xff] }
 0x283   :  { %2807 = vmatprep.subr.bf16.mxu0 %v4835_v47  ;;  %v1452_v47 = vld [vmem:[#allocation6 + $0x740] sm:$0xff] }
 0x284   :  { %2808 = vmatpush1.bf16.msra.mxu0 %v4834_v46 }
 0x285   :  { %928 = vmatpush1.bf16.msra.mxu1 %v5231_v50  ;;  %v1272_v50 = vld [vmem:[#allocation6 + $0x1a0] sm:$0xff] }
 0x286   :  { %929 = vmatprep.subr.bf16.mxu1 %v5236_v52  ;;  %v1396_v52 = vld [vmem:[#allocation6 + $0x580] sm:$0xff] }
 0x289   :  { %930 = vmatpush1.bf16.msra.mxu1 %v5234_v53  ;;  %v4715_v53 = vcombine.high %v1268_v48, %v1272_v50 }
 0x28a   :  { %931 = vmatprep.subr.bf16.mxu1 %v5239_v54  ;;  %v1400_v54 = vld [vmem:[#allocation6 + $0x5a0] sm:$0xff] }
 0x28d   :  { %932 = vmatpush1.bf16.msra.mxu1 %v5237_v55  ;;  %v4714_v55 = vcombine.low %v1268_v48, %v1272_v50  ;;  %v1456_v48 = vld [vmem:[#allocation6 + $0x760] sm:$0xff] }
 0x28e   :  { %933 = vmatprep.subr.bf16.mxu1 %v5242_v56  ;;  %v4842_v56 = vcombine.low %v1396_v52, %v1400_v54  ;;  %v1332_v50 = vld [vmem:[#allocation6 + $0x380] sm:$0xff] }
 0x291   :  { %934 = vmatpush1.bf16.msra.mxu1 %v5240_v59  ;;  %v4843_v59 = vcombine.high %v1396_v52, %v1400_v54  ;;  %v4899_v52 = vcombine.high %v1452_v47, %v1456_v48 }
 0x292   :  { %935 = vmatprep.subr.bf16.mxu1 %v5245_v60  ;;  %v1276_v60 = vld [vmem:[#allocation6 + $0x1c0] sm:$0xff] }
 0x293   :  { %2809 = vmatprep.subr.bf16.mxu0 %v4843_v59 }
 0x294   :  { %2810 = vmatpush1.bf16.msra.mxu0 %v4842_v56  ;;  %v1464_v56 = vld [vmem:[#allocation6 + $0x7a0] sm:$0xff] }
 0x295   :  { %936 = vmatpush1.bf16.msra.mxu1 %v5243_v61  ;;  %v1280_v61 = vld [vmem:[#allocation6 + $0x1e0] sm:$0xff] }
 0x296   :  { %937 = vmatprep.subr.bf16.mxu1 %v5248_v62  ;;  %v1404_v62 = vld [vmem:[#allocation6 + $0x5c0] sm:$0xff]  ;;  %v4722_v1 = vcombine.low %v1276_v60, %v1280_v61 }
 0x297   :  { %v4850_v2 = vcombine.low %v1404_v62, %v1408_v0 }
 0x299   :  { %938 = vmatpush1.bf16.msra.mxu1 %v5246_v63  ;;  %v4723_v63 = vcombine.high %v1276_v60, %v1280_v61  ;;  %v4898_v60 = vcombine.low %v1452_v47, %v1456_v48  ;;  %v1340_v61 = vld [vmem:[#allocation6 + $0x3c0] sm:$0xff] }
 0x29a   :  { %2756 = vmatprep.subr.bf16.mxu1 %v4667_v3  ;;  %v4851_v3 = vcombine.high %v1404_v62, %v1408_v0  ;;  %v1344_v62 = vld [vmem:[#allocation6 + $0x3e0] sm:$0xff] }
 0x29c   :  { %940 = vmatmul.mubr.bf16.vlgmr.msra.gmra.mrb[8].mxu1 %v5750_v29  ;;  %v4690_v29 = vcombine.low %v1244_v24, %v1248_v25  ;;  %2811 = vmatprep.subr.bf16.mxu0 %v4851_v3  ;;  %v1432_v24 = vld [vmem:[#allocation6 + $0x6a0] sm:$0xff]  ;;  %v4787_v3 = vcombine.high %v1340_v61, %v1344_v62 }
 0x29d   :  { %2757 = vmatpush1.bf16.msra.mxu1 %v4666_v6  ;;  %v1288_v6 = vld [vmem:[#allocation6 + $0x220] sm:$0xff]  ;;  %2812 = vmatpush1.bf16.msra.mxu0 %v4850_v2  ;;  %v4874_v26 = vcombine.low %v1428_v22, %v1432_v24 }
 0x29e   :  { %2758 = vmatprep.subr.bf16.mxu1 %v4675_v13  ;;  %v4731_v9 = vcombine.high %v1284_v4, %v1288_v6  ;;  %v4730_v11 = vcombine.low %v1284_v4, %v1288_v6  ;;  %v4859_v13 = vcombine.high %v1412_v7, %v1416_v10  ;;  %v1472_v2 = vld [vmem:[#allocation6 + $0x7e0] sm:$0xff]  ;;  %v4786_v7 = vcombine.low %v1340_v61, %v1344_v62 }
 0x2a0   :  { %2813 = vmatprep.subr.bf16.mxu0 %v4859_v13 }
 0x2a1   :  { %2759 = vmatpush1.bf16.msra.mxu1 %v4674_v15  ;;  %v1296_v15 = vld [vmem:[#allocation6 + $0x260] sm:$0xff]  ;;  %2814 = vmatpush1.bf16.msra.mxu0 %v4858_v12 }
 0x2a2   :  { %2760 = vmatprep.subr.bf16.mxu1 %v4683_v8  ;;  %v4739_v5 = vcombine.high %v1292_v14, %v1296_v15  ;;  %v4738_v18 = vcombine.low %v1292_v14, %v1296_v15  ;;  %v4867_v8 = vcombine.high %v1420_v16, %v1424_v17 }
 0x2a4   :  { %2815 = vmatprep.subr.bf16.mxu0 %v4867_v8 }
 0x2a5   :  { %2761 = vmatpush1.bf16.msra.mxu1 %v4682_v21  ;;  %v1304_v21 = vld [vmem:[#allocation6 + $0x2a0] sm:$0xff]  ;;  %2816 = vmatpush1.bf16.msra.mxu0 %v4866_v19 }
 0x2a6   :  { %2762 = vmatprep.subr.bf16.mxu1 %v4691_v27  ;;  %v4747_v23 = vcombine.high %v1300_v20, %v1304_v21  ;;  %v4746_v25 = vcombine.low %v1300_v20, %v1304_v21  ;;  %v4875_v27 = vcombine.high %v1428_v22, %v1432_v24  ;;  %v5766_v20 = vld [vmem:[#allocation6 + $0x8] sm:$0xff]  ;;  %v5770_v22 = vld [vmem:[#allocation6 + $0x10] sm:$0xff] }
 0x2a7   :  { %v5768_v21 = vld [vmem:[#allocation6 + $0x28] sm:$0xff] }
 0x2a8   :  { %2817 = vmatprep.subr.bf16.mxu0 %v4875_v27 }
 0x2a9   :  { %2763 = vmatpush1.bf16.msra.mxu1 %v4690_v29  ;;  %v1312_v29 = vld [vmem:[#allocation6 + $0x2e0] sm:$0xff]  ;;  %2818 = vmatpush1.bf16.msra.mxu0 %v4874_v26  ;;  %v5774_v26 = vld [vmem:[#allocation6 + $0x30] sm:$0xff] }
 0x2aa   :  { %2764 = vmatprep.subr.bf16.mxu1 %v4699_v35  ;;  %v4755_v31 = vcombine.high %v1308_v28, %v1312_v29  ;;  %v4754_v33 = vcombine.low %v1308_v28, %v1312_v29  ;;  %v4883_v35 = vcombine.high %v1436_v30, %v1440_v32  ;;  %v4668_v29 = vcombine.low %v5766_v20, %v5768_v21 }
 0x2ab   :  { %v4670_v30 = vcombine.low %v5770_v22, %v5774_v26 }
 0x2ac   :  { %2819 = vmatprep.subr.bf16.mxu0 %v4883_v35 }
 0x2ad   :  { %2765 = vmatpush1.bf16.msra.mxu1 %v4698_v37  ;;  %v1320_v37 = vld [vmem:[#allocation6 + $0x320] sm:$0xff]  ;;  %2820 = vmatpush1.bf16.msra.mxu0 %v4882_v34 }
 0x2ae   :  { %2766 = vmatprep.subr.bf16.mxu1 %v4707_v43  ;;  %v4762_v39 = vcombine.low %v1316_v36, %v1320_v37  ;;  %v4763_v40 = vcombine.high %v1316_v36, %v1320_v37  ;;  %v1328_v43 = vld [vmem:[#allocation6 + $0x360] sm:$0xff] }
 0x2af   :  { %v4771_v46 = vcombine.high %v1324_v42, %v1328_v43  ;;  %v4770_v54 = vcombine.low %v1324_v42, %v1328_v43 }
 0x2b1   :  { %2767 = vmatpush1.bf16.msra.mxu1 %v4706_v45  ;;  %v4891_v45 = vcombine.high %v1444_v38, %v1448_v41 }
 0x2b2   :  { %2768 = vmatprep.subr.bf16.mxu1 %v4715_v53  ;;  %v1336_v53 = vld [vmem:[#allocation6 + $0x3a0] sm:$0xff] }
 0x2b3   :  { %2821 = vmatprep.subr.bf16.mxu0 %v4891_v45  ;;  %v4779_v59 = vcombine.high %v1332_v50, %v1336_v53  ;;  %v4778_v0 = vcombine.low %v1332_v50, %v1336_v53 }
 0x2b4   :  { %2822 = vmatpush1.bf16.msra.mxu0 %v4890_v44 }
 0x2b5   :  { %2769 = vmatpush1.bf16.msra.mxu1 %v4714_v55  ;;  %v1460_v55 = vld [vmem:[#allocation6 + $0x780] sm:$0xff]  ;;  %2823 = vmatprep.subr.bf16.mxu0 %v4899_v52 }
 0x2b6   :  { %2770 = vmatprep.subr.bf16.mxu1 %v4723_v63  ;;  %v4907_v63 = vcombine.high %v1460_v55, %v1464_v56  ;;  %v4906_v4 = vcombine.low %v1460_v55, %v1464_v56 }
 0x2b8   :  { %2824 = vmatpush1.bf16.msra.mxu0 %v4898_v60 }
 0x2b9   :  { %2771 = vmatpush1.bf16.msra.mxu1 %v4722_v1  ;;  %v1468_v1 = vld [vmem:[#allocation6 + $0x7c0] sm:$0xff]  ;;  %2825 = vmatprep.subr.bf16.mxu0 %v4907_v63 }
 0x2ba   :  { %2772 = vmatprep.subr.bf16.mxu1 %v4731_v9  ;;  %v4915_v6 = vcombine.high %v1468_v1, %v1472_v2  ;;  %v4914_v13 = vcombine.low %v1468_v1, %v1472_v2 }
 0x2bc   :  { %2826 = vmatpush1.bf16.msra.mxu0 %v4906_v4 }
 0x2bd   :  { %2773 = vmatpush1.bf16.msra.mxu1 %v4730_v11  ;;  %2827 = vmatprep.subr.bf16.mxu0 %v4915_v6 }
 0x2be   :  { %2774 = vmatprep.subr.bf16.mxu1 %v4739_v5 }
 0x2c0   :  { %2828 = vmatpush1.bf16.msra.mxu0 %v4914_v13 }
 0x2c1   :  { %2775 = vmatpush1.bf16.msra.mxu1 %v4738_v18 }
 0x2c2   :  { %2776 = vmatprep.subr.bf16.mxu1 %v4747_v23 }
 0x2c5   :  { %2777 = vmatpush1.bf16.msra.mxu1 %v4746_v25  ;;  %v4669_v25 = vcombine.high %v5766_v20, %v5768_v21 }
 0x2c6   :  { %2778 = vmatprep.subr.bf16.mxu1 %v4755_v31 }
 0x2c9   :  { %2779 = vmatpush1.bf16.msra.mxu1 %v4754_v33  ;;  %v4671_v33 = vcombine.high %v5770_v22, %v5774_v26 }
 0x2ca   :  { %2780 = vmatprep.subr.bf16.mxu1 %v4763_v40 }
 0x2cb   :  { %2920 = vmatprep.subr.bf16.mxu0 %v4671_v33 }
 0x2cd   :  { %2781 = vmatpush1.bf16.msra.mxu1 %v4762_v39 }
 0x2ce   :  { %2782 = vmatprep.subr.bf16.mxu1 %v4771_v46 }
 0x2d1   :  { %2783 = vmatpush1.bf16.msra.mxu1 %v4770_v54 }
 0x2d2   :  { %2784 = vmatprep.subr.bf16.mxu1 %v4779_v59 }
 0x2d5   :  { %2785 = vmatpush1.bf16.msra.mxu1 %v4778_v0 }
 0x2d6   :  { %2786 = vmatprep.subr.bf16.mxu1 %v4787_v3 }
 0x2d9   :  { %2787 = vmatpush1.bf16.msra.mxu1 %v4786_v7 }
 0x2da   :  { %2838 = vmatprep.subr.bf16.mxu1 %v4669_v25 }
 0x32f   :  { %v5754_v9 = vpop.f32.mrb[4].mxu1 }
 0x330   :  { %v948_v10 = vrot.slane %v5754_v9, 4  ;;  %v972_v11 = vmul.f32 %v5754_v9, %v5754_v9  ;;  %v5759_v12 = vpop.f32.mrb[5].mxu1 }
 0x331   :  { %v954_v14 = vrot.slane %v5759_v12, 4  ;;  %v973_v15 = vmul.f32 %v5759_v12, %v5759_v12  ;;  %v904_v16 = vpop.f32.mrb[6].mxu1 }
 0x332   :  { %v949_v5 = vadd.f32 %v948_v10, %v5754_v9  ;;  %v976_v17 = vrot.slane %v972_v11, 4  ;;  %v905_v18 = vpop.f32.mrb[7].mxu1 }
 0x333   :  { %v955_v19 = vadd.f32 %v954_v14, %v5759_v12  ;;  %v982_v8 = vrot.slane %v973_v15, 4 }
 0x334   :  { %v950_v23 = vrot.slane %v949_v5, 2  ;;  %v977_v24 = vadd.f32 %v976_v17, %v972_v11 }
 0x335   :  { %v956_v27 = vrot.slane %v955_v19, 2  ;;  %v983_v28 = vadd.f32 %v982_v8, %v973_v15 }
 0x336   :  { %v951_v31 = vadd.f32 %v950_v23, %v949_v5  ;;  %v978_v32 = vrot.slane %v977_v24, 2 }
 0x337   :  { %v957_v34 = vadd.f32 %v956_v27, %v955_v19  ;;  %v984_v35 = vrot.slane %v983_v28, 2 }
 0x338   :  { %v952_v36 = vrot.slane %v951_v31, 1  ;;  %v979_v37 = vadd.f32 %v978_v32, %v977_v24 }
 0x339   :  { %v958_v38 = vrot.slane %v957_v34, 1  ;;  %v985_v39 = vadd.f32 %v984_v35, %v983_v28 }
 0x33a   :  { %v953_v40 = vadd.f32 %v952_v36, %v951_v31  ;;  %v980_v41 = vrot.slane %v979_v37, 1 }
 0x33b   :  { %v959_v42 = vadd.f32 %v958_v38, %v957_v34  ;;  %v986_v43 = vrot.slane %v985_v39, 1 }
 0x33c   :  { %v981_v44 = vadd.f32 %v980_v41, %v979_v37  ;;  %v5782_v45 = vmul.f32 0.125, %v953_v40 }
 0x33d   :  { %v987_v46 = vadd.f32 %v986_v43, %v985_v39  ;;  %v5784_v47 = vmul.f32 0.125, %v959_v42 }
 0x33e   :  { %v1004_v48 = vmul.f32 0.125, %v981_v44  ;;  %v1008_v50 = vmul.f32 %v5782_v45, %v5782_v45 }
 0x33f   :  { %v1005_v52 = vmul.f32 0.125, %v987_v46  ;;  %v1009_v53 = vmul.f32 %v5784_v47, %v5784_v47 }
 0x340   :  { %v1012_v54 = vsub.f32 %v1004_v48, %v1008_v50 }
 0x341   :  { %v1013_v55 = vsub.f32 %v1005_v52, %v1009_v53 }
 0x342   :  { %v1017_v56 = vadd.f32 0.8, %v1012_v54 }
 0x343   :  { %v1018_v59 = vadd.f32 0.8, %v1013_v55 }
 0x344   :  { %5445 = vrsqrt.f32 %v1017_v56 }
 0x345   :  { %5447 = vrsqrt.f32 %v1018_v59  ;;  %v1016_v59 = vld [vmem:[%s6104_s6 + $0x5] sm:$0xf] }
 0x34e   :  { %v5446_v60 = vpop.eup %5445 }
 0x34f   :  { %v5448_v61 = vpop.eup %5447 }
 0x350   :  { %v1029_v62 = vcombine.low %v5446_v60, %v5448_v61  ;;  %v5809_v61 = vsub.s32 2, %v5717_v49 }
 0x352   :  { %v1037_v54 = vrot.slane %v1029_v62, %v5720_v51 }
 0x36f   :  { %v5790_v63 = vpop.f32.mrb[8].mxu1 }
 0x370   :  { %v960_v0 = vrot.slane %v5790_v63, 4  ;;  %v974_v1 = vmul.f32 %v5790_v63, %v5790_v63  ;;  %v5795_v2 = vpop.f32.mrb[9].mxu1 }
 0x371   :  { %v966_v3 = vrot.slane %v5795_v2, 4  ;;  %v975_v4 = vmul.f32 %v5795_v2, %v5795_v2  ;;  %v945_v6 = vpop.f32.mrb[10].mxu1 }
 0x372   :  { %v961_v7 = vadd.f32 %v960_v0, %v5790_v63  ;;  %v988_v10 = vrot.slane %v974_v1, 4  ;;  %v946_v11 = vpop.f32.mrb[11].mxu1  ;;  %v5812_v0 = vsub.s32 3, %v5717_v49 }
 0x373   :  { %v967_v13 = vadd.f32 %v966_v3, %v5795_v2  ;;  %v994_v14 = vrot.slane %v975_v4, 4 }
 0x374   :  { %v962_v15 = vrot.slane %v961_v7, 2  ;;  %v989_v16 = vadd.f32 %v988_v10, %v974_v1 }
 0x375   :  { %v968_v5 = vrot.slane %v967_v13, 2  ;;  %v995_v17 = vadd.f32 %v994_v14, %v975_v4 }
 0x376   :  { %v963_v18 = vadd.f32 %v962_v15, %v961_v7  ;;  %v990_v19 = vrot.slane %v989_v16, 2 }
 0x377   :  { %v969_v8 = vadd.f32 %v968_v5, %v967_v13  ;;  %v996_v23 = vrot.slane %v995_v17, 2 }
 0x378   :  { %v964_v24 = vrot.slane %v963_v18, 1  ;;  %v991_v25 = vadd.f32 %v990_v19, %v989_v16 }
 0x379   :  { %v970_v27 = vrot.slane %v969_v8, 1  ;;  %v997_v28 = vadd.f32 %v996_v23, %v995_v17  ;;  %v1111_v17 = vpack.c.bf16 %v5754_v9, %v5754_v9 }
 0x37a   :  { %v965_v31 = vadd.f32 %v964_v24, %v963_v18  ;;  %v992_v32 = vrot.slane %v991_v25, 1  ;;  %v1112_v18 = vpack.c.bf16 %v5759_v12, %v5759_v12 }
 0x37b   :  { %v971_v33 = vadd.f32 %v970_v27, %v969_v8  ;;  %v998_v34 = vrot.slane %v997_v28, 1 }
 0x37c   :  { %v993_v35 = vadd.f32 %v992_v32, %v991_v25  ;;  %v1002_v36 = vmul.f32 0.125, %v965_v31 }
 0x37d   :  { %v999_v37 = vadd.f32 %v998_v34, %v997_v28  ;;  %v1003_v38 = vmul.f32 0.125, %v971_v33  ;;  %v1114_v28 = vpack.c.bf16 %v5795_v2, %v5795_v2 }
 0x37e   :  { %v1006_v39 = vmul.f32 0.125, %v993_v35  ;;  %v1010_v40 = vmul.f32 %v1002_v36, %v1002_v36 }
 0x37f   :  { %v1007_v41 = vmul.f32 0.125, %v999_v37  ;;  %v1011_v42 = vmul.f32 %v1003_v38, %v1003_v38 }
 0x380   :  { %v1014_v43 = vsub.f32 %v1006_v39, %v1010_v40 }
 0x381   :  { %v1015_v44 = vsub.f32 %v1007_v41, %v1011_v42 }
 0x382   :  { %v1019_v46 = vadd.f32 0.8, %v1014_v43 }
 0x383   :  { %v1020_v48 = vadd.f32 0.8, %v1015_v44 }
 0x384   :  { %5449 = vrsqrt.f32 %v1019_v46 }
 0x385   :  { %5451 = vrsqrt.f32 %v1020_v48 }
 0x38e   :  { %v5450_v50 = vpop.eup %5449 }
 0x38f   :  { %v5452_v52 = vpop.eup %5451 }
 0x390   :  { %v1030_v53 = vcombine.low %v5450_v50, %v5452_v52 }
 0x392   :  { %v1044_v55 = vrot.slane %v1030_v53, %v5720_v51 }
 0x394   :  { %v1045_v56 = vcombine.low %v1037_v54, %v1044_v55 }
 0x396   :  { %v1052_v60 = vrot.slane %v1045_v56, %v5720_v51 }
 0x398   :  { %v1054_v1 = vmul.f32 %v1052_v60, %v1016_v59 }
 0x39a   :  { %v1068_v3 = vrot.slane %v1054_v1, %v5809_v61  ;;  %v1072_v62 = vrot.slane %v1054_v1, %v5812_v0  ;;  %v1060_v4 = vrot.slane %v1054_v1, %v5728_v57  ;;  %v1064_v6 = vrot.slane %v1054_v1, %v5731_v58 }
 0x39c   :  { %v1079_v7 = vmul.f32 %v1068_v3, %v1002_v36  ;;  %v1080_v10 = vmul.f32 %v1072_v62, %v1003_v38  ;;  %v1118_v11 = vpack.c.bf16 %v1072_v62, %v1072_v62  ;;  %v1077_v13 = vmul.f32 %v1060_v4, %v5782_v45  ;;  %v1055_v38 = vld [vmem:[%s6104_s6 + $0x9] sm:$0xf] }
 0x39d   :  { %v1078_v14 = vmul.f32 %v1064_v6, %v5784_v47  ;;  %v1116_v15 = vpack.c.bf16 %v1064_v6, %v1064_v6  ;;  %v1115_v16 = vpack.c.bf16 %v1060_v4, %v1060_v4  ;;  %v1117_v5 = vpack.c.bf16 %v1068_v3, %v1068_v3 }
 0x39e   :  { %v1086_v19 = vcombine.low %v1079_v7, %v1080_v10  ;;  %v1141_v8 = vpack.i.b16 %v1118_v11, %v1118_v11  ;;  %v1113_v45 = vpack.c.bf16 %v5790_v63, %v5790_v63  ;;  %v1229_v7 = vld [vmem:[#allocation6 + $0x48] sm:$0xff]  ;;  %v1230_v11 = vld [vmem:[#allocation6 + $0x50] sm:$0xff] }
 0x39f   :  { %v1085_v23 = vcombine.low %v1077_v13, %v1078_v14  ;;  %v1127_v24 = vpack.i.b16 %v1116_v15, %v1116_v15  ;;  %v1120_v25 = vpack.i.b16 %v1115_v16, %v1115_v16  ;;  %v1134_v27 = vpack.i.b16 %v1117_v5, %v1117_v5  ;;  %v1233_v10 = vld [vmem:[#allocation6 + $0x68] sm:$0xff]  ;;  %v1234_v13 = vld [vmem:[#allocation6 + $0x70] sm:$0xff] }
 0x3a0   :  { %v1100_v47 = vrot.slane %v1086_v19, %v5720_v51  ;;  %v1146_v31 = vrot.slane %v1141_v8, %v5728_v57  ;;  %v4677_v19 = vcombine.high %v1229_v7, %v1233_v10  ;;  %v1237_v8 = vld [vmem:[#allocation6 + $0x88] sm:$0xff] }
 0x3a1   :  { %v1093_v9 = vrot.slane %v1085_v23, %v5720_v51  ;;  %v1132_v12 = vrot.slane %v1127_v24, %v5728_v57  ;;  %v1125_v32 = vrot.slane %v1120_v25, %v5728_v57  ;;  %v1139_v33 = vrot.slane %v1134_v27, %v5728_v57  ;;  %v1241_v27 = vld [vmem:[#allocation6 + $0xa8] sm:$0xff] }
 0x3a2   :  { %v1150_v34 = vmul.bf16 %v1146_v31, %v1114_v28  ;;  %v4679_v25 = vcombine.high %v1230_v11, %v1234_v13  ;;  %v4676_v28 = vcombine.low %v1229_v7, %v1233_v10  ;;  %v4678_v31 = vcombine.low %v1230_v11, %v1234_v13 }
 0x3a3   :  { %v1101_v35 = vcombine.low %v1093_v9, %v1100_v47  ;;  %v1148_v36 = vmul.bf16 %v1132_v12, %v1112_v18  ;;  %v1147_v37 = vmul.bf16 %v1125_v32, %v1111_v17  ;;  %v1149_v63 = vmul.bf16 %v1139_v33, %v1113_v45  ;;  %v1238_v45 = vld [vmem:[#allocation6 + $0x90] sm:$0xff]  ;;  %v1245_v32 = vld [vmem:[#allocation6 + $0xc8] sm:$0xff] }
 0x3a4   :  { %v1242_v47 = vld [vmem:[#allocation6 + $0xb0] sm:$0xff]  ;;  %v4685_v9 = vcombine.high %v1237_v8, %v1241_v27  ;;  %v1249_v33 = vld [vmem:[#allocation6 + $0xe8] sm:$0xff]  ;;  %v4684_v20 = vcombine.low %v1237_v8, %v1241_v27 }
 0x3a5   :  { %v1108_v2 = vrot.slane %v1101_v35, %v5720_v51  ;;  %v4687_v12 = vcombine.high %v1238_v45, %v1242_v47  ;;  %v1250_v35 = vld [vmem:[#allocation6 + $0xf0] sm:$0xff]  ;;  %v4686_v21 = vcombine.low %v1238_v45, %v1242_v47  ;;  %v4693_v22 = vcombine.high %v1245_v32, %v1249_v33  ;;  %v1293_v45 = vld [vmem:[#allocation6 + $0x248] sm:$0xff] }
 0x3a6   :  { %v1297_v47 = vld [vmem:[#allocation6 + $0x268] sm:$0xff] }
 0x3a7   :  { %v1110_v39 = vsub.f32 %v1055_v38, %v1108_v2 }
 0x3a9   :  { %v1159_v40 = vrot.slane %v1110_v39, %v5731_v58  ;;  %v1167_v41 = vrot.slane %v1110_v39, %v5812_v0  ;;  %v1155_v42 = vrot.slane %v1110_v39, %v5728_v57  ;;  %v1163_v43 = vrot.slane %v1110_v39, %v5809_v61 }
 0x3ab   :  { %v1173_v44 = vpack.c.bf16 %v1159_v40, %v1159_v40  ;;  %v1175_v46 = vpack.c.bf16 %v1167_v41, %v1167_v41  ;;  %v1172_v48 = vpack.c.bf16 %v1155_v42, %v1155_v42  ;;  %v1174_v50 = vpack.c.bf16 %v1163_v43, %v1163_v43  ;;  %v1261_v40 = vld [vmem:[#allocation6 + $0x148] sm:$0xff]  ;;  %v1262_v42 = vld [vmem:[#allocation6 + $0x150] sm:$0xff] }
 0x3ac   :  { %v1265_v41 = vld [vmem:[#allocation6 + $0x168] sm:$0xff]  ;;  %v1266_v43 = vld [vmem:[#allocation6 + $0x170] sm:$0xff] }
 0x3ad   :  { %v1184_v52 = vpack.i.b16 %v1173_v44, %v1173_v44  ;;  %v1198_v53 = vpack.i.b16 %v1175_v46, %v1175_v46  ;;  %v1177_v54 = vpack.i.b16 %v1172_v48, %v1172_v48  ;;  %v1191_v55 = vpack.i.b16 %v1174_v50, %v1174_v50 }
 0x3ae   :  { %v4709_v48 = vcombine.high %v1261_v40, %v1265_v41  ;;  %v4711_v50 = vcombine.high %v1262_v42, %v1266_v43 }
 0x3af   :  { %v1189_v56 = vrot.slane %v1184_v52, %v5728_v57  ;;  %v1203_v59 = vrot.slane %v1198_v53, %v5728_v57  ;;  %v1182_v60 = vrot.slane %v1177_v54, %v5728_v57  ;;  %v1196_v1 = vrot.slane %v1191_v55, %v5728_v57  ;;  %v1269_v52 = vld [vmem:[#allocation6 + $0x188] sm:$0xff]  ;;  %v1270_v54 = vld [vmem:[#allocation6 + $0x190] sm:$0xff] }
 0x3b0   :  { %v1273_v53 = vld [vmem:[#allocation6 + $0x1a8] sm:$0xff]  ;;  %v1274_v55 = vld [vmem:[#allocation6 + $0x1b0] sm:$0xff] }
 0x3b1   :  { %v1205_v3 = vadd.bf16 %v1189_v56, %v1148_v36  ;;  %v1207_v62 = vadd.bf16 %v1203_v59, %v1150_v34  ;;  %v1204_v4 = vadd.bf16 %v1182_v60, %v1147_v37  ;;  %v1206_v6 = vadd.bf16 %v1196_v1, %v1149_v63  ;;  %v1246_v34 = vld [vmem:[#allocation6 + $0xd0] sm:$0xff] }
 0x3b2   :  { %v4695_v26 = vcombine.high %v1246_v34, %v1250_v35  ;;  %v1254_v36 = vld [vmem:[#allocation6 + $0x110] sm:$0xff]  ;;  %v4692_v63 = vcombine.low %v1245_v32, %v1249_v33  ;;  %v4694_v38 = vcombine.low %v1246_v34, %v1250_v35  ;;  %v4708_v56 = vcombine.low %v1261_v40, %v1265_v41  ;;  %v1301_v34 = vld [vmem:[#allocation6 + $0x288] sm:$0xff] }
 0x3b3   :  { %vm1209_vm4 = vcmp.gt.bf16.partialorder %v1205_v3, 0  ;;  %v1213_v14 = vmul.bf16 1045249613, %v1205_v3  ;;  %vm1211_vm5 = vcmp.gt.bf16.partialorder %v1207_v62, 0  ;;  %v1215_v15 = vmul.bf16 1045249613, %v1207_v62 }
 0x3b4   :  { %vm1208_vm6 = vcmp.gt.bf16.partialorder %v1204_v4, 0  ;;  %v1212_v16 = vmul.bf16 1045249613, %v1204_v4  ;;  %vm1210_vm7 = vcmp.gt.bf16.partialorder %v1206_v6, 0  ;;  %v1214_v5 = vmul.bf16 1045249613, %v1206_v6 }
 0x3b5   :  { %v5846_v17 = vsel %vm1209_vm4, %v1205_v3, %v1213_v14  ;;  %v5848_v18 = vsel %vm1211_vm5, %v1207_v62, %v1215_v15  ;;  %v1258_v37 = vld [vmem:[#allocation6 + $0x130] sm:$0xff]  ;;  %v4710_v59 = vcombine.low %v1262_v42, %v1266_v43  ;;  %v4717_v60 = vcombine.high %v1269_v52, %v1273_v53  ;;  %v1277_v3 = vld [vmem:[#allocation6 + $0x1c8] sm:$0xff] }
 0x3b6   :  { %2788 = vmatprep.mubr.bf16.mxu1 %v5846_v17  ;;  %2829 = vmatprep.mubr.bf16.mxu0 %v5848_v18  ;;  %v5852_v23 = vsel %vm1208_vm6, %v1204_v4, %v1212_v16  ;;  %v5854_v24 = vsel %vm1210_vm7, %v1206_v6, %v1214_v5  ;;  %v4703_v39 = vcombine.high %v1254_v36, %v1258_v37  ;;  %v1281_v62 = vld [vmem:[#allocation6 + $0x1e8] sm:$0xff]  ;;  %v1278_v4 = vld [vmem:[#allocation6 + $0x1d0] sm:$0xff] }
 0x3b7   :  { %2789 = vmatmul.mubr.bf16.vlgmr.msra.gmra.mrb[12].mxu1 %v5852_v23  ;;  %2830 = vmatmul.mubr.bf16.vlgmr.msra.gmra.mrb[4].mxu0 %v5854_v24  ;;  %v4702_v46 = vcombine.low %v1254_v36, %v1258_v37  ;;  %v4719_v1 = vcombine.high %v1270_v54, %v1274_v55  ;;  %v1282_v6 = vld [vmem:[#allocation6 + $0x1f0] sm:$0xff]  ;;  %v4716_v7 = vcombine.low %v1269_v52, %v1273_v53  ;;  %v1285_v14 = vld [vmem:[#allocation6 + $0x208] sm:$0xff] }
 0x3b8   :  { %2839 = vmatpush1.bf16.msra.mxu1 %v4668_v29  ;;  %2921 = vmatpush1.bf16.msra.mxu0 %v4670_v30  ;;  %v1253_v29 = vld [vmem:[#allocation6 + $0x108] sm:$0xff]  ;;  %v4718_v10 = vcombine.low %v1270_v54, %v1274_v55  ;;  %v4725_v11 = vcombine.high %v1277_v3, %v1281_v62  ;;  %v4727_v13 = vcombine.high %v1278_v4, %v1282_v6  ;;  %v1286_v16 = vld [vmem:[#allocation6 + $0x210] sm:$0xff] }
 0x3b9   :  { %2870 = vmatprep.mubr.bf16.mxu1 %v5846_v17  ;;  %2952 = vmatprep.mubr.bf16.mxu0 %v5846_v17  ;;  %v1257_v30 = vld [vmem:[#allocation6 + $0x128] sm:$0xff]  ;;  %v1290_v5 = vld [vmem:[#allocation6 + $0x230] sm:$0xff]  ;;  %v4726_v8 = vcombine.low %v1278_v4, %v1282_v6  ;;  %v4741_v32 = vcombine.high %v1293_v45, %v1297_v47 }
 0x3ba   :  { %2840 = vmatprep.subr.bf16.mxu1 %v4677_v19  ;;  %2922 = vmatprep.subr.bf16.mxu0 %v4679_v25  ;;  %v4701_v2 = vcombine.high %v1253_v29, %v1257_v30  ;;  %v4700_v44 = vcombine.low %v1253_v29, %v1257_v30  ;;  %v1289_v15 = vld [vmem:[#allocation6 + $0x228] sm:$0xff]  ;;  %v4724_v19 = vcombine.low %v1277_v3, %v1281_v62 }
 0x3bb   :  { %v4733_v25 = vcombine.high %v1285_v14, %v1289_v15  ;;  %v4735_v27 = vcombine.high %v1286_v16, %v1290_v5  ;;  %v1305_v35 = vld [vmem:[#allocation6 + $0x2a8] sm:$0xff] }
 0x3bc   :  { %2841 = vmatpush1.bf16.msra.mxu1 %v4676_v28  ;;  %2923 = vmatpush1.bf16.msra.mxu0 %v4678_v31  ;;  %v1294_v28 = vld [vmem:[#allocation6 + $0x250] sm:$0xff]  ;;  %v4749_v29 = vcombine.high %v1301_v34, %v1305_v35  ;;  %v1309_v36 = vld [vmem:[#allocation6 + $0x2c8] sm:$0xff] }
 0x3bd   :  { %2842 = vmatprep.subr.bf16.mxu1 %v4685_v9  ;;  %2924 = vmatprep.subr.bf16.mxu0 %v4687_v12  ;;  %v1298_v31 = vld [vmem:[#allocation6 + $0x270] sm:$0xff]  ;;  %v4732_v9 = vcombine.low %v1285_v14, %v1289_v15  ;;  %v4734_v12 = vcombine.low %v1286_v16, %v1290_v5  ;;  %v1313_v37 = vld [vmem:[#allocation6 + $0x2e8] sm:$0xff] }
 0x3be   :  { %v4743_v33 = vcombine.high %v1294_v28, %v1298_v31  ;;  %v4757_v40 = vcombine.high %v1309_v36, %v1313_v37  ;;  %v1317_v42 = vld [vmem:[#allocation6 + $0x308] sm:$0xff] }
 0x3bf   :  { %v1321_v43 = vld [vmem:[#allocation6 + $0x328] sm:$0xff] }
 0x3c0   :  { %2843 = vmatpush1.bf16.msra.mxu1 %v4684_v20  ;;  %2925 = vmatpush1.bf16.msra.mxu0 %v4686_v21  ;;  %v1302_v20 = vld [vmem:[#allocation6 + $0x290] sm:$0xff]  ;;  %v4765_v52 = vcombine.high %v1317_v42, %v1321_v43  ;;  %v1325_v54 = vld [vmem:[#allocation6 + $0x348] sm:$0xff] }
 0x3c1   :  { %2844 = vmatprep.subr.bf16.mxu1 %v4693_v22  ;;  %2926 = vmatprep.subr.bf16.mxu0 %v4695_v26  ;;  %v1306_v21 = vld [vmem:[#allocation6 + $0x2b0] sm:$0xff]  ;;  %v4740_v22 = vcombine.low %v1293_v45, %v1297_v47  ;;  %v4742_v26 = vcombine.low %v1294_v28, %v1298_v31  ;;  %v1329_v55 = vld [vmem:[#allocation6 + $0x368] sm:$0xff] }
 0x3c2   :  { %v4751_v30 = vcombine.high %v1302_v20, %v1306_v21  ;;  %v4773_v3 = vcombine.high %v1325_v54, %v1329_v55  ;;  %v1333_v4 = vld [vmem:[#allocation6 + $0x388] sm:$0xff] }
 0x3c3   :  { %v1337_v6 = vld [vmem:[#allocation6 + $0x3a8] sm:$0xff] }
 0x3c4   :  { %2845 = vmatpush1.bf16.msra.mxu1 %v4692_v63  ;;  %2927 = vmatpush1.bf16.msra.mxu0 %v4694_v38  ;;  %v1310_v63 = vld [vmem:[#allocation6 + $0x2d0] sm:$0xff]  ;;  %v4781_v14 = vcombine.high %v1333_v4, %v1337_v6  ;;  %v1341_v16 = vld [vmem:[#allocation6 + $0x3c8] sm:$0xff] }
 0x3c5   :  { %2846 = vmatprep.subr.bf16.mxu1 %v4701_v2  ;;  %2928 = vmatprep.subr.bf16.mxu0 %v4703_v39  ;;  %v1314_v38 = vld [vmem:[#allocation6 + $0x2f0] sm:$0xff]  ;;  %v4748_v2 = vcombine.low %v1301_v34, %v1305_v35  ;;  %v4750_v39 = vcombine.low %v1302_v20, %v1306_v21  ;;  %v1345_v5 = vld [vmem:[#allocation6 + $0x3e8] sm:$0xff] }
 0x3c6   :  { %v4759_v41 = vcombine.high %v1310_v63, %v1314_v38  ;;  %v4789_v45 = vcombine.high %v1341_v16, %v1345_v5  ;;  %v1349_v28 = vld [vmem:[#allocation6 + $0x408] sm:$0xff] }
 0x3c7   :  { %v1353_v31 = vld [vmem:[#allocation6 + $0x428] sm:$0xff] }
 0x3c8   :  { %2847 = vmatpush1.bf16.msra.mxu1 %v4700_v44  ;;  %2929 = vmatpush1.bf16.msra.mxu0 %v4702_v46  ;;  %v1318_v44 = vld [vmem:[#allocation6 + $0x310] sm:$0xff]  ;;  %v4797_v34 = vcombine.high %v1349_v28, %v1353_v31  ;;  %v1357_v20 = vld [vmem:[#allocation6 + $0x448] sm:$0xff] }
 0x3c9   :  { %2848 = vmatprep.subr.bf16.mxu1 %v4709_v48  ;;  %2930 = vmatprep.subr.bf16.mxu0 %v4711_v50  ;;  %v1322_v46 = vld [vmem:[#allocation6 + $0x330] sm:$0xff]  ;;  %v4756_v48 = vcombine.low %v1309_v36, %v1313_v37  ;;  %v4758_v50 = vcombine.low %v1310_v63, %v1314_v38  ;;  %v1361_v21 = vld [vmem:[#allocation6 + $0x468] sm:$0xff] }
 0x3ca   :  { %v4767_v53 = vcombine.high %v1318_v44, %v1322_v46  ;;  %v4805_v36 = vcombine.high %v1357_v20, %v1361_v21  ;;  %v1365_v63 = vld [vmem:[#allocation6 + $0x488] sm:$0xff] }
 0x3cb   :  { %v1369_v38 = vld [vmem:[#allocation6 + $0x4a8] sm:$0xff] }
 0x3cc   :  { %2849 = vmatpush1.bf16.msra.mxu1 %v4708_v56  ;;  %2931 = vmatpush1.bf16.msra.mxu0 %v4710_v59  ;;  %v1326_v56 = vld [vmem:[#allocation6 + $0x350] sm:$0xff] }
 0x3cd   :  { %2850 = vmatprep.subr.bf16.mxu1 %v4717_v60  ;;  %2932 = vmatprep.subr.bf16.mxu0 %v4719_v1  ;;  %v1330_v59 = vld [vmem:[#allocation6 + $0x370] sm:$0xff]  ;;  %v4764_v60 = vcombine.low %v1317_v42, %v1321_v43  ;;  %v4766_v1 = vcombine.low %v1318_v44, %v1322_v46  ;;  %v4813_v42 = vcombine.high %v1365_v63, %v1369_v38  ;;  %v1373_v44 = vld [vmem:[#allocation6 + $0x4c8] sm:$0xff] }
 0x3ce   :  { %v4775_v62 = vcombine.high %v1326_v56, %v1330_v59  ;;  %v1377_v46 = vld [vmem:[#allocation6 + $0x4e8] sm:$0xff] }
 0x3d0   :  { %2851 = vmatpush1.bf16.msra.mxu1 %v4716_v7  ;;  %2933 = vmatpush1.bf16.msra.mxu0 %v4718_v10  ;;  %v1334_v7 = vld [vmem:[#allocation6 + $0x390] sm:$0xff] }
 0x3d1   :  { %2852 = vmatprep.subr.bf16.mxu1 %v4725_v11  ;;  %2934 = vmatprep.subr.bf16.mxu0 %v4727_v13  ;;  %v1338_v10 = vld [vmem:[#allocation6 + $0x3b0] sm:$0xff]  ;;  %v4772_v11 = vcombine.low %v1325_v54, %v1329_v55  ;;  %v4774_v13 = vcombine.low %v1326_v56, %v1330_v59  ;;  %v4821_v54 = vcombine.high %v1373_v44, %v1377_v46  ;;  %v1381_v56 = vld [vmem:[#allocation6 + $0x508] sm:$0xff] }
 0x3d2   :  { %v4783_v15 = vcombine.high %v1334_v7, %v1338_v10  ;;  %v1385_v59 = vld [vmem:[#allocation6 + $0x528] sm:$0xff] }
 0x3d4   :  { %2853 = vmatpush1.bf16.msra.mxu1 %v4724_v19  ;;  %2935 = vmatpush1.bf16.msra.mxu0 %v4726_v8  ;;  %v1342_v19 = vld [vmem:[#allocation6 + $0x3d0] sm:$0xff] }
 0x3d5   :  { %2854 = vmatprep.subr.bf16.mxu1 %v4733_v25  ;;  %2936 = vmatprep.subr.bf16.mxu0 %v4735_v27  ;;  %v1346_v8 = vld [vmem:[#allocation6 + $0x3f0] sm:$0xff]  ;;  %v4780_v25 = vcombine.low %v1333_v4, %v1337_v6  ;;  %v4782_v27 = vcombine.low %v1334_v7, %v1338_v10  ;;  %v4829_v4 = vcombine.high %v1381_v56, %v1385_v59  ;;  %v1389_v7 = vld [vmem:[#allocation6 + $0x548] sm:$0xff] }
 0x3d6   :  { %v4791_v47 = vcombine.high %v1342_v19, %v1346_v8  ;;  %v1393_v10 = vld [vmem:[#allocation6 + $0x568] sm:$0xff] }
 0x3d8   :  { %2855 = vmatpush1.bf16.msra.mxu1 %v4732_v9  ;;  %2937 = vmatpush1.bf16.msra.mxu0 %v4734_v12  ;;  %v1350_v9 = vld [vmem:[#allocation6 + $0x410] sm:$0xff] }
 0x3d9   :  { %2856 = vmatprep.subr.bf16.mxu1 %v4741_v32  ;;  %2938 = vmatprep.subr.bf16.mxu0 %v4743_v33  ;;  %v1354_v12 = vld [vmem:[#allocation6 + $0x430] sm:$0xff]  ;;  %v4788_v32 = vcombine.low %v1341_v16, %v1345_v5  ;;  %v4790_v33 = vcombine.low %v1342_v19, %v1346_v8  ;;  %v4837_v16 = vcombine.high %v1389_v7, %v1393_v10  ;;  %v1397_v19 = vld [vmem:[#allocation6 + $0x588] sm:$0xff] }
 0x3da   :  { %v4799_v35 = vcombine.high %v1350_v9, %v1354_v12  ;;  %v1401_v8 = vld [vmem:[#allocation6 + $0x5a8] sm:$0xff] }
 0x3dc   :  { %2857 = vmatpush1.bf16.msra.mxu1 %v4740_v22  ;;  %2939 = vmatpush1.bf16.msra.mxu0 %v4742_v26  ;;  %v1358_v22 = vld [vmem:[#allocation6 + $0x450] sm:$0xff] }
 0x3dd   :  { %2858 = vmatprep.subr.bf16.mxu1 %v4749_v29  ;;  %2940 = vmatprep.subr.bf16.mxu0 %v4751_v30  ;;  %v1362_v26 = vld [vmem:[#allocation6 + $0x470] sm:$0xff]  ;;  %v4796_v29 = vcombine.low %v1349_v28, %v1353_v31  ;;  %v4798_v30 = vcombine.low %v1350_v9, %v1354_v12  ;;  %v4845_v28 = vcombine.high %v1397_v19, %v1401_v8  ;;  %v1405_v9 = vld [vmem:[#allocation6 + $0x5c8] sm:$0xff] }
 0x3de   :  { %v4807_v37 = vcombine.high %v1358_v22, %v1362_v26  ;;  %v1409_v12 = vld [vmem:[#allocation6 + $0x5e8] sm:$0xff] }
 0x3e0   :  { %2859 = vmatpush1.bf16.msra.mxu1 %v4748_v2  ;;  %2941 = vmatpush1.bf16.msra.mxu0 %v4750_v39  ;;  %v1366_v2 = vld [vmem:[#allocation6 + $0x490] sm:$0xff] }
 0x3e1   :  { %2860 = vmatprep.subr.bf16.mxu1 %v4757_v40  ;;  %2942 = vmatprep.subr.bf16.mxu0 %v4759_v41  ;;  %v1370_v39 = vld [vmem:[#allocation6 + $0x4b0] sm:$0xff]  ;;  %v4804_v40 = vcombine.low %v1357_v20, %v1361_v21  ;;  %v4806_v41 = vcombine.low %v1358_v22, %v1362_v26  ;;  %v4853_v20 = vcombine.high %v1405_v9, %v1409_v12  ;;  %v1413_v22 = vld [vmem:[#allocation6 + $0x608] sm:$0xff] }
 0x3e2   :  { %v4815_v43 = vcombine.high %v1366_v2, %v1370_v39  ;;  %v1417_v26 = vld [vmem:[#allocation6 + $0x628] sm:$0xff] }
 0x3e4   :  { %2861 = vmatpush1.bf16.msra.mxu1 %v4756_v48  ;;  %2943 = vmatpush1.bf16.msra.mxu0 %v4758_v50  ;;  %v1374_v48 = vld [vmem:[#allocation6 + $0x4d0] sm:$0xff] }
 0x3e5   :  { %2862 = vmatprep.subr.bf16.mxu1 %v4765_v52  ;;  %2944 = vmatprep.subr.bf16.mxu0 %v4767_v53  ;;  %v1378_v50 = vld [vmem:[#allocation6 + $0x4f0] sm:$0xff]  ;;  %v4812_v52 = vcombine.low %v1365_v63, %v1369_v38  ;;  %v4814_v53 = vcombine.low %v1366_v2, %v1370_v39  ;;  %v4861_v63 = vcombine.high %v1413_v22, %v1417_v26  ;;  %v1421_v2 = vld [vmem:[#allocation6 + $0x648] sm:$0xff] }
 0x3e6   :  { %v4823_v55 = vcombine.high %v1374_v48, %v1378_v50  ;;  %v1425_v39 = vld [vmem:[#allocation6 + $0x668] sm:$0xff] }
 0x3e8   :  { %2863 = vmatpush1.bf16.msra.mxu1 %v4764_v60  ;;  %2945 = vmatpush1.bf16.msra.mxu0 %v4766_v1  ;;  %v1382_v60 = vld [vmem:[#allocation6 + $0x510] sm:$0xff] }
 0x3e9   :  { %2864 = vmatprep.subr.bf16.mxu1 %v4773_v3  ;;  %2946 = vmatprep.subr.bf16.mxu0 %v4775_v62  ;;  %v1386_v1 = vld [vmem:[#allocation6 + $0x530] sm:$0xff]  ;;  %v4820_v3 = vcombine.low %v1373_v44, %v1377_v46  ;;  %v4822_v62 = vcombine.low %v1374_v48, %v1378_v50  ;;  %v4869_v44 = vcombine.high %v1421_v2, %v1425_v39  ;;  %v1429_v48 = vld [vmem:[#allocation6 + $0x688] sm:$0xff] }
 0x3ea   :  { %v4831_v6 = vcombine.high %v1382_v60, %v1386_v1  ;;  %v1433_v50 = vld [vmem:[#allocation6 + $0x6a8] sm:$0xff] }
 0x3ec   :  { %2865 = vmatpush1.bf16.msra.mxu1 %v4772_v11  ;;  %2947 = vmatpush1.bf16.msra.mxu0 %v4774_v13  ;;  %v1390_v11 = vld [vmem:[#allocation6 + $0x550] sm:$0xff] }
 0x3ed   :  { %2866 = vmatprep.subr.bf16.mxu1 %v4781_v14  ;;  %2948 = vmatprep.subr.bf16.mxu0 %v4783_v15  ;;  %v1394_v13 = vld [vmem:[#allocation6 + $0x570] sm:$0xff]  ;;  %v4828_v14 = vcombine.low %v1381_v56, %v1385_v59  ;;  %v4830_v15 = vcombine.low %v1382_v60, %v1386_v1  ;;  %v4877_v56 = vcombine.high %v1429_v48, %v1433_v50  ;;  %v1437_v60 = vld [vmem:[#allocation6 + $0x6c8] sm:$0xff] }
 0x3ee   :  { %v4839_v5 = vcombine.high %v1390_v11, %v1394_v13  ;;  %v1441_v1 = vld [vmem:[#allocation6 + $0x6e8] sm:$0xff] }
 0x3f0   :  { %2867 = vmatpush1.bf16.msra.mxu1 %v4780_v25  ;;  %2949 = vmatpush1.bf16.msra.mxu0 %v4782_v27  ;;  %v1398_v25 = vld [vmem:[#allocation6 + $0x590] sm:$0xff] }
 0x3f1   :  { %2868 = vmatprep.subr.bf16.mxu1 %v4789_v45  ;;  %2950 = vmatprep.subr.bf16.mxu0 %v4791_v47  ;;  %v1402_v27 = vld [vmem:[#allocation6 + $0x5b0] sm:$0xff]  ;;  %v4836_v45 = vcombine.low %v1389_v7, %v1393_v10  ;;  %v4838_v47 = vcombine.low %v1390_v11, %v1394_v13  ;;  %v4885_v7 = vcombine.high %v1437_v60, %v1441_v1  ;;  %v1445_v11 = vld [vmem:[#allocation6 + $0x708] sm:$0xff] }
 0x3f2   :  { %v4847_v31 = vcombine.high %v1398_v25, %v1402_v27  ;;  %v1449_v13 = vld [vmem:[#allocation6 + $0x728] sm:$0xff] }
 0x3f4   :  { %2869 = vmatpush1.bf16.msra.mxu1 %v4788_v32  ;;  %2951 = vmatpush1.bf16.msra.mxu0 %v4790_v33  ;;  %v1406_v32 = vld [vmem:[#allocation6 + $0x5d0] sm:$0xff] }
 0x3f5   :  { %2879 = vmatprep.subr.bf16.mxu1 %v4797_v34  ;;  %2961 = vmatprep.subr.bf16.mxu0 %v4799_v35  ;;  %v1410_v33 = vld [vmem:[#allocation6 + $0x5f0] sm:$0xff]  ;;  %v4844_v34 = vcombine.low %v1397_v19, %v1401_v8  ;;  %v4846_v35 = vcombine.low %v1398_v25, %v1402_v27  ;;  %v4893_v19 = vcombine.high %v1445_v11, %v1449_v13  ;;  %v1453_v25 = vld [vmem:[#allocation6 + $0x748] sm:$0xff] }
 0x3f6   :  { %v4855_v21 = vcombine.high %v1406_v32, %v1410_v33  ;;  %v1457_v27 = vld [vmem:[#allocation6 + $0x768] sm:$0xff] }
 0x3f7   :  { %2871 = vmatmul.mubr.bf16.vlgmr.msra.gmra.mrb[16].mxu1 %v5852_v23  ;;  %2953 = vmatmul.mubr.bf16.vlgmr.msra.gmra.mrb[8].mxu0 %v5852_v23 }
 0x3f8   :  { %2880 = vmatpush1.bf16.msra.mxu1 %v4796_v29  ;;  %2911 = vmatprep.mubr.bf16.mxu1 %v5848_v18  ;;  %v1414_v29 = vld [vmem:[#allocation6 + $0x610] sm:$0xff] }
 0x3f9   :  { %2962 = vmatpush1.bf16.msra.mxu0 %v4798_v30  ;;  %2993 = vmatprep.mubr.bf16.mxu0 %v5848_v18  ;;  %v1418_v30 = vld [vmem:[#allocation6 + $0x630] sm:$0xff] }
 0x3fa   :  { %2881 = vmatprep.subr.bf16.mxu1 %v4805_v36  ;;  %2963 = vmatprep.subr.bf16.mxu0 %v4807_v37  ;;  %v4852_v36 = vcombine.low %v1405_v9, %v1409_v12  ;;  %v4854_v37 = vcombine.low %v1406_v32, %v1410_v33  ;;  %v4863_v38 = vcombine.high %v1414_v29, %v1418_v30  ;;  %v1461_v32 = vld [vmem:[#allocation6 + $0x788] sm:$0xff] }
 0x3fb   :  { %v4901_v9 = vcombine.high %v1453_v25, %v1457_v27  ;;  %v1465_v33 = vld [vmem:[#allocation6 + $0x7a8] sm:$0xff] }
 0x3fc   :  { %2882 = vmatpush1.bf16.msra.mxu1 %v4804_v40  ;;  %v1422_v40 = vld [vmem:[#allocation6 + $0x650] sm:$0xff] }
 0x3fd   :  { %2964 = vmatpush1.bf16.msra.mxu0 %v4806_v41  ;;  %2883 = vmatprep.subr.bf16.mxu1 %v4813_v42  ;;  %v1426_v41 = vld [vmem:[#allocation6 + $0x670] sm:$0xff]  ;;  %v4860_v42 = vcombine.low %v1413_v22, %v1417_v26  ;;  %v4909_v22 = vcombine.high %v1461_v32, %v1465_v33 }
 0x3fe   :  { %2965 = vmatprep.subr.bf16.mxu0 %v4815_v43  ;;  %v4862_v43 = vcombine.low %v1414_v29, %v1418_v30  ;;  %v4871_v46 = vcombine.high %v1422_v40, %v1426_v41  ;;  %v1469_v29 = vld [vmem:[#allocation6 + $0x7c8] sm:$0xff] }
 0x3ff   :  { %v1473_v30 = vld [vmem:[#allocation6 + $0x7e8] sm:$0xff] }
 0x400   :  { %2884 = vmatpush1.bf16.msra.mxu1 %v4812_v52  ;;  %v1430_v52 = vld [vmem:[#allocation6 + $0x690] sm:$0xff] }
 0x401   :  { %2966 = vmatpush1.bf16.msra.mxu0 %v4814_v53  ;;  %2885 = vmatprep.subr.bf16.mxu1 %v4821_v54  ;;  %v1434_v53 = vld [vmem:[#allocation6 + $0x6b0] sm:$0xff]  ;;  %v4868_v54 = vcombine.low %v1421_v2, %v1425_v39  ;;  %v4917_v2 = vcombine.high %v1469_v29, %v1473_v30 }
 0x402   :  { %2967 = vmatprep.subr.bf16.mxu0 %v4823_v55  ;;  %v4870_v55 = vcombine.low %v1422_v40, %v1426_v41  ;;  %v4879_v59 = vcombine.high %v1430_v52, %v1434_v53  ;;  %v1223_v40 = vld [vmem:[#allocation6 + $0x18] sm:$0xff] }
 0x403   :  { %v1227_v41 = vld [vmem:[#allocation6 + $0x38] sm:$0xff] }
 0x404   :  { %2886 = vmatpush1.bf16.msra.mxu1 %v4820_v3  ;;  %v1438_v3 = vld [vmem:[#allocation6 + $0x6d0] sm:$0xff] }
 0x405   :  { %2968 = vmatpush1.bf16.msra.mxu0 %v4822_v62  ;;  %2887 = vmatprep.subr.bf16.mxu1 %v4829_v4  ;;  %v1442_v62 = vld [vmem:[#allocation6 + $0x6f0] sm:$0xff]  ;;  %v4876_v4 = vcombine.low %v1429_v48, %v1433_v50  ;;  %v1235_v48 = vld [vmem:[#allocation6 + $0x78] sm:$0xff]  ;;  %v4672_v50 = vcombine.low %v1223_v40, %v1227_v41 }
 0x406   :  { %2969 = vmatprep.subr.bf16.mxu0 %v4831_v6  ;;  %v4878_v6 = vcombine.low %v1430_v52, %v1434_v53  ;;  %v4887_v10 = vcombine.high %v1438_v3, %v1442_v62  ;;  %v1239_v53 = vld [vmem:[#allocation6 + $0x98] sm:$0xff] }
 0x408   :  { %2888 = vmatpush1.bf16.msra.mxu1 %v4828_v14  ;;  %v1446_v14 = vld [vmem:[#allocation6 + $0x710] sm:$0xff] }
 0x409   :  { %2970 = vmatpush1.bf16.msra.mxu0 %v4830_v15  ;;  %2889 = vmatprep.subr.bf16.mxu1 %v4837_v16  ;;  %v1450_v15 = vld [vmem:[#allocation6 + $0x730] sm:$0xff]  ;;  %v4884_v16 = vcombine.low %v1437_v60, %v1441_v1  ;;  %v1251_v60 = vld [vmem:[#allocation6 + $0xf8] sm:$0xff] }
 0x40a   :  { %2971 = vmatprep.subr.bf16.mxu0 %v4839_v5  ;;  %v4886_v5 = vcombine.low %v1438_v3, %v1442_v62  ;;  %v4895_v8 = vcombine.high %v1446_v14, %v1450_v15  ;;  %v1255_v62 = vld [vmem:[#allocation6 + $0x118] sm:$0xff] }
 0x40c   :  { %2890 = vmatpush1.bf16.msra.mxu1 %v4836_v45  ;;  %v1454_v45 = vld [vmem:[#allocation6 + $0x750] sm:$0xff] }
 0x40d   :  { %2972 = vmatpush1.bf16.msra.mxu0 %v4838_v47  ;;  %2891 = vmatprep.subr.bf16.mxu1 %v4845_v28  ;;  %v1458_v47 = vld [vmem:[#allocation6 + $0x770] sm:$0xff]  ;;  %v4892_v28 = vcombine.low %v1445_v11, %v1449_v13  ;;  %v1267_v11 = vld [vmem:[#allocation6 + $0x178] sm:$0xff] }
 0x40e   :  { %2973 = vmatprep.subr.bf16.mxu0 %v4847_v31  ;;  %v4894_v31 = vcombine.low %v1446_v14, %v1450_v15  ;;  %v4903_v12 = vcombine.high %v1454_v45, %v1458_v47  ;;  %v1271_v14 = vld [vmem:[#allocation6 + $0x198] sm:$0xff] }
 0x40f   :  { %v1275_v15 = vld [vmem:[#allocation6 + $0x1b8] sm:$0xff] }
 0x410   :  { %2892 = vmatpush1.bf16.msra.mxu1 %v4844_v34  ;;  %v1462_v34 = vld [vmem:[#allocation6 + $0x790] sm:$0xff] }
 0x411   :  { %2974 = vmatpush1.bf16.msra.mxu0 %v4846_v35  ;;  %2893 = vmatprep.subr.bf16.mxu1 %v4853_v20  ;;  %v1466_v35 = vld [vmem:[#allocation6 + $0x7b0] sm:$0xff]  ;;  %v4900_v20 = vcombine.low %v1453_v25, %v1457_v27  ;;  %v4720_v25 = vcombine.low %v1271_v14, %v1275_v15 }
 0x412   :  { %2975 = vmatprep.subr.bf16.mxu0 %v4855_v21  ;;  %v4902_v21 = vcombine.low %v1454_v45, %v1458_v47  ;;  %v4911_v26 = vcombine.high %v1462_v34, %v1466_v35  ;;  %v1287_v45 = vld [vmem:[#allocation6 + $0x218] sm:$0xff] }
 0x413   :  { %v1291_v47 = vld [vmem:[#allocation6 + $0x238] sm:$0xff] }
 0x414   :  { %2894 = vmatpush1.bf16.msra.mxu1 %v4852_v36  ;;  %v1470_v36 = vld [vmem:[#allocation6 + $0x7d0] sm:$0xff] }
 0x415   :  { %2976 = vmatpush1.bf16.msra.mxu0 %v4854_v37  ;;  %2895 = vmatprep.subr.bf16.mxu1 %v4861_v63  ;;  %v1474_v37 = vld [vmem:[#allocation6 + $0x7f0] sm:$0xff]  ;;  %v4908_v63 = vcombine.low %v1461_v32, %v1465_v33  ;;  %v4736_v32 = vcombine.low %v1287_v45, %v1291_v47 }
 0x416   :  { %2977 = vmatprep.subr.bf16.mxu0 %v4863_v38  ;;  %v4910_v38 = vcombine.low %v1462_v34, %v1466_v35  ;;  %v4919_v39 = vcombine.high %v1470_v36, %v1474_v37  ;;  %v1303_v34 = vld [vmem:[#allocation6 + $0x298] sm:$0xff] }
 0x417   :  { %v1307_v35 = vld [vmem:[#allocation6 + $0x2b8] sm:$0xff] }
 0x418   :  { %2896 = vmatpush1.bf16.msra.mxu1 %v4860_v42  ;;  %v4916_v42 = vcombine.low %v1469_v29, %v1473_v30  ;;  %v4752_v29 = vcombine.low %v1303_v34, %v1307_v35 }
 0x419   :  { %2978 = vmatpush1.bf16.msra.mxu0 %v4862_v43  ;;  %2897 = vmatprep.subr.bf16.mxu1 %v4869_v44  ;;  %v4918_v43 = vcombine.low %v1470_v36, %v1474_v37  ;;  %v4673_v44 = vcombine.high %v1223_v40, %v1227_v41  ;;  %v1319_v36 = vld [vmem:[#allocation6 + $0x318] sm:$0xff] }
 0x41a   :  { %2979 = vmatprep.subr.bf16.mxu0 %v4871_v46  ;;  %v1231_v46 = vld [vmem:[#allocation6 + $0x58] sm:$0xff] }
 0x41b   :  { %v4681_v52 = vcombine.high %v1231_v46, %v1235_v48  ;;  %v1323_v37 = vld [vmem:[#allocation6 + $0x338] sm:$0xff] }
 0x41c   :  { %2898 = vmatpush1.bf16.msra.mxu1 %v4868_v54  ;;  %v1243_v54 = vld [vmem:[#allocation6 + $0xb8] sm:$0xff]  ;;  %v4768_v40 = vcombine.low %v1319_v36, %v1323_v37 }
 0x41d   :  { %2980 = vmatpush1.bf16.msra.mxu0 %v4870_v55  ;;  %2899 = vmatprep.subr.bf16.mxu1 %v4877_v56  ;;  %v4680_v55 = vcombine.low %v1231_v46, %v1235_v48  ;;  %v4689_v56 = vcombine.high %v1239_v53, %v1243_v54  ;;  %v4688_v1 = vcombine.low %v1239_v53, %v1243_v54  ;;  %v1343_v48 = vld [vmem:[#allocation6 + $0x3d8] sm:$0xff] }
 0x41e   :  { %2981 = vmatprep.subr.bf16.mxu0 %v4879_v59  ;;  %v1247_v59 = vld [vmem:[#allocation6 + $0xd8] sm:$0xff] }
 0x41f   :  { %v4697_v3 = vcombine.high %v1247_v59, %v1251_v60  ;;  %v1351_v54 = vld [vmem:[#allocation6 + $0x418] sm:$0xff] }
 0x420   :  { %2900 = vmatpush1.bf16.msra.mxu1 %v4876_v4  ;;  %v1259_v4 = vld [vmem:[#allocation6 + $0x138] sm:$0xff] }
 0x421   :  { %2982 = vmatpush1.bf16.msra.mxu0 %v4878_v6  ;;  %2901 = vmatprep.subr.bf16.mxu1 %v4885_v7  ;;  %v4696_v6 = vcombine.low %v1247_v59, %v1251_v60  ;;  %v4705_v7 = vcombine.high %v1255_v62, %v1259_v4  ;;  %v4704_v13 = vcombine.low %v1255_v62, %v1259_v4  ;;  %v1359_v60 = vld [vmem:[#allocation6 + $0x458] sm:$0xff] }
 0x422   :  { %2983 = vmatprep.subr.bf16.mxu0 %v4887_v10  ;;  %v1263_v10 = vld [vmem:[#allocation6 + $0x158] sm:$0xff] }
 0x423   :  { %v1367_v4 = vld [vmem:[#allocation6 + $0x498] sm:$0xff] }
 0x424   :  { %2902 = vmatpush1.bf16.msra.mxu1 %v4884_v16  ;;  %v4712_v16 = vcombine.low %v1263_v10, %v1267_v11 }
 0x425   :  { %2984 = vmatpush1.bf16.msra.mxu0 %v4886_v5  ;;  %2903 = vmatprep.subr.bf16.mxu1 %v4893_v19  ;;  %v4721_v5 = vcombine.high %v1271_v14, %v1275_v15  ;;  %v1279_v19 = vld [vmem:[#allocation6 + $0x1d8] sm:$0xff] }
 0x426   :  { %2985 = vmatprep.subr.bf16.mxu0 %v4895_v8  ;;  %v1283_v8 = vld [vmem:[#allocation6 + $0x1f8] sm:$0xff] }
 0x427   :  { %v4729_v27 = vcombine.high %v1279_v19, %v1283_v8  ;;  %v1383_v15 = vld [vmem:[#allocation6 + $0x518] sm:$0xff] }
 0x428   :  { %2904 = vmatpush1.bf16.msra.mxu1 %v4892_v28  ;;  %v4728_v28 = vcombine.low %v1279_v19, %v1283_v8  ;;  %v1391_v8 = vld [vmem:[#allocation6 + $0x558] sm:$0xff] }
 0x429   :  { %2986 = vmatpush1.bf16.msra.mxu0 %v4894_v31  ;;  %2905 = vmatprep.subr.bf16.mxu1 %v4901_v9  ;;  %v4737_v31 = vcombine.high %v1287_v45, %v1291_v47  ;;  %v1295_v9 = vld [vmem:[#allocation6 + $0x258] sm:$0xff] }
 0x42a   :  { %2987 = vmatprep.subr.bf16.mxu0 %v4903_v12  ;;  %v1299_v12 = vld [vmem:[#allocation6 + $0x278] sm:$0xff] }
 0x42b   :  { %v4745_v33 = vcombine.high %v1295_v9, %v1299_v12  ;;  %v1403_v45 = vld [vmem:[#allocation6 + $0x5b8] sm:$0xff] }
 0x42c   :  { %2906 = vmatpush1.bf16.msra.mxu1 %v4900_v20  ;;  %v4744_v20 = vcombine.low %v1295_v9, %v1299_v12  ;;  %v1407_v12 = vld [vmem:[#allocation6 + $0x5d8] sm:$0xff] }
 0x42d   :  { %2988 = vmatpush1.bf16.msra.mxu0 %v4902_v21  ;;  %2907 = vmatprep.subr.bf16.mxu1 %v4909_v22  ;;  %v4753_v21 = vcombine.high %v1303_v34, %v1307_v35  ;;  %v1311_v22 = vld [vmem:[#allocation6 + $0x2d8] sm:$0xff] }
 0x42e   :  { %2989 = vmatprep.subr.bf16.mxu0 %v4911_v26  ;;  %v1315_v26 = vld [vmem:[#allocation6 + $0x2f8] sm:$0xff] }
 0x42f   :  { %v4761_v30 = vcombine.high %v1311_v22, %v1315_v26 }
 0x430   :  { %2908 = vmatpush1.bf16.msra.mxu1 %v4908_v63  ;;  %v4760_v63 = vcombine.low %v1311_v22, %v1315_v26 }
 0x431   :  { %2990 = vmatpush1.bf16.msra.mxu0 %v4910_v38  ;;  %2909 = vmatprep.subr.bf16.mxu1 %v4917_v2  ;;  %v4769_v38 = vcombine.high %v1319_v36, %v1323_v37  ;;  %v1327_v2 = vld [vmem:[#allocation6 + $0x358] sm:$0xff] }
 0x432   :  { %2991 = vmatprep.subr.bf16.mxu0 %v4919_v39  ;;  %v1331_v39 = vld [vmem:[#allocation6 + $0x378] sm:$0xff] }
 0x433   :  { %v4777_v41 = vcombine.high %v1327_v2, %v1331_v39 }
 0x434   :  { %2910 = vmatpush1.bf16.msra.mxu1 %v4916_v42  ;;  %v1335_v42 = vld [vmem:[#allocation6 + $0x398] sm:$0xff] }
 0x435   :  { %2992 = vmatpush1.bf16.msra.mxu0 %v4918_v43  ;;  %3002 = vmatprep.subr.bf16.mxu1 %v4673_v44  ;;  %v1339_v43 = vld [vmem:[#allocation6 + $0x3b8] sm:$0xff]  ;;  %v4776_v44 = vcombine.low %v1327_v2, %v1331_v39 }
 0x436   :  { %v4785_v46 = vcombine.high %v1335_v42, %v1339_v43  ;;  %v1415_v39 = vld [vmem:[#allocation6 + $0x618] sm:$0xff] }
 0x437   :  { %2912 = vmatmul.mubr.bf16.vlgmr.msra.gmra.mrb[16].mxu1 %v5854_v24 }
 0x438   :  { %2994 = vmatmul.mubr.bf16.vlgmr.msra.gmra.mrb[8].mxu0 %v5854_v24  ;;  %3003 = vmatpush1.bf16.msra.mxu1 %v4672_v50  ;;  %v1347_v50 = vld [vmem:[#allocation6 + $0x3f8] sm:$0xff] }
 0x439   :  { %3034 = vmatprep.mubr.bf16.mxu1 %v5846_v17  ;;  %3004 = vmatprep.subr.bf16.mxu1 %v4681_v52  ;;  %v4713_v17 = vcombine.high %v1263_v10, %v1267_v11  ;;  %v4784_v52 = vcombine.low %v1335_v42, %v1339_v43  ;;  %v4793_v53 = vcombine.high %v1343_v48, %v1347_v50  ;;  %v1375_v11 = vld [vmem:[#allocation6 + $0x4d8] sm:$0xff] }
 0x43c   :  { %3005 = vmatpush1.bf16.msra.mxu1 %v4680_v55  ;;  %v1355_v55 = vld [vmem:[#allocation6 + $0x438] sm:$0xff] }
 0x43d   :  { %3006 = vmatprep.subr.bf16.mxu1 %v4689_v56  ;;  %v4792_v56 = vcombine.low %v1343_v48, %v1347_v50  ;;  %v4801_v59 = vcombine.high %v1351_v54, %v1355_v55 }
 0x440   :  { %3007 = vmatpush1.bf16.msra.mxu1 %v4688_v1  ;;  %v1363_v1 = vld [vmem:[#allocation6 + $0x478] sm:$0xff] }
 0x441   :  { %3008 = vmatprep.subr.bf16.mxu1 %v4697_v3  ;;  %v4800_v3 = vcombine.low %v1351_v54, %v1355_v55  ;;  %v4809_v62 = vcombine.high %v1359_v60, %v1363_v1  ;;  %v1423_v55 = vld [vmem:[#allocation6 + $0x658] sm:$0xff] }
 0x444   :  { %3009 = vmatpush1.bf16.msra.mxu1 %v4696_v6  ;;  %v1371_v6 = vld [vmem:[#allocation6 + $0x4b8] sm:$0xff] }
 0x445   :  { %3010 = vmatprep.subr.bf16.mxu1 %v4705_v7  ;;  %v4808_v7 = vcombine.low %v1359_v60, %v1363_v1  ;;  %v4817_v10 = vcombine.high %v1367_v4, %v1371_v6 }
 0x448   :  { %3011 = vmatpush1.bf16.msra.mxu1 %v4704_v13  ;;  %v1379_v13 = vld [vmem:[#allocation6 + $0x4f8] sm:$0xff] }
 0x449   :  { %3012 = vmatprep.subr.bf16.mxu1 %v4713_v17  ;;  %v4816_v17 = vcombine.low %v1367_v4, %v1371_v6  ;;  %v4825_v14 = vcombine.high %v1375_v11, %v1379_v13 }
 0x44c   :  { %3013 = vmatpush1.bf16.msra.mxu1 %v4712_v16  ;;  %v1387_v16 = vld [vmem:[#allocation6 + $0x538] sm:$0xff] }
 0x44d   :  { %3014 = vmatprep.subr.bf16.mxu1 %v4721_v5  ;;  %v4824_v5 = vcombine.low %v1375_v11, %v1379_v13  ;;  %v4833_v19 = vcombine.high %v1383_v15, %v1387_v16  ;;  %v1431_v13 = vld [vmem:[#allocation6 + $0x698] sm:$0xff] }
 0x450   :  { %3015 = vmatpush1.bf16.msra.mxu1 %v4720_v25  ;;  %v4832_v25 = vcombine.low %v1383_v15, %v1387_v16 }
 0x451   :  { %3016 = vmatprep.subr.bf16.mxu1 %v4729_v27  ;;  %v1399_v27 = vld [vmem:[#allocation6 + $0x598] sm:$0xff] }
 0x452   :  { %v4848_v26 = vcombine.low %v1399_v27, %v1403_v45 }
 0x454   :  { %3017 = vmatpush1.bf16.msra.mxu1 %v4728_v28  ;;  %v4849_v28 = vcombine.high %v1399_v27, %v1403_v45  ;;  %v1439_v45 = vld [vmem:[#allocation6 + $0x6d8] sm:$0xff] }
 0x455   :  { %3018 = vmatprep.subr.bf16.mxu1 %v4737_v31 }
 0x458   :  { %3019 = vmatpush1.bf16.msra.mxu1 %v4736_v32  ;;  %v1411_v32 = vld [vmem:[#allocation6 + $0x5f8] sm:$0xff] }
 0x459   :  { %3020 = vmatprep.subr.bf16.mxu1 %v4745_v33 }
 0x45c   :  { %3021 = vmatpush1.bf16.msra.mxu1 %v4744_v20 }
 0x45d   :  { %3022 = vmatprep.subr.bf16.mxu1 %v4753_v21 }
 0x460   :  { %3023 = vmatpush1.bf16.msra.mxu1 %v4752_v29 }
 0x461   :  { %3024 = vmatprep.subr.bf16.mxu1 %v4761_v30 }
 0x464   :  { %3025 = vmatpush1.bf16.msra.mxu1 %v4760_v63  ;;  %v4857_v63 = vcombine.high %v1407_v12, %v1411_v32 }
 0x465   :  { %3026 = vmatprep.subr.bf16.mxu1 %v4769_v38 }
 0x468   :  { %3027 = vmatpush1.bf16.msra.mxu1 %v4768_v40  ;;  %v1419_v40 = vld [vmem:[#allocation6 + $0x638] sm:$0xff] }
 0x469   :  { %3028 = vmatprep.subr.bf16.mxu1 %v4777_v41 }
 0x46c   :  { %3029 = vmatpush1.bf16.msra.mxu1 %v4776_v44 }
 0x46d   :  { %3030 = vmatprep.subr.bf16.mxu1 %v4785_v46  ;;  %v4856_v46 = vcombine.low %v1407_v12, %v1411_v32 }
 0x470   :  { %3031 = vmatpush1.bf16.msra.mxu1 %v4784_v52  ;;  %v4865_v52 = vcombine.high %v1415_v39, %v1419_v40 }
 0x471   :  { %3032 = vmatprep.subr.bf16.mxu1 %v4793_v53 }
 0x474   :  { %3033 = vmatpush1.bf16.msra.mxu1 %v4792_v56  ;;  %v1427_v56 = vld [vmem:[#allocation6 + $0x678] sm:$0xff] }
 0x475   :  { %3043 = vmatprep.subr.bf16.mxu1 %v4801_v59 }
 0x477   :  { %3035 = vmatmul.mubr.bf16.vlgmr.msra.gmra.mrb[20].mxu1 %v5852_v23  ;;  %v1395_v23 = vld [vmem:[#allocation6 + $0x578] sm:$0xff] }
 0x478   :  { %3044 = vmatpush1.bf16.msra.mxu1 %v4800_v3  ;;  %3075 = vmatprep.mubr.bf16.mxu1 %v5848_v18  ;;  %v4841_v18 = vcombine.high %v1391_v8, %v1395_v23  ;;  %v4840_v47 = vcombine.low %v1391_v8, %v1395_v23 }
 0x479   :  { %3045 = vmatprep.subr.bf16.mxu1 %v4809_v62  ;;  %v4864_v62 = vcombine.low %v1415_v39, %v1419_v40  ;;  %v1463_v40 = vld [vmem:[#allocation6 + $0x798] sm:$0xff] }
 0x47c   :  { %3046 = vmatpush1.bf16.msra.mxu1 %v4808_v7  ;;  %v4873_v7 = vcombine.high %v1423_v55, %v1427_v56 }
 0x47d   :  { %3047 = vmatprep.subr.bf16.mxu1 %v4817_v10 }
 0x480   :  { %3048 = vmatpush1.bf16.msra.mxu1 %v4816_v17  ;;  %v1435_v17 = vld [vmem:[#allocation6 + $0x6b8] sm:$0xff] }
 0x481   :  { %3049 = vmatprep.subr.bf16.mxu1 %v4825_v14  ;;  %v4880_v32 = vcombine.low %v1431_v13, %v1435_v17 }
 0x484   :  { %3050 = vmatpush1.bf16.msra.mxu1 %v4824_v5 }
 0x485   :  { %3051 = vmatprep.subr.bf16.mxu1 %v4833_v19  ;;  %v4872_v19 = vcombine.low %v1423_v55, %v1427_v56 }
 0x488   :  { %3052 = vmatpush1.bf16.msra.mxu1 %v4832_v25  ;;  %v4881_v25 = vcombine.high %v1431_v13, %v1435_v17 }
 0x489   :  { %3053 = vmatprep.subr.bf16.mxu1 %v4841_v18 }
 0x48a   :  { %v2790_v31 = vpop.f32.mrb[12].mxu1  ;;  %v2831_v9 = vpop.f32.mrb[4].mxu0 }
 0x48b   :  { %v5875_v33 = vadd.f32 %v2831_v9, %v2790_v31  ;;  %v2792_v34 = vpop.f32.mrb[13].mxu1  ;;  %v2833_v35 = vpop.f32.mrb[5].mxu0 }
 0x48c   :  { %v5877_v20 = vadd.f32 %v2833_v35, %v2792_v34  ;;  %3054 = vmatpush1.bf16.msra.mxu1 %v4840_v47  ;;  %v2794_v21 = vpop.f32.mrb[14].mxu1  ;;  %v2835_v22 = vpop.f32.mrb[6].mxu0  ;;  %v1443_v47 = vld [vmem:[#allocation6 + $0x6f8] sm:$0xff] }
 0x48d   :  { %v3084_v29 = vrot.slane %v5875_v33, 4  ;;  %v3132_v30 = vmul.f32 %v5875_v33, %v5875_v33  ;;  %v2795_v36 = vpop.f32.mrb[15].mxu1  ;;  %v2836_v37 = vpop.f32.mrb[7].mxu0  ;;  %3055 = vmatprep.subr.bf16.mxu1 %v4849_v28  ;;  %v4889_v35 = vcombine.high %v1439_v45, %v1443_v47  ;;  %v1447_v22 = vld [vmem:[#allocation6 + $0x718] sm:$0xff] }
 0x48e   :  { %v3090_v38 = vrot.slane %v5877_v20, 4  ;;  %v3133_v2 = vmul.f32 %v5877_v20, %v5877_v20  ;;  %v4888_v36 = vcombine.low %v1439_v45, %v1443_v47 }
 0x48f   :  { %v3085_v41 = vadd.f32 %v3084_v29, %v5875_v33  ;;  %v3140_v42 = vrot.slane %v3132_v30, 4 }
 0x490   :  { %v3091_v43 = vadd.f32 %v3090_v38, %v5877_v20  ;;  %v3146_v44 = vrot.slane %v3133_v2, 4  ;;  %3056 = vmatpush1.bf16.msra.mxu1 %v4848_v26  ;;  %v1451_v26 = vld [vmem:[#allocation6 + $0x738] sm:$0xff] }
 0x491   :  { %v3086_v48 = vrot.slane %v3085_v41, 2  ;;  %v3141_v50 = vadd.f32 %v3140_v42, %v3132_v30  ;;  %3057 = vmatprep.subr.bf16.mxu1 %v4857_v63  ;;  %v4897_v37 = vcombine.high %v1447_v22, %v1451_v26  ;;  %v1455_v63 = vld [vmem:[#allocation6 + $0x758] sm:$0xff] }
 0x492   :  { %v3092_v53 = vrot.slane %v3091_v43, 2  ;;  %v3147_v54 = vadd.f32 %v3146_v44, %v3133_v2  ;;  %v1459_v38 = vld [vmem:[#allocation6 + $0x778] sm:$0xff]  ;;  %v4896_v2 = vcombine.low %v1447_v22, %v1451_v26 }
 0x493   :  { %v3087_v59 = vadd.f32 %v3086_v48, %v3085_v41  ;;  %v3142_v60 = vrot.slane %v3141_v50, 2  ;;  %v4905_v39 = vcombine.high %v1455_v63, %v1459_v38  ;;  %v1467_v41 = vld [vmem:[#allocation6 + $0x7b8] sm:$0xff]  ;;  %v4904_v42 = vcombine.low %v1455_v63, %v1459_v38 }
 0x494   :  { %v3093_v1 = vadd.f32 %v3092_v53, %v3091_v43  ;;  %v3148_v3 = vrot.slane %v3147_v54, 2  ;;  %3058 = vmatpush1.bf16.msra.mxu1 %v4856_v46  ;;  %v4913_v43 = vcombine.high %v1463_v40, %v1467_v41  ;;  %v1471_v44 = vld [vmem:[#allocation6 + $0x7d8] sm:$0xff] }
 0x495   :  { %v3088_v4 = vrot.slane %v3087_v59, 1  ;;  %v3143_v6 = vadd.f32 %v3142_v60, %v3141_v50  ;;  %3059 = vmatprep.subr.bf16.mxu1 %v4865_v52  ;;  %v1475_v46 = vld [vmem:[#allocation6 + $0x7f8] sm:$0xff]  ;;  %v4912_v52 = vcombine.low %v1463_v40, %v1467_v41 }
 0x496   :  { %v3094_v10 = vrot.slane %v3093_v1, 1  ;;  %v3149_v11 = vadd.f32 %v3148_v3, %v3147_v54  ;;  %v4921_v54 = vcombine.high %v1471_v44, %v1475_v46  ;;  %v4920_v55 = vcombine.low %v1471_v44, %v1475_v46 }
 0x497   :  { %v3089_v14 = vadd.f32 %v3088_v4, %v3087_v59  ;;  %v3144_v15 = vrot.slane %v3143_v6, 1 }
 0x498   :  { %v3095_v16 = vadd.f32 %v3094_v10, %v3093_v1  ;;  %v3150_v5 = vrot.slane %v3149_v11, 1  ;;  %3060 = vmatpush1.bf16.msra.mxu1 %v4864_v62 }
 0x499   :  { %v3145_v8 = vadd.f32 %v3144_v15, %v3143_v6  ;;  %v5887_v23 = vmul.f32 0.125, %v3089_v14  ;;  %3061 = vmatprep.subr.bf16.mxu1 %v4873_v7 }
 0x49a   :  { %v3151_v18 = vadd.f32 %v3150_v5, %v3149_v11  ;;  %v5889_v27 = vmul.f32 0.125, %v3095_v16 }
 0x49b   :  { %v3196_v28 = vmul.f32 0.125, %v3145_v8  ;;  %v3204_v31 = vmul.f32 %v5887_v23, %v5887_v23 }
 0x49c   :  { %v3197_v9 = vmul.f32 0.125, %v3151_v18  ;;  %v3205_v12 = vmul.f32 %v5889_v27, %v5889_v27  ;;  %3062 = vmatpush1.bf16.msra.mxu1 %v4872_v19 }
 0x49d   :  { %v3212_v34 = vsub.f32 %v3196_v28, %v3204_v31  ;;  %3063 = vmatprep.subr.bf16.mxu1 %v4881_v25 }
 0x49e   :  { %v3213_v21 = vsub.f32 %v3197_v9, %v3205_v12 }
 0x49f   :  { %v3221_v29 = vadd.f32 0.8, %v3212_v34 }
 0x4a0   :  { %v3222_v30 = vadd.f32 0.8, %v3213_v21  ;;  %3064 = vmatpush1.bf16.msra.mxu1 %v4880_v32 }
 0x4a1   :  { %5453 = vrsqrt.f32 %v3221_v29  ;;  %3065 = vmatprep.subr.bf16.mxu1 %v4889_v35 }
 0x4a2   :  { %5455 = vrsqrt.f32 %v3222_v30 }
 0x4a4   :  { %3066 = vmatpush1.bf16.msra.mxu1 %v4888_v36 }
 0x4a5   :  { %3067 = vmatprep.subr.bf16.mxu1 %v4897_v37 }
 0x4a8   :  { %3068 = vmatpush1.bf16.msra.mxu1 %v4896_v2 }
 0x4a9   :  { %3069 = vmatprep.subr.bf16.mxu1 %v4905_v39 }
 0x4ab   :  { %v5895_v48 = vpop.eup %5453 }
 0x4ac   :  { %v5897_v50 = vpop.eup %5455  ;;  %3070 = vmatpush1.bf16.msra.mxu1 %v4904_v42 }
 0x4ad   :  { %v3245_v53 = vcombine.low %v5895_v48, %v5897_v50  ;;  %3071 = vmatprep.subr.bf16.mxu1 %v4913_v43  ;;  %v5264_v48 = vld [vmem:[#allocation7 + $0x50] ss:$8 sps:$4 sm:$0xff]   ;;  %v5269_v50 = vld [vmem:[#allocation7 + $0x64] ss:$8 sps:$4 sm:$0xff]  }
 0x4b0   :  { %3072 = vmatpush1.bf16.msra.mxu1 %v4912_v52 }
 0x4b1   :  { %3073 = vmatprep.subr.bf16.mxu1 %v4921_v54 }
 0x4b4   :  { %3074 = vmatpush1.bf16.msra.mxu1 %v4920_v55 }
 0x4b7   :  { %3076 = vmatmul.mubr.bf16.vlgmr.msra.gmra.mrb[20].mxu1 %v5854_v24 }
 0x50a   :  { %v5902_v56 = vpop.f32.mrb[16].mxu1 }
 0x50b   :  { %v3096_v59 = vrot.slane %v5902_v56, 4  ;;  %v3134_v60 = vmul.f32 %v5902_v56, %v5902_v56  ;;  %v5907_v1 = vpop.f32.mrb[8].mxu0  ;;  %v5909_v3 = vpop.f32.mrb[17].mxu1 }
 0x50c   :  { %v3108_v62 = vrot.slane %v5907_v1, 4  ;;  %v3136_v4 = vmul.f32 %v5907_v1, %v5907_v1  ;;  %v3102_v6 = vrot.slane %v5909_v3, 4  ;;  %v5915_v7 = vpop.f32.mrb[9].mxu0  ;;  %v2917_v24 = vpop.f32.mrb[18].mxu1  ;;  %v3135_v13 = vmul.f32 %v5909_v3, %v5909_v3 }
 0x50d   :  { %v3097_v10 = vadd.f32 %v3096_v59, %v5902_v56  ;;  %v3152_v11 = vrot.slane %v3134_v60, 4  ;;  %v2999_v17 = vpop.f32.mrb[10].mxu0  ;;  %v2918_v14 = vpop.f32.mrb[19].mxu1  ;;  %v3114_v19 = vrot.slane %v5915_v7, 4  ;;  %v3137_v47 = vmul.f32 %v5915_v7, %v5915_v7 }
 0x50e   :  { %v3109_v15 = vadd.f32 %v3108_v62, %v5907_v1  ;;  %v3164_v16 = vrot.slane %v3136_v4, 4  ;;  %v3103_v5 = vadd.f32 %v3102_v6, %v5909_v3  ;;  %v3000_v8 = vpop.f32.mrb[11].mxu0  ;;  %v3158_v45 = vrot.slane %v3135_v13, 4 }
 0x50f   :  { %v3098_v25 = vrot.slane %v3097_v10, 2  ;;  %v3153_v18 = vadd.f32 %v3152_v11, %v3134_v60  ;;  %v3115_v12 = vadd.f32 %v3114_v19, %v5915_v7  ;;  %v3170_v21 = vrot.slane %v3137_v47, 4 }
 0x510   :  { %v3110_v28 = vrot.slane %v3109_v15, 2  ;;  %v3165_v31 = vadd.f32 %v3164_v16, %v3136_v4  ;;  %v3104_v9 = vrot.slane %v3103_v5, 2  ;;  %v3159_v35 = vadd.f32 %v3158_v45, %v3135_v13 }
 0x511   :  { %v3099_v32 = vadd.f32 %v3098_v25, %v3097_v10  ;;  %v3154_v34 = vrot.slane %v3153_v18, 2  ;;  %v3116_v30 = vrot.slane %v3115_v12, 2  ;;  %v3171_v38 = vadd.f32 %v3170_v21, %v3137_v47 }
 0x512   :  { %v3111_v22 = vadd.f32 %v3110_v28, %v3109_v15  ;;  %v3166_v26 = vrot.slane %v3165_v31, 2  ;;  %v3105_v29 = vadd.f32 %v3104_v9, %v3103_v5  ;;  %v3160_v63 = vrot.slane %v3159_v35, 2 }
 0x513   :  { %v3100_v36 = vrot.slane %v3099_v32, 1  ;;  %v3155_v37 = vadd.f32 %v3154_v34, %v3153_v18  ;;  %v3117_v41 = vadd.f32 %v3116_v30, %v3115_v12  ;;  %v3172_v46 = vrot.slane %v3171_v38, 2  ;;  %v5254_v30 = vld [vmem:[#allocation7 + $0x14] ss:$8 sps:$4 sm:$0xff]  }
 0x514   :  { %v3112_v2 = vrot.slane %v3111_v22, 1  ;;  %v3167_v39 = vadd.f32 %v3166_v26, %v3165_v31  ;;  %v3106_v40 = vrot.slane %v3105_v29, 1  ;;  %v3161_v44 = vadd.f32 %v3160_v63, %v3159_v35  ;;  %v5251_v26 = vld [vmem:[#allocation7 + $0x4] ss:$8 sps:$4 sm:$0xff]  }
 0x515   :  { %v3101_v42 = vadd.f32 %v3100_v36, %v3099_v32  ;;  %v3156_v43 = vrot.slane %v3155_v37, 1  ;;  %v3118_v59 = vrot.slane %v3117_v41, 1  ;;  %v3173_v6 = vadd.f32 %v3172_v46, %v3171_v38  ;;  %4402 = vmatprep.subr.bf16.mxu0 %v5251_v26  ;;  %v5252_v36 = vld [vmem:[#allocation7 + $0x10] ss:$8 sps:$4 sm:$0xff]   ;;  %v5257_v63 = vld [vmem:[#allocation7 + $0x24] ss:$8 sps:$4 sm:$0xff]  }
 0x516   :  { %v3113_v52 = vadd.f32 %v3112_v2, %v3111_v22  ;;  %v3168_v54 = vrot.slane %v3167_v39, 1  ;;  %v3107_v55 = vadd.f32 %v3106_v40, %v3105_v29  ;;  %v3162_v4 = vrot.slane %v3161_v44, 1  ;;  %v5249_v29 = vld [vmem:[#allocation7] ss:$8 sps:$4 sm:$0xff]  }
 0x517   :  { %v3157_v60 = vadd.f32 %v3156_v43, %v3155_v37  ;;  %v5926_v62 = vmul.f32 0.125, %v3101_v42  ;;  %v3119_v13 = vadd.f32 %v3118_v59, %v3117_v41  ;;  %v3174_v16 = vrot.slane %v3173_v6, 1  ;;  %4403 = vmatpush1.bf16.msra.mxu0 %v5249_v29  ;;  %v5255_v2 = vld [vmem:[#allocation7 + $0x20] ss:$8 sps:$4 sm:$0xff]   ;;  %v5260_v42 = vld [vmem:[#allocation7 + $0x34] ss:$8 sps:$4 sm:$0xff]  }
 0x518   :  { %v3169_v24 = vadd.f32 %v3168_v54, %v3167_v39  ;;  %v5928_v10 = vmul.f32 0.125, %v3113_v52  ;;  %v5930_v11 = vmul.f32 0.125, %v3107_v55  ;;  %v3163_v15 = vadd.f32 %v3162_v4, %v3161_v44  ;;  %4404 = vmatprep.subr.bf16.mxu0 %v5254_v30  ;;  %v5258_v52 = vld [vmem:[#allocation7 + $0x30] ss:$8 sps:$4 sm:$0xff]   ;;  %v5263_v55 = vld [vmem:[#allocation7 + $0x44] ss:$8 sps:$4 sm:$0xff]  }
 0x519   :  { %v3198_v17 = vmul.f32 0.125, %v3157_v60  ;;  %v3206_v14 = vmul.f32 %v5926_v62, %v5926_v62  ;;  %v5938_v25 = vmul.f32 0.125, %v3119_v13  ;;  %v3175_v47 = vadd.f32 %v3174_v16, %v3173_v6  ;;  %v5261_v59 = vld [vmem:[#allocation7 + $0x40] ss:$8 sps:$4 sm:$0xff]   ;;  %v5266_v60 = vld [vmem:[#allocation7 + $0x54] ss:$8 sps:$4 sm:$0xff]  }
 0x51a   :  { %v3200_v5 = vmul.f32 0.125, %v3169_v24  ;;  %v3208_v19 = vmul.f32 %v5928_v10, %v5928_v10  ;;  %v3207_v8 = vmul.f32 %v5930_v11, %v5930_v11  ;;  %v3199_v45 = vmul.f32 0.125, %v3163_v15  ;;  %v5272_v4 = vld [vmem:[#allocation7 + $0x74] ss:$8 sps:$4 sm:$0xff]   ;;  %v5270_v6 = vld [vmem:[#allocation7 + $0x70] ss:$8 sps:$4 sm:$0xff]  }
 0x51b   :  { %v3214_v18 = vsub.f32 %v3198_v17, %v3206_v14  ;;  %v3209_v31 = vmul.f32 %v5938_v25, %v5938_v25  ;;  %v3201_v32 = vmul.f32 0.125, %v3175_v47  ;;  %4405 = vmatpush1.bf16.msra.mxu0 %v5252_v36  ;;  %v5950_v43 = vrot.slane %v3245_v53, %v5720_v51  ;;  %v5267_v53 = vld [vmem:[#allocation7 + $0x60] ss:$8 sps:$4 sm:$0xff]   ;;  %v5275_v13 = vld [vmem:[#allocation7 + $0x84] ss:$8 sps:$4 sm:$0xff]  }
 0x51c   :  { %v3216_v28 = vsub.f32 %v3200_v5, %v3208_v19  ;;  %v3215_v12 = vsub.f32 %v3199_v45, %v3207_v8  ;;  %4406 = vmatprep.subr.bf16.mxu0 %v5257_v63  ;;  %v5273_v24 = vld [vmem:[#allocation7 + $0x80] ss:$8 sps:$4 sm:$0xff]   ;;  %v5278_v17 = vld [vmem:[#allocation7 + $0x94] ss:$8 sps:$4 sm:$0xff]   ;;  %v5276_v14 = vld [vmem:[#allocation7 + $0x90] ss:$8 sps:$4 sm:$0xff]  }
 0x51d   :  { %v3223_v9 = vadd.f32 0.8, %v3214_v18  ;;  %v3217_v21 = vsub.f32 %v3201_v32, %v3209_v31  ;;  %v5281_v15 = vld [vmem:[#allocation7 + $0xa4] ss:$8 sps:$4 sm:$0xff]   ;;  %v5279_v16 = vld [vmem:[#allocation7 + $0xa0] ss:$8 sps:$4 sm:$0xff]  }
 0x51e   :  { %v3225_v34 = vadd.f32 0.8, %v3216_v28  ;;  %v3224_v35 = vadd.f32 0.8, %v3215_v12  ;;  %v5284_v5 = vld [vmem:[#allocation7 + $0xb4] ss:$8 sps:$4 sm:$0xff]  }
 0x51f   :  { %5457 = vrsqrt.f32 %v3223_v9  ;;  %v3226_v22 = vadd.f32 0.8, %v3217_v21  ;;  %4407 = vmatpush1.bf16.msra.mxu0 %v5255_v2  ;;  %v5282_v19 = vld [vmem:[#allocation7 + $0xb0] ss:$8 sps:$4 sm:$0xff]   ;;  %v5287_v8 = vld [vmem:[#allocation7 + $0xc4] ss:$8 sps:$4 sm:$0xff]  }
 0x520   :  { %5459 = vrsqrt.f32 %v3225_v34  ;;  %4408 = vmatprep.subr.bf16.mxu0 %v5260_v42  ;;  %v5285_v18 = vld [vmem:[#allocation7 + $0xc0] ss:$8 sps:$4 sm:$0xff]   ;;  %v5290_v45 = vld [vmem:[#allocation7 + $0xd4] ss:$8 sps:$4 sm:$0xff]   ;;  %v5288_v47 = vld [vmem:[#allocation7 + $0xd0] ss:$8 sps:$4 sm:$0xff]  }
 0x521   :  { %5461 = vrsqrt.f32 %v3224_v35  ;;  %v5293_v28 = vld [vmem:[#allocation7 + $0xe4] ss:$8 sps:$4 sm:$0xff]   ;;  %v5291_v31 = vld [vmem:[#allocation7 + $0xe0] ss:$8 sps:$4 sm:$0xff]   ;;  %v5296_v9 = vld [vmem:[#allocation7 + $0xf4] ss:$8 sps:$4 sm:$0xff]  }
 0x522   :  { %5463 = vrsqrt.f32 %v3226_v22  ;;  %v5294_v12 = vld [vmem:[#allocation7 + $0xf0] ss:$8 sps:$4 sm:$0xff]   ;;  %v5299_v32 = vld [vmem:[#allocation7 + $0x104] ss:$8 sps:$4 sm:$0xff]  }
 0x523   :  { %4409 = vmatpush1.bf16.msra.mxu0 %v5258_v52 }
 0x524   :  { %4410 = vmatprep.subr.bf16.mxu0 %v5263_v55 }
 0x527   :  { %4411 = vmatpush1.bf16.msra.mxu0 %v5261_v59 }
 0x528   :  { %4412 = vmatprep.subr.bf16.mxu0 %v5266_v60 }
 0x529   :  { %v5458_v37 = vpop.eup %5457 }
 0x52a   :  { %v5942_v38 = vpop.eup %5459 }
 0x52b   :  { %v5462_v39 = vpop.eup %5461  ;;  %4413 = vmatpush1.bf16.msra.mxu0 %v5264_v48 }
 0x52c   :  { %v3246_v40 = vcombine.low %v5458_v37, %v5462_v39  ;;  %v5944_v41 = vpop.eup %5463  ;;  %4414 = vmatprep.subr.bf16.mxu0 %v5269_v50 }
 0x52d   :  { %v3247_v46 = vcombine.low %v5942_v38, %v5944_v41  ;;  %v3320_v38 = vsub.s32 5, %v5717_v49  ;;  %v3324_v41 = vsub.s32 6, %v5717_v49 }
 0x52e   :  { %v5953_v44 = vrot.slane %v3246_v40, %v5720_v51 }
 0x52f   :  { %4415 = vmatpush1.bf16.msra.mxu0 %v5267_v53 }
 0x530   :  { %v3277_v54 = vcombine.low %v5950_v43, %v5953_v44  ;;  %4416 = vmatprep.subr.bf16.mxu0 %v5272_v4  ;;  %v3405_v43 = vpack.c.bf16 %v5875_v33, %v5875_v33  ;;  %v3406_v44 = vpack.c.bf16 %v5877_v20, %v5877_v20 }
 0x533   :  { %4417 = vmatpush1.bf16.msra.mxu0 %v5270_v6 }
 0x534   :  { %4418 = vmatprep.subr.bf16.mxu0 %v5275_v13 }
 0x537   :  { %4419 = vmatpush1.bf16.msra.mxu0 %v5273_v24 }
 0x538   :  { %4420 = vmatprep.subr.bf16.mxu0 %v5278_v17 }
 0x53b   :  { %4421 = vmatpush1.bf16.msra.mxu0 %v5276_v14 }
 0x53c   :  { %4422 = vmatprep.subr.bf16.mxu0 %v5281_v15 }
 0x53f   :  { %4423 = vmatpush1.bf16.msra.mxu0 %v5279_v16 }
 0x540   :  { %4424 = vmatprep.subr.bf16.mxu0 %v5284_v5 }
 0x543   :  { %4425 = vmatpush1.bf16.msra.mxu0 %v5282_v19 }
 0x544   :  { %4426 = vmatprep.subr.bf16.mxu0 %v5287_v8 }
 0x547   :  { %4427 = vmatpush1.bf16.msra.mxu0 %v5285_v18 }
 0x548   :  { %4428 = vmatprep.subr.bf16.mxu0 %v5290_v45 }
 0x54b   :  { %4429 = vmatpush1.bf16.msra.mxu0 %v5288_v47 }
 0x54c   :  { %4430 = vmatprep.subr.bf16.mxu0 %v5293_v28 }
 0x54f   :  { %4431 = vmatpush1.bf16.msra.mxu0 %v5291_v31 }
 0x550   :  { %4432 = vmatprep.subr.bf16.mxu0 %v5296_v9 }
 0x553   :  { %4433 = vmatpush1.bf16.msra.mxu0 %v5294_v12 }
 0x554   :  { %4443 = vmatprep.subr.bf16.mxu0 %v5299_v32 }
 0x58a   :  { %v5959_v34 = vpop.f32.mrb[20].mxu1 }
 0x58b   :  { %v3120_v35 = vrot.slane %v5959_v34, 4  ;;  %v3138_v21 = vmul.f32 %v5959_v34, %v5959_v34  ;;  %v5964_v22 = vpop.f32.mrb[21].mxu1 }
 0x58c   :  { %v3126_v26 = vrot.slane %v5964_v22, 4  ;;  %v3139_v29 = vmul.f32 %v5964_v22, %v5964_v22  ;;  %v3081_v30 = vpop.f32.mrb[22].mxu1 }
 0x58d   :  { %v3121_v36 = vadd.f32 %v3120_v35, %v5959_v34  ;;  %v3176_v37 = vrot.slane %v3138_v21, 4  ;;  %v3082_v63 = vpop.f32.mrb[23].mxu1 }
 0x58e   :  { %v3127_v2 = vadd.f32 %v3126_v26, %v5964_v22  ;;  %v3182_v39 = vrot.slane %v3139_v29, 4 }
 0x58f   :  { %v3122_v40 = vrot.slane %v3121_v36, 2  ;;  %v3177_v42 = vadd.f32 %v3176_v37, %v3138_v21  ;;  %v3285_v37 = vrot.slane %v3277_v54, %v5720_v51  ;;  %v3408_v54 = vpack.c.bf16 %v5909_v3, %v5909_v3 }
 0x590   :  { %v3128_v52 = vrot.slane %v3127_v2, 2  ;;  %v3183_v55 = vadd.f32 %v3182_v39, %v3139_v29  ;;  %v3269_v29 = vrot.slane %v3247_v46, %v5720_v51  ;;  %v3316_v39 = vsub.s32 4, %v5717_v49 }
 0x591   :  { %v3123_v59 = vadd.f32 %v3122_v40, %v3121_v36  ;;  %v3178_v60 = vrot.slane %v3177_v42, 2  ;;  %v3328_v46 = vsub.s32 7, %v5717_v49 }
 0x592   :  { %v3129_v48 = vadd.f32 %v3128_v52, %v3127_v2  ;;  %v3184_v50 = vrot.slane %v3183_v55, 2  ;;  %v3220_v2 = vld [vmem:[%s6104_s6 + $0xd] sm:$0xff]  ;;  %v3412_v52 = vpack.c.bf16 %v5964_v22, %v5964_v22 }
 0x593   :  { %v3124_v53 = vrot.slane %v3123_v59, 1  ;;  %v3179_v4 = vadd.f32 %v3178_v60, %v3177_v42 }
 0x594   :  { %v3130_v6 = vrot.slane %v3129_v48, 1  ;;  %v3185_v24 = vadd.f32 %v3184_v50, %v3183_v55 }
 0x595   :  { %v3125_v13 = vadd.f32 %v3124_v53, %v3123_v59  ;;  %v3180_v17 = vrot.slane %v3179_v4, 1 }
 0x596   :  { %v3131_v14 = vadd.f32 %v3130_v6, %v3129_v48  ;;  %v3186_v15 = vrot.slane %v3185_v24, 1 }
 0x597   :  { %v3181_v16 = vadd.f32 %v3180_v17, %v3179_v4  ;;  %v3194_v5 = vmul.f32 0.125, %v3125_v13 }
 0x598   :  { %v3187_v19 = vadd.f32 %v3186_v15, %v3185_v24  ;;  %v3195_v8 = vmul.f32 0.125, %v3131_v14 }
 0x599   :  { %v3202_v18 = vmul.f32 0.125, %v3181_v16  ;;  %v3210_v45 = vmul.f32 %v3194_v5, %v3194_v5 }
 0x59a   :  { %v3203_v47 = vmul.f32 0.125, %v3187_v19  ;;  %v3211_v28 = vmul.f32 %v3195_v8, %v3195_v8 }
 0x59b   :  { %v3218_v31 = vsub.f32 %v3202_v18, %v3210_v45 }
 0x59c   :  { %v3219_v9 = vsub.f32 %v3203_v47, %v3211_v28 }
 0x59d   :  { %v3227_v12 = vadd.f32 0.8, %v3218_v31 }
 0x59e   :  { %v3228_v32 = vadd.f32 0.8, %v3219_v9 }
 0x59f   :  { %5465 = vrsqrt.f32 %v3227_v12 }
 0x5a0   :  { %5467 = vrsqrt.f32 %v3228_v32 }
 0x5a9   :  { %v5466_v35 = vpop.eup %5465 }
 0x5aa   :  { %v5468_v21 = vpop.eup %5467 }
 0x5ab   :  { %v3248_v26 = vcombine.low %v5466_v35, %v5468_v21 }
 0x5ad   :  { %v3276_v30 = vrot.slane %v3248_v26, %v5720_v51 }
 0x5af   :  { %v3278_v36 = vcombine.low %v3269_v29, %v3276_v30 }
 0x5b1   :  { %v3292_v63 = vrot.slane %v3278_v36, %v5720_v51 }
 0x5b3   :  { %v3293_v40 = vcombine.low %v3285_v37, %v3292_v63 }
 0x5b5   :  { %v3295_v42 = vmul.f32 %v3293_v40, %v3220_v2 }
 0x5b7   :  { %v3317_v55 = vrot.slane %v3295_v42, %v3316_v39  ;;  %v3321_v59 = vrot.slane %v3295_v42, %v3320_v38  ;;  %v3325_v60 = vrot.slane %v3295_v42, %v3324_v41  ;;  %v3329_v33 = vrot.slane %v3295_v42, %v3328_v46 }
 0x5b8   :  { %v3301_v20 = vrot.slane %v3295_v42, %v5728_v57  ;;  %v3305_v48 = vrot.slane %v3295_v42, %v5731_v58  ;;  %v3309_v3 = vrot.slane %v3295_v42, %v5809_v61  ;;  %v3313_v22 = vrot.slane %v3295_v42, %v5812_v0 }
 0x5b9   :  { %v3342_v50 = vmul.f32 %v3317_v55, %v5928_v10  ;;  %v3343_v53 = vmul.f32 %v3321_v59, %v5938_v25  ;;  %v3344_v4 = vmul.f32 %v3325_v60, %v3194_v5  ;;  %v3345_v6 = vmul.f32 %v3329_v33, %v3195_v8 }
 0x5ba   :  { %v3420_v24 = vpack.c.bf16 %v3329_v33, %v3329_v33  ;;  %v3338_v13 = vmul.f32 %v3301_v20, %v5887_v23  ;;  %v3339_v17 = vmul.f32 %v3305_v48, %v5889_v27  ;;  %v3340_v14 = vmul.f32 %v3309_v3, %v5926_v62 }
 0x5bb   :  { %v3356_v15 = vcombine.low %v3342_v50, %v3343_v53  ;;  %v3357_v16 = vcombine.low %v3344_v4, %v3345_v6  ;;  %v3341_v19 = vmul.f32 %v3313_v22, %v5930_v11  ;;  %v3414_v18 = vpack.c.bf16 %v3305_v48, %v3305_v48 }
 0x5bc   :  { %v3471_v45 = vpack.i.b16 %v3420_v24, %v3420_v24  ;;  %v3354_v47 = vcombine.low %v3338_v13, %v3339_v17  ;;  %v3413_v28 = vpack.c.bf16 %v3301_v20, %v3301_v20  ;;  %v3416_v10 = vpack.c.bf16 %v3313_v22, %v3313_v22 }
 0x5bd   :  { %v3378_v25 = vrot.slane %v3356_v15, %v5720_v51  ;;  %v3385_v5 = vrot.slane %v3357_v16, %v5720_v51  ;;  %v3355_v8 = vcombine.low %v3340_v14, %v3341_v19  ;;  %v3429_v31 = vpack.i.b16 %v3414_v18, %v3414_v18 }
 0x5be   :  { %v3476_v23 = vrot.slane %v3471_v45, %v5728_v57  ;;  %v3364_v27 = vrot.slane %v3354_v47, %v5720_v51  ;;  %v3422_v62 = vpack.i.b16 %v3413_v28, %v3413_v28  ;;  %v3443_v9 = vpack.i.b16 %v3416_v10, %v3416_v10 }
 0x5bf   :  { %v3387_v12 = vcombine.low %v3378_v25, %v3385_v5  ;;  %v3371_v11 = vrot.slane %v3355_v8, %v5720_v51  ;;  %v3434_v32 = vrot.slane %v3429_v31, %v5728_v57  ;;  %v3415_v35 = vpack.c.bf16 %v3309_v3, %v3309_v3 }
 0x5c0   :  { %v6020_v21 = vmul.bf16 %v3476_v23, %v3412_v52  ;;  %v3427_v26 = vrot.slane %v3422_v62, %v5728_v57  ;;  %v3448_v29 = vrot.slane %v3443_v9, %v5728_v57  ;;  %v3418_v30 = vpack.c.bf16 %v3321_v59, %v3321_v59 }
 0x5c1   :  { %v3401_v36 = vrot.slane %v3387_v12, %v5720_v51  ;;  %v3386_v37 = vcombine.low %v3364_v27, %v3371_v11  ;;  %v3478_v63 = vmul.bf16 %v3434_v32, %v3406_v44  ;;  %v3436_v2 = vpack.i.b16 %v3415_v35, %v3415_v35  ;;  %v3296_v44 = vld [vmem:[%s6104_s6 + $0x15] sm:$0xff] }
 0x5c2   :  { %v3477_v40 = vmul.bf16 %v3427_v26, %v3405_v43  ;;  %v3480_v42 = vmul.bf16 %v3448_v29, %v3408_v54  ;;  %v3457_v33 = vpack.i.b16 %v3418_v30, %v3418_v30  ;;  %v3417_v20 = vpack.c.bf16 %v3317_v55, %v3317_v55 }
 0x5c3   :  { %v3407_v48 = vpack.c.bf16 %v5902_v56, %v5902_v56  ;;  %v3394_v52 = vrot.slane %v3386_v37, %v5720_v51  ;;  %v3441_v3 = vrot.slane %v3436_v2, %v5728_v57  ;;  %v3419_v22 = vpack.c.bf16 %v3325_v60, %v3325_v60 }
 0x5c4   :  { %v3410_v59 = vpack.c.bf16 %v5915_v7, %v5915_v7  ;;  %v3462_v43 = vrot.slane %v3457_v33, %v5728_v57  ;;  %v3450_v54 = vpack.i.b16 %v3417_v20, %v3417_v20  ;;  %v3409_v56 = vpack.c.bf16 %v5907_v1, %v5907_v1 }
 0x5c5   :  { %v3402_v50 = vcombine.low %v3394_v52, %v3401_v36  ;;  %v3479_v55 = vmul.bf16 %v3441_v3, %v3407_v48  ;;  %v3464_v53 = vpack.i.b16 %v3419_v22, %v3419_v22  ;;  %v3411_v7 = vpack.c.bf16 %v5959_v34, %v5959_v34  ;;  %v5297_v3 = vld [vmem:[#allocation7 + $0x100] ss:$8 sps:$4 sm:$0xff]   ;;  %v5302_v22 = vld [vmem:[#allocation7 + $0x114] ss:$8 sps:$4 sm:$0xff]  }
 0x5c6   :  { %v3482_v51 = vmul.bf16 %v3462_v43, %v3410_v59  ;;  %v3455_v4 = vrot.slane %v3450_v54, %v5728_v57  ;;  %v5305_v43 = vld [vmem:[#allocation7 + $0x124] ss:$8 sps:$4 sm:$0xff]   ;;  %v5303_v54 = vld [vmem:[#allocation7 + $0x120] ss:$8 sps:$4 sm:$0xff]  }
 0x5c7   :  { %v3404_v60 = vsub.f32 %v3296_v44, %v3402_v50  ;;  %v3469_v6 = vrot.slane %v3464_v53, %v5728_v57  ;;  %v5308_v50 = vld [vmem:[#allocation7 + $0x134] ss:$8 sps:$4 sm:$0xff]   ;;  %v5311_v53 = vld [vmem:[#allocation7 + $0x144] ss:$8 sps:$4 sm:$0xff]  }
 0x5c8   :  { %v3481_v24 = vmul.bf16 %v3455_v4, %v3409_v56  ;;  %v5309_v56 = vld [vmem:[#allocation7 + $0x140] ss:$8 sps:$4 sm:$0xff]   ;;  %v5312_v4 = vld [vmem:[#allocation7 + $0x150] ss:$8 sps:$4 sm:$0xff]  }
 0x5c9   :  { %v3493_v13 = vrot.slane %v3404_v60, %v5731_v58  ;;  %v3489_v17 = vrot.slane %v3404_v60, %v5728_v57  ;;  %v3501_v14 = vrot.slane %v3404_v60, %v5812_v0  ;;  %v3497_v15 = vrot.slane %v3404_v60, %v5809_v61 }
 0x5ca   :  { %v3509_v1 = vrot.slane %v3404_v60, %v3320_v38  ;;  %v3505_v16 = vrot.slane %v3404_v60, %v3316_v39  ;;  %v3517_v19 = vrot.slane %v3404_v60, %v3328_v46  ;;  %v3483_v18 = vmul.bf16 %v3469_v6, %v3411_v7  ;;  %v5315_v6 = vld [vmem:[#allocation7 + $0x160] ss:$8 sps:$4 sm:$0xff]   ;;  %v5320_v7 = vld [vmem:[#allocation7 + $0x174] ss:$8 sps:$4 sm:$0xff]  }
 0x5cb   :  { %v3527_v34 = vpack.c.bf16 %v3493_v13, %v3493_v13  ;;  %v3526_v45 = vpack.c.bf16 %v3489_v17, %v3489_v17  ;;  %v3529_v47 = vpack.c.bf16 %v3501_v14, %v3501_v14  ;;  %v3528_v28 = vpack.c.bf16 %v3497_v15, %v3497_v15  ;;  %v5323_v13 = vld [vmem:[#allocation7 + $0x184] ss:$8 sps:$4 sm:$0xff]   ;;  %v5321_v17 = vld [vmem:[#allocation7 + $0x180] ss:$8 sps:$4 sm:$0xff]   ;;  %v5326_v14 = vld [vmem:[#allocation7 + $0x194] ss:$8 sps:$4 sm:$0xff]  }
 0x5cc   :  { %v3531_v10 = vpack.c.bf16 %v3509_v1, %v3509_v1  ;;  %v3530_v25 = vpack.c.bf16 %v3505_v16, %v3505_v16  ;;  %v3533_v5 = vpack.c.bf16 %v3517_v19, %v3517_v19  ;;  %v3513_v61 = vrot.slane %v3404_v60, %v3324_v41  ;;  %v5317_v60 = vld [vmem:[#allocation7 + $0x164] ss:$8 sps:$4 sm:$0xff]   ;;  %v5324_v15 = vld [vmem:[#allocation7 + $0x190] ss:$8 sps:$4 sm:$0xff]   ;;  %v5327_v16 = vld [vmem:[#allocation7 + $0x1a0] ss:$8 sps:$4 sm:$0xff]  }
 0x5cd   :  { %v3542_v0 = vpack.i.b16 %v3527_v34, %v3527_v34  ;;  %v3535_v8 = vpack.i.b16 %v3526_v45, %v3526_v45  ;;  %v3556_v38 = vpack.i.b16 %v3529_v47, %v3529_v47  ;;  %v3549_v31 = vpack.i.b16 %v3528_v28, %v3528_v28  ;;  %v5329_v1 = vld [vmem:[#allocation7 + $0x1a4] ss:$8 sps:$4 sm:$0xff]   ;;  %v5332_v19 = vld [vmem:[#allocation7 + $0x1b4] ss:$8 sps:$4 sm:$0xff]   ;;  %v5333_v45 = vld [vmem:[#allocation7 + $0x1c0] ss:$8 sps:$4 sm:$0xff]  }
 0x5ce   :  { %v3570_v23 = vpack.i.b16 %v3531_v10, %v3531_v10  ;;  %v3563_v39 = vpack.i.b16 %v3530_v25, %v3530_v25  ;;  %v3584_v27 = vpack.i.b16 %v3533_v5, %v3533_v5  ;;  %v3532_v62 = vpack.c.bf16 %v3513_v61, %v3513_v61  ;;  %v5335_v34 = vld [vmem:[#allocation7 + $0x1c4] ss:$8 sps:$4 sm:$0xff]   ;;  %v5338_v47 = vld [vmem:[#allocation7 + $0x1d4] ss:$8 sps:$4 sm:$0xff]   ;;  %v5336_v28 = vld [vmem:[#allocation7 + $0x1d0] ss:$8 sps:$4 sm:$0xff]  }
 0x5cf   :  { %v3547_v46 = vrot.slane %v3542_v0, %v5728_v57  ;;  %v3540_v9 = vrot.slane %v3535_v8, %v5728_v57  ;;  %v3561_v12 = vrot.slane %v3556_v38, %v5728_v57  ;;  %v3554_v11 = vrot.slane %v3549_v31, %v5728_v57  ;;  %v5341_v10 = vld [vmem:[#allocation7 + $0x1e4] ss:$8 sps:$4 sm:$0xff]   ;;  %v5339_v25 = vld [vmem:[#allocation7 + $0x1e0] ss:$8 sps:$4 sm:$0xff]   ;;  %v5344_v5 = vld [vmem:[#allocation7 + $0x1f4] ss:$8 sps:$4 sm:$0xff]  }
 0x5d0   :  { %v3575_v32 = vrot.slane %v3570_v23, %v5728_v57  ;;  %v3568_v49 = vrot.slane %v3563_v39, %v5728_v57  ;;  %v3589_v41 = vrot.slane %v3584_v27, %v5728_v57  ;;  %v3577_v35 = vpack.i.b16 %v3532_v62, %v3532_v62  ;;  %v5342_v61 = vld [vmem:[#allocation7 + $0x1f0] ss:$8 sps:$4 sm:$0xff]   ;;  %v5347_v0 = vld [vmem:[#allocation7 + $0x204] ss:$8 sps:$4 sm:$0xff]   ;;  %v5345_v31 = vld [vmem:[#allocation7 + $0x200] ss:$8 sps:$4 sm:$0xff]  }
 0x5d1   :  { %v3591_v26 = vadd.bf16 %v3547_v46, %v3478_v63  ;;  %v3590_v29 = vadd.bf16 %v3540_v9, %v3477_v40  ;;  %v3593_v30 = vadd.bf16 %v3561_v12, %v3480_v42  ;;  %v6060_v36 = vadd.bf16 %v3554_v11, %v3479_v55  ;;  %v5306_v55 = vld [vmem:[#allocation7 + $0x130] ss:$8 sps:$4 sm:$0xff]   ;;  %v5350_v23 = vld [vmem:[#allocation7 + $0x214] ss:$8 sps:$4 sm:$0xff]   ;;  %v5353_v46 = vld [vmem:[#allocation7 + $0x224] ss:$8 sps:$4 sm:$0xff]  }
 0x5d2   :  { %v6062_v37 = vadd.bf16 %v3575_v32, %v3482_v51  ;;  %v6064_v2 = vadd.bf16 %v3568_v49, %v3481_v24  ;;  %v6067_v33 = vadd.bf16 %v3589_v41, %v6020_v21  ;;  %v3582_v20 = vrot.slane %v3577_v35, %v5728_v57  ;;  %v5300_v21 = vld [vmem:[#allocation7 + $0x110] ss:$8 sps:$4 sm:$0xff]   ;;  %v5314_v51 = vld [vmem:[#allocation7 + $0x154] ss:$8 sps:$4 sm:$0xff]   ;;  %v5351_v9 = vld [vmem:[#allocation7 + $0x220] ss:$8 sps:$4 sm:$0xff]  }
 0x5d3   :  { %vm3599_vm8 = vcmp.gt.bf16.partialorder %v3591_v26, 0  ;;  %v3607_v48 = vmul.bf16 1045249613, %v3591_v26  ;;  %vm3598_vm9 = vcmp.gt.bf16.partialorder %v3590_v29, 0  ;;  %v3606_v52 = vmul.bf16 1045249613, %v3590_v29 }
 0x5d4   :  { %vm3601_vm10 = vcmp.gt.bf16.partialorder %v3593_v30, 0  ;;  %v3609_v63 = vmul.bf16 1045249613, %v3593_v30  ;;  %v6070_v44 = vadd.bf16 %v3582_v20, %v3483_v18  ;;  %v5318_v24 = vld [vmem:[#allocation7 + $0x170] ss:$8 sps:$4 sm:$0xff]   ;;  %vm3600_vm11 = vcmp.gt.bf16.partialorder %v6060_v36, 0 }
 0x5d5   :  { %v3615_v40 = vsel %vm3599_vm8, %v3591_v26, %v3607_v48  ;;  %v3614_v42 = vsel %vm3598_vm9, %v3590_v29, %v3606_v52  ;;  %v5330_v18 = vld [vmem:[#allocation7 + $0x1b0] ss:$8 sps:$4 sm:$0xff]   ;;  %v3608_v8 = vmul.bf16 1045249613, %v6060_v36  ;;  %v3611_v38 = vmul.bf16 1045249613, %v6062_v37 }
 0x5d6   :  { %4434 = vmatprep.mubr.bf16.mxu0 %v3615_v40  ;;  %v3617_v59 = vsel %vm3601_vm10, %v3593_v30, %v3609_v63  ;;  %vm3603_vm12 = vcmp.gt.bf16.partialorder %v6062_v37, 0  ;;  %v5348_v62 = vld [vmem:[#allocation7 + $0x210] ss:$8 sps:$4 sm:$0xff]   ;;  %v5356_v12 = vld [vmem:[#allocation7 + $0x234] ss:$8 sps:$4 sm:$0xff]   ;;  %vm3602_vm13 = vcmp.gt.bf16.partialorder %v6064_v2, 0 }
 0x5d7   :  { %4435 = vmatmul.mubr.bf16.vlgmr.msra.gmra.mrb[12].mxu0 %v3614_v42  ;;  %v3616_v39 = vsel %vm3600_vm11, %v6060_v36, %v3608_v8  ;;  %v3619_v27 = vsel %vm3603_vm12, %v6062_v37, %v3611_v38  ;;  %v5354_v11 = vld [vmem:[#allocation7 + $0x230] ss:$8 sps:$4 sm:$0xff]   ;;  %v5359_v32 = vld [vmem:[#allocation7 + $0x244] ss:$8 sps:$4 sm:$0xff]   ;;  %v5357_v49 = vld [vmem:[#allocation7 + $0x240] ss:$8 sps:$4 sm:$0xff]  }
 0x5d8   :  { %4444 = vmatpush1.bf16.msra.mxu0 %v5297_v3  ;;  %4475 = vmatprep.mubr.bf16.mxu0 %v3617_v59  ;;  %v5362_v41 = vld [vmem:[#allocation7 + $0x254] ss:$8 sps:$4 sm:$0xff]   ;;  %v5360_v35 = vld [vmem:[#allocation7 + $0x250] ss:$8 sps:$4 sm:$0xff]   ;;  %v5365_v26 = vld [vmem:[#allocation7 + $0x264] ss:$8 sps:$4 sm:$0xff]  }
 0x5d9   :  { %4445 = vmatprep.subr.bf16.mxu0 %v5302_v22  ;;  %v5363_v29 = vld [vmem:[#allocation7 + $0x260] ss:$8 sps:$4 sm:$0xff]   ;;  %v5368_v30 = vld [vmem:[#allocation7 + $0x274] ss:$8 sps:$4 sm:$0xff]   ;;  %v5366_v36 = vld [vmem:[#allocation7 + $0x270] ss:$8 sps:$4 sm:$0xff]  }
 0x5da   :  { %v5371_v37 = vld [vmem:[#allocation7 + $0x284] ss:$8 sps:$4 sm:$0xff]   ;;  %v5369_v20 = vld [vmem:[#allocation7 + $0x280] ss:$8 sps:$4 sm:$0xff]   ;;  %v5374_v48 = vld [vmem:[#allocation7 + $0x294] ss:$8 sps:$4 sm:$0xff]  }
 0x5db   :  { %v5372_v52 = vld [vmem:[#allocation7 + $0x290] ss:$8 sps:$4 sm:$0xff]   ;;  %v5377_v3 = vld [vmem:[#allocation7 + $0x2a4] ss:$8 sps:$4 sm:$0xff]   ;;  %v5375_v63 = vld [vmem:[#allocation7 + $0x2a0] ss:$8 sps:$4 sm:$0xff]  }
 0x5dc   :  { %4446 = vmatpush1.bf16.msra.mxu0 %v5300_v21  ;;  %v5380_v40 = vld [vmem:[#allocation7 + $0x2b4] ss:$8 sps:$4 sm:$0xff]   ;;  %v5378_v42 = vld [vmem:[#allocation7 + $0x2b0] ss:$8 sps:$4 sm:$0xff]   ;;  %v5383_v22 = vld [vmem:[#allocation7 + $0x2c4] ss:$8 sps:$4 sm:$0xff]  }
 0x5dd   :  { %4447 = vmatprep.subr.bf16.mxu0 %v5305_v43  ;;  %v5381_v59 = vld [vmem:[#allocation7 + $0x2c0] ss:$8 sps:$4 sm:$0xff]   ;;  %v5386_v21 = vld [vmem:[#allocation7 + $0x2d4] ss:$8 sps:$4 sm:$0xff]   ;;  %v5384_v43 = vld [vmem:[#allocation7 + $0x2d0] ss:$8 sps:$4 sm:$0xff]  }
 0x5de   :  { %vm3605_vm14 = vcmp.gt.bf16.partialorder %v6067_v33, 0  ;;  %v5428_v8 = vld [vmem:[#allocation7 + $0x3b4] ss:$8 sps:$4 sm:$0xff]   ;;  %v5426_v38 = vld [vmem:[#allocation7 + $0x3b0] ss:$8 sps:$4 sm:$0xff]   ;;  %vm3604_vm15 = vcmp.gt.bf16.partialorder %v6070_v44, 0 }
 0x5e0   :  { %4448 = vmatpush1.bf16.msra.mxu0 %v5303_v54  ;;  %v5389_v54 = vld [vmem:[#allocation7 + $0x2e4] ss:$8 sps:$4 sm:$0xff]  }
 0x5e1   :  { %4449 = vmatprep.subr.bf16.mxu0 %v5308_v50  ;;  %v5387_v50 = vld [vmem:[#allocation7 + $0x2e0] ss:$8 sps:$4 sm:$0xff]  }
 0x5e4   :  { %4450 = vmatpush1.bf16.msra.mxu0 %v5306_v55  ;;  %v5392_v55 = vld [vmem:[#allocation7 + $0x2f4] ss:$8 sps:$4 sm:$0xff]  }
 0x5e5   :  { %4451 = vmatprep.subr.bf16.mxu0 %v5311_v53  ;;  %v5390_v53 = vld [vmem:[#allocation7 + $0x2f0] ss:$8 sps:$4 sm:$0xff]  }
 0x5e8   :  { %4452 = vmatpush1.bf16.msra.mxu0 %v5309_v56  ;;  %v5395_v56 = vld [vmem:[#allocation7 + $0x304] ss:$8 sps:$4 sm:$0xff]  }
 0x5e9   :  { %4453 = vmatprep.subr.bf16.mxu0 %v5314_v51  ;;  %v3610_v51 = vmul.bf16 1045249613, %v6064_v2 }
 0x5ec   :  { %4454 = vmatpush1.bf16.msra.mxu0 %v5312_v4  ;;  %v3613_v4 = vmul.bf16 1045249613, %v6067_v33 }
 0x5ed   :  { %4455 = vmatprep.subr.bf16.mxu0 %v5317_v60  ;;  %v5393_v60 = vld [vmem:[#allocation7 + $0x300] ss:$8 sps:$4 sm:$0xff]  }
 0x5f0   :  { %4456 = vmatpush1.bf16.msra.mxu0 %v5315_v6  ;;  %v5398_v6 = vld [vmem:[#allocation7 + $0x314] ss:$8 sps:$4 sm:$0xff]  }
 0x5f1   :  { %4457 = vmatprep.subr.bf16.mxu0 %v5320_v7  ;;  %v3618_v7 = vsel %vm3602_vm13, %v6064_v2, %v3610_v51  ;;  %v5410_v2 = vld [vmem:[#allocation7 + $0x354] ss:$8 sps:$4 sm:$0xff]  }
 0x5f4   :  { %4458 = vmatpush1.bf16.msra.mxu0 %v5318_v24  ;;  %v3621_v24 = vsel %vm3605_vm14, %v6067_v33, %v3613_v4  ;;  %v5413_v33 = vld [vmem:[#allocation7 + $0x364] ss:$8 sps:$4 sm:$0xff]  }
 0x5f5   :  { %4459 = vmatprep.subr.bf16.mxu0 %v5323_v13  ;;  %v5396_v13 = vld [vmem:[#allocation7 + $0x310] ss:$8 sps:$4 sm:$0xff]  }
 0x5f8   :  { %4460 = vmatpush1.bf16.msra.mxu0 %v5321_v17  ;;  %v5401_v17 = vld [vmem:[#allocation7 + $0x324] ss:$8 sps:$4 sm:$0xff]  }
 0x5f9   :  { %4461 = vmatprep.subr.bf16.mxu0 %v5326_v14  ;;  %v5399_v14 = vld [vmem:[#allocation7 + $0x320] ss:$8 sps:$4 sm:$0xff]  }
 0x5fc   :  { %4462 = vmatpush1.bf16.msra.mxu0 %v5324_v15  ;;  %v5404_v15 = vld [vmem:[#allocation7 + $0x334] ss:$8 sps:$4 sm:$0xff]  }
 0x5fd   :  { %4463 = vmatprep.subr.bf16.mxu0 %v5329_v1  ;;  %v5402_v1 = vld [vmem:[#allocation7 + $0x330] ss:$8 sps:$4 sm:$0xff]  }
 0x600   :  { %4464 = vmatpush1.bf16.msra.mxu0 %v5327_v16  ;;  %v5407_v16 = vld [vmem:[#allocation7 + $0x344] ss:$8 sps:$4 sm:$0xff]  }
 0x601   :  { %4465 = vmatprep.subr.bf16.mxu0 %v5332_v19  ;;  %v5405_v19 = vld [vmem:[#allocation7 + $0x340] ss:$8 sps:$4 sm:$0xff]  }
 0x604   :  { %4466 = vmatpush1.bf16.msra.mxu0 %v5330_v18  ;;  %v5408_v18 = vld [vmem:[#allocation7 + $0x350] ss:$8 sps:$4 sm:$0xff]  }
 0x605   :  { %4467 = vmatprep.subr.bf16.mxu0 %v5335_v34  ;;  %v5411_v34 = vld [vmem:[#allocation7 + $0x360] ss:$8 sps:$4 sm:$0xff]  }
 0x608   :  { %4468 = vmatpush1.bf16.msra.mxu0 %v5333_v45  ;;  %v5416_v45 = vld [vmem:[#allocation7 + $0x374] ss:$8 sps:$4 sm:$0xff]  }
 0x609   :  { %4469 = vmatprep.subr.bf16.mxu0 %v5338_v47  ;;  %v5414_v47 = vld [vmem:[#allocation7 + $0x370] ss:$8 sps:$4 sm:$0xff]  }
 0x60c   :  { %4470 = vmatpush1.bf16.msra.mxu0 %v5336_v28  ;;  %v5419_v28 = vld [vmem:[#allocation7 + $0x384] ss:$8 sps:$4 sm:$0xff]  }
 0x60d   :  { %4471 = vmatprep.subr.bf16.mxu0 %v5341_v10  ;;  %v5417_v10 = vld [vmem:[#allocation7 + $0x380] ss:$8 sps:$4 sm:$0xff]  }
 0x610   :  { %4472 = vmatpush1.bf16.msra.mxu0 %v5339_v25  ;;  %v5422_v25 = vld [vmem:[#allocation7 + $0x394] ss:$8 sps:$4 sm:$0xff]  }
 0x611   :  { %4473 = vmatprep.subr.bf16.mxu0 %v5344_v5  ;;  %v5420_v5 = vld [vmem:[#allocation7 + $0x390] ss:$8 sps:$4 sm:$0xff]  }
 0x614   :  { %4474 = vmatpush1.bf16.msra.mxu0 %v5342_v61  ;;  %v5425_v61 = vld [vmem:[#allocation7 + $0x3a4] ss:$8 sps:$4 sm:$0xff]  }
 0x615   :  { %4484 = vmatprep.subr.bf16.mxu0 %v5347_v0  ;;  %v5423_v0 = vld [vmem:[#allocation7 + $0x3a0] ss:$8 sps:$4 sm:$0xff]  }
 0x617   :  { %4476 = vmatmul.mubr.bf16.vlgmr.msra.gmra.mrb[12].mxu0 %v3616_v39  ;;  %v5434_v39 = vld [vmem:[#allocation7 + $0x3d4] ss:$8 sps:$4 sm:$0xff]  }
 0x618   :  { %4485 = vmatpush1.bf16.msra.mxu0 %v5345_v31  ;;  %4516 = vmatprep.mubr.bf16.mxu0 %v3619_v27  ;;  %v5431_v31 = vld [vmem:[#allocation7 + $0x3c4] ss:$8 sps:$4 sm:$0xff]   ;;  %v5432_v27 = vld [vmem:[#allocation7 + $0x3d0] ss:$8 sps:$4 sm:$0xff]  }
 0x619   :  { %4486 = vmatprep.subr.bf16.mxu0 %v5350_v23  ;;  %v5429_v23 = vld [vmem:[#allocation7 + $0x3c0] ss:$8 sps:$4 sm:$0xff]  }
 0x61c   :  { %4487 = vmatpush1.bf16.msra.mxu0 %v5348_v62  ;;  %v5437_v62 = vld [vmem:[#allocation7 + $0x3e4] ss:$8 sps:$4 sm:$0xff]  }
 0x61d   :  { %4488 = vmatprep.subr.bf16.mxu0 %v5353_v46  ;;  %v5435_v46 = vld [vmem:[#allocation7 + $0x3e0] ss:$8 sps:$4 sm:$0xff]  }
 0x620   :  { %4489 = vmatpush1.bf16.msra.mxu0 %v5351_v9  ;;  %v5440_v9 = vld [vmem:[#allocation7 + $0x3f4] ss:$8 sps:$4 sm:$0xff]  }
 0x621   :  { %4490 = vmatprep.subr.bf16.mxu0 %v5356_v12  ;;  %v5438_v12 = vld [vmem:[#allocation7 + $0x3f0] ss:$8 sps:$4 sm:$0xff]  }
 0x624   :  { %4491 = vmatpush1.bf16.msra.mxu0 %v5354_v11  ;;  %v3612_v11 = vmul.bf16 1045249613, %v6070_v44 }
 0x625   :  { %4492 = vmatprep.subr.bf16.mxu0 %v5359_v32 }
 0x626   :  { %v3620_v32 = vsel %vm3604_vm15, %v6070_v44, %v3612_v11 }
 0x628   :  { %4493 = vmatpush1.bf16.msra.mxu0 %v5357_v49  ;;  %v3750_v49 = vld [vmem:[%s6104_s6 + $0x1d] sm:$0x3] }
 0x629   :  { %4494 = vmatprep.subr.bf16.mxu0 %v5362_v41  ;;  %v3755_v41 = vrot.slane %v3750_v49, %v5728_v57 }
 0x62c   :  { %4495 = vmatpush1.bf16.msra.mxu0 %v5360_v35  ;;  %v3759_v35 = vrot.slane %v3750_v49, %v5731_v58 }
 0x62d   :  { %4496 = vmatprep.subr.bf16.mxu0 %v5365_v26 }
 0x630   :  { %4497 = vmatpush1.bf16.msra.mxu0 %v5363_v29 }
 0x631   :  { %4498 = vmatprep.subr.bf16.mxu0 %v5368_v30 }
 0x634   :  { %4499 = vmatpush1.bf16.msra.mxu0 %v5366_v36 }
 0x635   :  { %4500 = vmatprep.subr.bf16.mxu0 %v5371_v37 }
 0x638   :  { %4501 = vmatpush1.bf16.msra.mxu0 %v5369_v20 }
 0x639   :  { %4502 = vmatprep.subr.bf16.mxu0 %v5374_v48 }
 0x63c   :  { %4503 = vmatpush1.bf16.msra.mxu0 %v5372_v52 }
 0x63d   :  { %4504 = vmatprep.subr.bf16.mxu0 %v5377_v3 }
 0x640   :  { %4505 = vmatpush1.bf16.msra.mxu0 %v5375_v63 }
 0x641   :  { %4506 = vmatprep.subr.bf16.mxu0 %v5380_v40 }
 0x644   :  { %4507 = vmatpush1.bf16.msra.mxu0 %v5378_v42 }
 0x645   :  { %4508 = vmatprep.subr.bf16.mxu0 %v5383_v22 }
 0x648   :  { %4509 = vmatpush1.bf16.msra.mxu0 %v5381_v59 }
 0x649   :  { %4510 = vmatprep.subr.bf16.mxu0 %v5386_v21 }
 0x64c   :  { %4511 = vmatpush1.bf16.msra.mxu0 %v5384_v43 }
 0x64d   :  { %4512 = vmatprep.subr.bf16.mxu0 %v5389_v54 }
 0x650   :  { %4513 = vmatpush1.bf16.msra.mxu0 %v5387_v50 }
 0x651   :  { %4514 = vmatprep.subr.bf16.mxu0 %v5392_v55 }
 0x654   :  { %4515 = vmatpush1.bf16.msra.mxu0 %v5390_v53 }
 0x655   :  { %4525 = vmatprep.subr.bf16.mxu0 %v5395_v56 }
 0x657   :  { %4517 = vmatmul.mubr.bf16.vlgmr.msra.gmra.mrb[12].mxu0 %v3618_v7 }
 0x658   :  { %4526 = vmatpush1.bf16.msra.mxu0 %v5393_v60  ;;  %4557 = vmatprep.mubr.bf16.mxu0 %v3621_v24 }
 0x659   :  { %4527 = vmatprep.subr.bf16.mxu0 %v5398_v6 }
 0x65c   :  { %4528 = vmatpush1.bf16.msra.mxu0 %v5396_v13 }
 0x65d   :  { %4529 = vmatprep.subr.bf16.mxu0 %v5401_v17 }
 0x660   :  { %4530 = vmatpush1.bf16.msra.mxu0 %v5399_v14 }
 0x661   :  { %4531 = vmatprep.subr.bf16.mxu0 %v5404_v15 }
 0x664   :  { %4532 = vmatpush1.bf16.msra.mxu0 %v5402_v1 }
 0x665   :  { %4533 = vmatprep.subr.bf16.mxu0 %v5407_v16 }
 0x668   :  { %4534 = vmatpush1.bf16.msra.mxu0 %v5405_v19 }
 0x669   :  { %4535 = vmatprep.subr.bf16.mxu0 %v5410_v2 }
 0x66c   :  { %4536 = vmatpush1.bf16.msra.mxu0 %v5408_v18 }
 0x66d   :  { %4537 = vmatprep.subr.bf16.mxu0 %v5413_v33 }
 0x670   :  { %4538 = vmatpush1.bf16.msra.mxu0 %v5411_v34 }
 0x671   :  { %4539 = vmatprep.subr.bf16.mxu0 %v5416_v45 }
 0x674   :  { %4540 = vmatpush1.bf16.msra.mxu0 %v5414_v47 }
 0x675   :  { %4541 = vmatprep.subr.bf16.mxu0 %v5419_v28 }
 0x678   :  { %4542 = vmatpush1.bf16.msra.mxu0 %v5417_v10 }
 0x679   :  { %4543 = vmatprep.subr.bf16.mxu0 %v5422_v25 }
 0x67c   :  { %4544 = vmatpush1.bf16.msra.mxu0 %v5420_v5 }
 0x67d   :  { %4545 = vmatprep.subr.bf16.mxu0 %v5425_v61 }
 0x680   :  { %4546 = vmatpush1.bf16.msra.mxu0 %v5423_v0 }
 0x681   :  { %4547 = vmatprep.subr.bf16.mxu0 %v5428_v8 }
 0x684   :  { %4548 = vmatpush1.bf16.msra.mxu0 %v5426_v38 }
 0x685   :  { %4549 = vmatprep.subr.bf16.mxu0 %v5431_v31 }
 0x688   :  { %4550 = vmatpush1.bf16.msra.mxu0 %v5429_v23 }
 0x689   :  { %4551 = vmatprep.subr.bf16.mxu0 %v5434_v39 }
 0x68c   :  { %4552 = vmatpush1.bf16.msra.mxu0 %v5432_v27 }
 0x68d   :  { %4553 = vmatprep.subr.bf16.mxu0 %v5437_v62 }
 0x690   :  { %4554 = vmatpush1.bf16.msra.mxu0 %v5435_v46 }
 0x691   :  { %4555 = vmatprep.subr.bf16.mxu0 %v5440_v9 }
 0x694   :  { %4556 = vmatpush1.bf16.msra.mxu0 %v5438_v12 }
 0x697   :  { %4558 = vmatmul.mubr.bf16.vlgmr.msra.gmra.mrb[12].mxu0 %v3620_v32 }
 0x76a   :  { %v4559_v26 = vpop.f32.mrb[12].mxu0 }
 0x76b   :  { %v5081_v29 = vadd.f32 %v4559_v26, %v3755_v41  ;;  %v4561_v30 = vpop.f32.mrb[13].mxu0 }
 0x76c   :  { %v5082_v36 = vadd.f32 %v4561_v30, %v3759_v35  ;;  %v4563_v37 = vpop.f32.mrb[14].mxu0 }
 0x76d   :  { %5469 = vtanh.f32 %v5081_v29  ;;  %v4564_v20 = vpop.f32.mrb[15].mxu0 }
 0x76e   :  { %5471 = vtanh.f32 %v5082_v36 }
 0x777   :  { %v5470_v48 = vpop.eup %5469 }
 0x778   :  { %v5472_v52 = vpop.eup %5471  ;;  %4568 = vst [vmem:[%s6105_s7] sm:$0xff] %v5470_v48 }
 0x779   :  { %4569 = vst [vmem:[%s6105_s7 + $0x8] sm:$0xff] %v5472_v52 }
 0x77a   :  { %4574 = vsyncpa [#allocation3], 1 }
 0x77b   :  { %4575 = vsyncpa [#allocation5], 1 }
 0x77c   :  { %4576 = vsyncpa [#allocation8], 1 }

</bundles_post_ra>
